<compile_context>
chip_gen: v5e
topology: v5e:2x2
jax: 0.10.0
libtpu: 0.0.40
codegen_flags: <defaults>
</compile_context>

<pallas_src>
import math

import jax
import jax.numpy as jnp
from jax import lax
from jax.experimental import pallas as pl
from jax.experimental.pallas import tpu as pltpu

IN_FEAT = 5
K1 = IN_FEAT + 1          # feature rows + constant-1 row (folds in b1)
HIDDEN = 64
OUT_FEAT = 256
DT = 0.1


def _atan_f32(z):
    """float32 atan(z): Cephes atanf range reduction + minimax polynomial."""
    sign = jnp.where(z >= 0.0, 1.0, -1.0).astype(jnp.float32)
    a = jnp.abs(z)

    big = a > 2.414213562373095      # tan(3*pi/8)
    mid = a > 0.4142135623730950     # tan(pi/8)

    a_safe = jnp.maximum(a, 1e-30)
    x_big = -1.0 / a_safe
    x_mid = (a - 1.0) / (a + 1.0)
    xr = jnp.where(big, x_big, jnp.where(mid, x_mid, a))
    off = jnp.where(big, jnp.float32(math.pi / 2),
                    jnp.where(mid, jnp.float32(math.pi / 4), jnp.float32(0.0)))

    zz = xr * xr
    p = (((8.05374449538e-2 * zz - 1.38776856032e-1) * zz
          + 1.99777106478e-1) * zz - 3.33329491539e-1)
    return sign * (off + (p * zz * xr + xr))


def future_encoder_kernel(xy_ref, w1e_ref, w2t_ref, b2_ref, o_ref):
    # xy_ref : (2*(T+1), GT)  rows 0..T   = x (current x first, then traj x)
    #                         rows T+1..  = y (current y first, then traj y)
    # w1e_ref: (HIDDEN, 6)    [W1^T | b1^T]           (f32)
    # w2t_ref: (OUT_FEAT, HIDDEN) = W2^T              (bf16)
    # b2_ref : (OUT_FEAT, 1)                          (f32)
    # o_ref  : (OUT_FEAT, GT)                         (f32)
    t1 = xy_ref.shape[0] // 2          # T + 1
    t = t1 - 1
    gt = xy_ref.shape[1]

    xs = xy_ref[0:t1, :]               # (T+1, GT)
    ys = xy_ref[t1:2 * t1, :]          # (T+1, GT)
    x = xs[1:, :]                      # (T, GT)   raw trajectory x
    y = ys[1:, :]                      # (T, GT)   raw trajectory y
    dx = x - xs[:t, :]                 # (T, GT)   per-step displacement
    dy = y - ys[:t, :]
    vx = dx * (1.0 / DT)
    vy = dy * (1.0 / DT)
    theta = _atan_f32(dy / jnp.maximum(dx, 1e-6))   # torch .clamp(min=1e-6)

    ones = jnp.ones((1, gt), jnp.float32)           # hoisted (bias row)
    w1e = w1e_ref[...]                               # (HIDDEN, 6)  f32
    w2t = w2t_ref[...]                               # (OUT, HIDDEN) bf16

    # Fused time loop: small K=6 matmul -> ReLU -> bf16 -> 64->256 matmul ->
    # running max straight into the output block (no (GT*T, 256) intermediate).
    for step in range(t):
        feat_t = jnp.concatenate(
            [x[step:step + 1, :], y[step:step + 1, :], theta[step:step + 1, :],
             vx[step:step + 1, :], vy[step:step + 1, :], ones], axis=0)  # (6, GT)
        h = jnp.dot(w1e, feat_t, preferred_element_type=jnp.float32)     # (64, GT)
        h = jnp.maximum(h, 0.0).astype(jnp.bfloat16)
        yt = jnp.dot(w2t, h, preferred_element_type=jnp.float32)         # (256, GT)
        if step == 0:
            o_ref[...] = yt
        else:
            o_ref[...] = jnp.maximum(o_ref[...], yt)

    # b2 is constant over time: add once after the max.
    o_ref[...] = o_ref[...] + b2_ref[...]


def future_encoder(trajs, current_states, params, group_tile=512):
    B, A, M, T, C = trajs.shape
    assert C == 2
    G = B * A * M

    # Lane-dense group tiling: GT is a multiple of 128 (vreg lane width).
    g128 = ((G + 127) // 128) * 128
    GT = max(128, min(group_tile, g128) // 128 * 128)
    # NOTE(v7x): if this leaves a single grid step, halving GT enables megacore
    # sharding across the 2 TensorCores; left as-is so v5e/v6e keep the big tile.
    G_pad = ((G + GT - 1) // GT) * GT

    # Host prep (layout only): prepend current xy, transpose so groups land on
    # the lane axis -> (2*(T+1), G_pad).  This small transposed copy is ~13% of
    # the output bytes; the pallas kernel does all of state_process + MLP + max.
    cur_xy = jnp.broadcast_to(current_states[:, :, None, :2], (B, A, M, 2))
    cur_xy = cur_xy.reshape(G, 1, 2)
    xy = jnp.concatenate([cur_xy, trajs.reshape(G, T, 2)], axis=1)    # (G, T+1, 2)
    xyt = jnp.transpose(xy, (2, 1, 0)).reshape(2 * (T + 1), G)        # (2(T+1), G)
    xyt = jnp.pad(xyt, ((0, 0), (0, G_pad - G))).astype(jnp.float32)

    # Weights: fold b1 into W1 (K=6), transpose for the lane-major orientation,
    # bf16 for the dominant 64->256 matmul.
    w1e = jnp.concatenate([params["w1"], params["b1"]], axis=0).T     # (64, 6)
    w1e = w1e.astype(jnp.float32)
    w2t = params["w2"].T.astype(jnp.bfloat16)                          # (256, 64)
    b2t = params["b2"].reshape(OUT_FEAT, 1).astype(jnp.float32)        # (256, 1)

    out_t = pl.pallas_call(
        future_encoder_kernel,
        out_shape=jax.ShapeDtypeStruct((OUT_FEAT, G_pad), jnp.float32),
        grid=(G_pad // GT,),
        in_specs=[
            pl.BlockSpec((2 * (T + 1), GT), lambda g: (0, g)),   # xy tile
            pl.BlockSpec((HIDDEN, K1), lambda g: (0, 0)),        # W1e (resident)
            pl.BlockSpec((OUT_FEAT, HIDDEN), lambda g: (0, 0)),  # W2^T bf16
            pl.BlockSpec((OUT_FEAT, 1), lambda g: (0, 0)),       # b2
        ],
        out_specs=pl.BlockSpec((OUT_FEAT, GT), lambda g: (0, g)),
        compiler_params=pltpu.CompilerParams(
            dimension_semantics=("parallel",),
            vmem_limit_bytes=32 * 1024 * 1024,
        ),
    )(xyt, w1e, w2t, b2t)

    return out_t.T[:G].reshape(B, A, M, OUT_FEAT)


def init_params(rng):
    # Deterministic synthetic parameters (module __init__ defines shapes only).
    k1, k2, k3, k4 = jax.random.split(rng, 4)
    s1 = 1.0 / math.sqrt(IN_FEAT)
    s2 = 1.0 / math.sqrt(HIDDEN)
    return dict(
        w1=(s1 * jax.random.normal(k1, (IN_FEAT, HIDDEN))).astype(jnp.float32),
        b1=(s1 * jax.random.normal(k2, (1, HIDDEN))).astype(jnp.float32),
        w2=(s2 * jax.random.normal(k3, (HIDDEN, OUT_FEAT))).astype(jnp.float32),
        b2=(s2 * jax.random.normal(k4, (1, OUT_FEAT))).astype(jnp.float32),
    )


def future_encoder_ref(trajs, current_states, params):
    # Pure-JAX reference mirroring the torch module (f32 end to end).
    B, A, M, T, _ = trajs.shape
    cur = jnp.broadcast_to(current_states[:, :, None, None, :2], (B, A, M, 1, 2))
    xy = jnp.concatenate([cur, trajs], axis=-2)
    dxy = jnp.diff(xy, axis=-2)
    v = dxy / DT
    theta = jnp.arctan2(dxy[..., 1], jnp.maximum(dxy[..., 0], 1e-6))[..., None]
    feat = jnp.concatenate([trajs, theta, v], axis=-1)
    h = jnp.maximum(
        jnp.dot(feat, params["w1"], precision=lax.Precision.HIGHEST)
        + params["b1"], 0.0)
    y = jnp.dot(h, params["w2"], precision=lax.Precision.HIGHEST) + params["b2"]
    return jnp.max(y, axis=-2)


if __name__ == "__main__":
    # Small shapes consistent with the module: B batches, A agents, M modes,
    # T future steps, 2 coords; current_states has >= 2 state features.
    B, A, M, T, S = 2, 4, 6, 16, 5
    root = jax.random.PRNGKey(0)
    kt, kc, kp = jax.random.split(root, 3)

    trajs = jax.random.normal(kt, (B, A, M, T, 2), jnp.float32)
    current_states = jax.random.normal(kc, (B, A, S), jnp.float32)
    params = init_params(kp)

    out = future_encoder(trajs, current_states, params)
    jax.block_until_ready(out)

    assert out.shape == (B, A, M, OUT_FEAT)
    assert bool(jnp.all(jnp.isfinite(out)))

    # Sanity vs pure-JAX f32 reference (bf16 64->256 matmul => loose tolerance).
    ref = future_encoder_ref(trajs, current_states, params)
    rel_err = float(jnp.max(jnp.abs(out - ref)) / (jnp.max(jnp.abs(ref)) + 1e-6))
    assert rel_err < 5e-2, rel_err

    print("KERNEL_OK")
</pallas_src>

<mosaic_0001>
module attributes {stable_mosaic.version = 11 : i64} {
  func.func @future_encoder_kernel(%arg0: i32, %arg1: memref<34x128xf32, #tpu.memory_space<vmem>>, %arg2: memref<64x6xf32, #tpu.memory_space<vmem>>, %arg3: memref<256x64xbf16, #tpu.memory_space<vmem>>, %arg4: memref<256x1xf32, #tpu.memory_space<vmem>>, %arg5: memref<256x128xf32, #tpu.memory_space<vmem>>) attributes {dimension_semantics = [#tpu.dimension_semantics<parallel>], iteration_bounds = array<i64: 1>, scalar_prefetch = 0 : i64, scratch_operands = 0 : i64, tpu.core_type = #tpu.core_type<tc>, window_params = [{transform_indices = @transform_0, window_bounds = array<i64: 34, 128>}, {pipeline_mode = #tpu.pipeline_mode<synchronous>, transform_indices = @transform_1, window_bounds = array<i64: 64, 6>}, {pipeline_mode = #tpu.pipeline_mode<synchronous>, transform_indices = @transform_2, window_bounds = array<i64: 256, 64>}, {pipeline_mode = #tpu.pipeline_mode<synchronous>, transform_indices = @transform_3, window_bounds = array<i64: 256, 1>}, {transform_indices = @transform_4, window_bounds = array<i64: 256, 128>}]} {
    %c0 = arith.constant 0 : index
    %c0_0 = arith.constant 0 : index
    %0 = vector.load %arg1[%c0, %c0_0] : memref<34x128xf32, #tpu.memory_space<vmem>>, vector<17x128xf32>
    %c17 = arith.constant 17 : index
    %c0_1 = arith.constant 0 : index
    %1 = vector.load %arg1[%c17, %c0_1] : memref<34x128xf32, #tpu.memory_space<vmem>>, vector<17x128xf32>
    %2 = vector.extract_strided_slice %0 {offsets = [1, 0], sizes = [16, 128], strides = [1, 1]} : vector<17x128xf32> to vector<16x128xf32>
    %3 = vector.extract_strided_slice %1 {offsets = [1, 0], sizes = [16, 128], strides = [1, 1]} : vector<17x128xf32> to vector<16x128xf32>
    %4 = vector.extract_strided_slice %0 {offsets = [0, 0], sizes = [16, 128], strides = [1, 1]} : vector<17x128xf32> to vector<16x128xf32>
    %5 = arith.subf %2, %4 : vector<16x128xf32>
    %6 = vector.extract_strided_slice %1 {offsets = [0, 0], sizes = [16, 128], strides = [1, 1]} : vector<17x128xf32> to vector<16x128xf32>
    %7 = arith.subf %3, %6 : vector<16x128xf32>
    %cst = arith.constant 1.000000e+01 : f32
    %8 = vector.broadcast %cst : f32 to vector<16x128xf32>
    %9 = arith.mulf %5, %8 : vector<16x128xf32>
    %cst_2 = arith.constant 1.000000e+01 : f32
    %10 = vector.broadcast %cst_2 : f32 to vector<16x128xf32>
    %11 = arith.mulf %7, %10 : vector<16x128xf32>
    %cst_3 = arith.constant 9.99999997E-7 : f32
    %12 = vector.broadcast %cst_3 : f32 to vector<16x128xf32>
    %13 = arith.maximumf %5, %12 : vector<16x128xf32>
    %14 = arith.divf %7, %13 : vector<16x128xf32>
    %cst_4 = arith.constant 0.000000e+00 : f32
    %15 = vector.broadcast %cst_4 : f32 to vector<16x128xf32>
    %16 = arith.cmpf oge, %14, %15 : vector<16x128xf32>
    %cst_5 = arith.constant 1.000000e+00 : f32
    %cst_6 = arith.constant -1.000000e+00 : f32
    %17 = vector.broadcast %cst_5 : f32 to vector<16x128xf32>
    %18 = vector.broadcast %cst_6 : f32 to vector<16x128xf32>
    %19 = arith.select %16, %17, %18 : vector<16x128xi1>, vector<16x128xf32>
    %20 = math.absf %14 : vector<16x128xf32>
    %cst_7 = arith.constant 2.41421366 : f32
    %21 = vector.broadcast %cst_7 : f32 to vector<16x128xf32>
    %22 = arith.cmpf ogt, %20, %21 : vector<16x128xf32>
    %cst_8 = arith.constant 0.414213568 : f32
    %23 = vector.broadcast %cst_8 : f32 to vector<16x128xf32>
    %24 = arith.cmpf ogt, %20, %23 : vector<16x128xf32>
    %cst_9 = arith.constant 1.000000e-30 : f32
    %25 = vector.broadcast %cst_9 : f32 to vector<16x128xf32>
    %26 = arith.maximumf %20, %25 : vector<16x128xf32>
    %cst_10 = arith.constant -1.000000e+00 : f32
    %27 = vector.broadcast %cst_10 : f32 to vector<16x128xf32>
    %28 = arith.divf %27, %26 : vector<16x128xf32>
    %cst_11 = arith.constant 1.000000e+00 : f32
    %29 = vector.broadcast %cst_11 : f32 to vector<16x128xf32>
    %30 = arith.subf %20, %29 : vector<16x128xf32>
    %cst_12 = arith.constant 1.000000e+00 : f32
    %31 = vector.broadcast %cst_12 : f32 to vector<16x128xf32>
    %32 = arith.addf %20, %31 : vector<16x128xf32>
    %33 = arith.divf %30, %32 : vector<16x128xf32>
    %34 = arith.select %24, %33, %20 : vector<16x128xi1>, vector<16x128xf32>
    %35 = arith.select %22, %28, %34 : vector<16x128xi1>, vector<16x128xf32>
    %cst_13 = arith.constant 0.785398185 : f32
    %cst_14 = arith.constant 0.000000e+00 : f32
    %36 = vector.broadcast %cst_13 : f32 to vector<16x128xf32>
    %37 = vector.broadcast %cst_14 : f32 to vector<16x128xf32>
    %38 = arith.select %24, %36, %37 : vector<16x128xi1>, vector<16x128xf32>
    %cst_15 = arith.constant 1.57079637 : f32
    %39 = vector.broadcast %cst_15 : f32 to vector<16x128xf32>
    %40 = arith.select %22, %39, %38 : vector<16x128xi1>, vector<16x128xf32>
    %41 = arith.mulf %35, %35 : vector<16x128xf32>
    %cst_16 = arith.constant 0.0805374458 : f32
    %42 = vector.broadcast %cst_16 : f32 to vector<16x128xf32>
    %43 = arith.mulf %42, %41 : vector<16x128xf32>
    %cst_17 = arith.constant 0.138776854 : f32
    %44 = vector.broadcast %cst_17 : f32 to vector<16x128xf32>
    %45 = arith.subf %43, %44 : vector<16x128xf32>
    %46 = arith.mulf %45, %41 : vector<16x128xf32>
    %cst_18 = arith.constant 0.199777111 : f32
    %47 = vector.broadcast %cst_18 : f32 to vector<16x128xf32>
    %48 = arith.addf %46, %47 : vector<16x128xf32>
    %49 = arith.mulf %48, %41 : vector<16x128xf32>
    %cst_19 = arith.constant 0.333329499 : f32
    %50 = vector.broadcast %cst_19 : f32 to vector<16x128xf32>
    %51 = arith.subf %49, %50 : vector<16x128xf32>
    %52 = arith.mulf %51, %41 : vector<16x128xf32>
    %53 = arith.mulf %52, %35 : vector<16x128xf32>
    %54 = arith.addf %53, %35 : vector<16x128xf32>
    %55 = arith.addf %40, %54 : vector<16x128xf32>
    %56 = arith.mulf %19, %55 : vector<16x128xf32>
    %cst_20 = arith.constant 1.000000e+00 : f32
    %57 = vector.broadcast %cst_20 : f32 to vector<1x128xf32>
    %c0_21 = arith.constant 0 : index
    %c0_22 = arith.constant 0 : index
    %58 = vector.load %arg2[%c0_21, %c0_22] : memref<64x6xf32, #tpu.memory_space<vmem>>, vector<64x6xf32>
    %c0_23 = arith.constant 0 : index
    %c0_24 = arith.constant 0 : index
    %59 = vector.load %arg3[%c0_23, %c0_24] : memref<256x64xbf16, #tpu.memory_space<vmem>>, vector<256x64xbf16>
    %60 = vector.extract_strided_slice %2 {offsets = [0, 0], sizes = [1, 128], strides = [1, 1]} : vector<16x128xf32> to vector<1x128xf32>
    %61 = vector.extract_strided_slice %3 {offsets = [0, 0], sizes = [1, 128], strides = [1, 1]} : vector<16x128xf32> to vector<1x128xf32>
    %62 = vector.extract_strided_slice %56 {offsets = [0, 0], sizes = [1, 128], strides = [1, 1]} : vector<16x128xf32> to vector<1x128xf32>
    %63 = vector.extract_strided_slice %9 {offsets = [0, 0], sizes = [1, 128], strides = [1, 1]} : vector<16x128xf32> to vector<1x128xf32>
    %64 = vector.extract_strided_slice %11 {offsets = [0, 0], sizes = [1, 128], strides = [1, 1]} : vector<16x128xf32> to vector<1x128xf32>
    %65 = tpu.concatenate %60, %61, %62, %63, %64, %57 in 0 : vector<1x128xf32>, vector<1x128xf32>, vector<1x128xf32>, vector<1x128xf32>, vector<1x128xf32>, vector<1x128xf32> -> vector<6x128xf32>
    %cst_25 = arith.constant dense<0.000000e+00> : vector<64x128xf32>
    %66 = tpu.matmul %58, %65, %cst_25 {dimension_numbers = #tpu.dot_dimension_numbers<[1], [0], [0], [1], [0, 0, 1, 1], [], []>} : vector<64x6xf32>, vector<6x128xf32>, vector<64x128xf32> -> vector<64x128xf32>
    %cst_26 = arith.constant 0.000000e+00 : f32
    %67 = vector.broadcast %cst_26 : f32 to vector<64x128xf32>
    %68 = arith.maximumf %66, %67 : vector<64x128xf32>
    %69 = arith.truncf %68 : vector<64x128xf32> to vector<64x128xbf16>
    %cst_27 = arith.constant dense<0.000000e+00> : vector<256x128xf32>
    %70 = tpu.matmul %59, %69, %cst_27 {dimension_numbers = #tpu.dot_dimension_numbers<[1], [0], [0], [1], [0, 0, 1, 1], [], []>} : vector<256x64xbf16>, vector<64x128xbf16>, vector<256x128xf32> -> vector<256x128xf32>
    %c0_28 = arith.constant 0 : index
    %c0_29 = arith.constant 0 : index
    %71 = vector.load %arg5[%c0_28, %c0_29] : memref<256x128xf32, #tpu.memory_space<vmem>>, vector<256x128xf32>
    tpu.vector_store %arg5[%c0_28, %c0_29], %70 {strides = array<i32>} : memref<256x128xf32, #tpu.memory_space<vmem>>, vector<256x128xf32>,
    %72 = vector.extract_strided_slice %2 {offsets = [1, 0], sizes = [1, 128], strides = [1, 1]} : vector<16x128xf32> to vector<1x128xf32>
    %73 = vector.extract_strided_slice %3 {offsets = [1, 0], sizes = [1, 128], strides = [1, 1]} : vector<16x128xf32> to vector<1x128xf32>
    %74 = vector.extract_strided_slice %56 {offsets = [1, 0], sizes = [1, 128], strides = [1, 1]} : vector<16x128xf32> to vector<1x128xf32>
    %75 = vector.extract_strided_slice %9 {offsets = [1, 0], sizes = [1, 128], strides = [1, 1]} : vector<16x128xf32> to vector<1x128xf32>
    %76 = vector.extract_strided_slice %11 {offsets = [1, 0], sizes = [1, 128], strides = [1, 1]} : vector<16x128xf32> to vector<1x128xf32>
    %77 = tpu.concatenate %72, %73, %74, %75, %76, %57 in 0 : vector<1x128xf32>, vector<1x128xf32>, vector<1x128xf32>, vector<1x128xf32>, vector<1x128xf32>, vector<1x128xf32> -> vector<6x128xf32>
    %cst_30 = arith.constant dense<0.000000e+00> : vector<64x128xf32>
    %78 = tpu.matmul %58, %77, %cst_30 {dimension_numbers = #tpu.dot_dimension_numbers<[1], [0], [0], [1], [0, 0, 1, 1], [], []>} : vector<64x6xf32>, vector<6x128xf32>, vector<64x128xf32> -> vector<64x128xf32>
    %cst_31 = arith.constant 0.000000e+00 : f32
    %79 = vector.broadcast %cst_31 : f32 to vector<64x128xf32>
    %80 = arith.maximumf %78, %79 : vector<64x128xf32>
    %81 = arith.truncf %80 : vector<64x128xf32> to vector<64x128xbf16>
    %cst_32 = arith.constant dense<0.000000e+00> : vector<256x128xf32>
    %82 = tpu.matmul %59, %81, %cst_32 {dimension_numbers = #tpu.dot_dimension_numbers<[1], [0], [0], [1], [0, 0, 1, 1], [], []>} : vector<256x64xbf16>, vector<64x128xbf16>, vector<256x128xf32> -> vector<256x128xf32>
    %c0_33 = arith.constant 0 : index
    %c0_34 = arith.constant 0 : index
    %83 = vector.load %arg5[%c0_33, %c0_34] : memref<256x128xf32, #tpu.memory_space<vmem>>, vector<256x128xf32>
    %84 = arith.maximumf %83, %82 : vector<256x128xf32>
    %c0_35 = arith.constant 0 : index
    %c0_36 = arith.constant 0 : index
    %85 = vector.load %arg5[%c0_35, %c0_36] : memref<256x128xf32, #tpu.memory_space<vmem>>, vector<256x128xf32>
    tpu.vector_store %arg5[%c0_35, %c0_36], %84 {strides = array<i32>} : memref<256x128xf32, #tpu.memory_space<vmem>>, vector<256x128xf32>,
    %86 = vector.extract_strided_slice %2 {offsets = [2, 0], sizes = [1, 128], strides = [1, 1]} : vector<16x128xf32> to vector<1x128xf32>
    %87 = vector.extract_strided_slice %3 {offsets = [2, 0], sizes = [1, 128], strides = [1, 1]} : vector<16x128xf32> to vector<1x128xf32>
    %88 = vector.extract_strided_slice %56 {offsets = [2, 0], sizes = [1, 128], strides = [1, 1]} : vector<16x128xf32> to vector<1x128xf32>
    %89 = vector.extract_strided_slice %9 {offsets = [2, 0], sizes = [1, 128], strides = [1, 1]} : vector<16x128xf32> to vector<1x128xf32>
    %90 = vector.extract_strided_slice %11 {offsets = [2, 0], sizes = [1, 128], strides = [1, 1]} : vector<16x128xf32> to vector<1x128xf32>
    %91 = tpu.concatenate %86, %87, %88, %89, %90, %57 in 0 : vector<1x128xf32>, vector<1x128xf32>, vector<1x128xf32>, vector<1x128xf32>, vector<1x128xf32>, vector<1x128xf32> -> vector<6x128xf32>
    %cst_37 = arith.constant dense<0.000000e+00> : vector<64x128xf32>
    %92 = tpu.matmul %58, %91, %cst_37 {dimension_numbers = #tpu.dot_dimension_numbers<[1], [0], [0], [1], [0, 0, 1, 1], [], []>} : vector<64x6xf32>, vector<6x128xf32>, vector<64x128xf32> -> vector<64x128xf32>
    %cst_38 = arith.constant 0.000000e+00 : f32
    %93 = vector.broadcast %cst_38 : f32 to vector<64x128xf32>
    %94 = arith.maximumf %92, %93 : vector<64x128xf32>
    %95 = arith.truncf %94 : vector<64x128xf32> to vector<64x128xbf16>
    %cst_39 = arith.constant dense<0.000000e+00> : vector<256x128xf32>
    %96 = tpu.matmul %59, %95, %cst_39 {dimension_numbers = #tpu.dot_dimension_numbers<[1], [0], [0], [1], [0, 0, 1, 1], [], []>} : vector<256x64xbf16>, vector<64x128xbf16>, vector<256x128xf32> -> vector<256x128xf32>
    %c0_40 = arith.constant 0 : index
    %c0_41 = arith.constant 0 : index
    %97 = vector.load %arg5[%c0_40, %c0_41] : memref<256x128xf32, #tpu.memory_space<vmem>>, vector<256x128xf32>
    %98 = arith.maximumf %97, %96 : vector<256x128xf32>
    %c0_42 = arith.constant 0 : index
    %c0_43 = arith.constant 0 : index
    %99 = vector.load %arg5[%c0_42, %c0_43] : memref<256x128xf32, #tpu.memory_space<vmem>>, vector<256x128xf32>
    tpu.vector_store %arg5[%c0_42, %c0_43], %98 {strides = array<i32>} : memref<256x128xf32, #tpu.memory_space<vmem>>, vector<256x128xf32>,
    %100 = vector.extract_strided_slice %2 {offsets = [3, 0], sizes = [1, 128], strides = [1, 1]} : vector<16x128xf32> to vector<1x128xf32>
    %101 = vector.extract_strided_slice %3 {offsets = [3, 0], sizes = [1, 128], strides = [1, 1]} : vector<16x128xf32> to vector<1x128xf32>
    %102 = vector.extract_strided_slice %56 {offsets = [3, 0], sizes = [1, 128], strides = [1, 1]} : vector<16x128xf32> to vector<1x128xf32>
    %103 = vector.extract_strided_slice %9 {offsets = [3, 0], sizes = [1, 128], strides = [1, 1]} : vector<16x128xf32> to vector<1x128xf32>
    %104 = vector.extract_strided_slice %11 {offsets = [3, 0], sizes = [1, 128], strides = [1, 1]} : vector<16x128xf32> to vector<1x128xf32>
    %105 = tpu.concatenate %100, %101, %102, %103, %104, %57 in 0 : vector<1x128xf32>, vector<1x128xf32>, vector<1x128xf32>, vector<1x128xf32>, vector<1x128xf32>, vector<1x128xf32> -> vector<6x128xf32>
    %cst_44 = arith.constant dense<0.000000e+00> : vector<64x128xf32>
    %106 = tpu.matmul %58, %105, %cst_44 {dimension_numbers = #tpu.dot_dimension_numbers<[1], [0], [0], [1], [0, 0, 1, 1], [], []>} : vector<64x6xf32>, vector<6x128xf32>, vector<64x128xf32> -> vector<64x128xf32>
    %cst_45 = arith.constant 0.000000e+00 : f32
    %107 = vector.broadcast %cst_45 : f32 to vector<64x128xf32>
    %108 = arith.maximumf %106, %107 : vector<64x128xf32>
    %109 = arith.truncf %108 : vector<64x128xf32> to vector<64x128xbf16>
    %cst_46 = arith.constant dense<0.000000e+00> : vector<256x128xf32>
    %110 = tpu.matmul %59, %109, %cst_46 {dimension_numbers = #tpu.dot_dimension_numbers<[1], [0], [0], [1], [0, 0, 1, 1], [], []>} : vector<256x64xbf16>, vector<64x128xbf16>, vector<256x128xf32> -> vector<256x128xf32>
    %c0_47 = arith.constant 0 : index
    %c0_48 = arith.constant 0 : index
    %111 = vector.load %arg5[%c0_47, %c0_48] : memref<256x128xf32, #tpu.memory_space<vmem>>, vector<256x128xf32>
    %112 = arith.maximumf %111, %110 : vector<256x128xf32>
    %c0_49 = arith.constant 0 : index
    %c0_50 = arith.constant 0 : index
    %113 = vector.load %arg5[%c0_49, %c0_50] : memref<256x128xf32, #tpu.memory_space<vmem>>, vector<256x128xf32>
    tpu.vector_store %arg5[%c0_49, %c0_50], %112 {strides = array<i32>} : memref<256x128xf32, #tpu.memory_space<vmem>>, vector<256x128xf32>,
    %114 = vector.extract_strided_slice %2 {offsets = [4, 0], sizes = [1, 128], strides = [1, 1]} : vector<16x128xf32> to vector<1x128xf32>
    %115 = vector.extract_strided_slice %3 {offsets = [4, 0], sizes = [1, 128], strides = [1, 1]} : vector<16x128xf32> to vector<1x128xf32>
    %116 = vector.extract_strided_slice %56 {offsets = [4, 0], sizes = [1, 128], strides = [1, 1]} : vector<16x128xf32> to vector<1x128xf32>
    %117 = vector.extract_strided_slice %9 {offsets = [4, 0], sizes = [1, 128], strides = [1, 1]} : vector<16x128xf32> to vector<1x128xf32>
    %118 = vector.extract_strided_slice %11 {offsets = [4, 0], sizes = [1, 128], strides = [1, 1]} : vector<16x128xf32> to vector<1x128xf32>
    %119 = tpu.concatenate %114, %115, %116, %117, %118, %57 in 0 : vector<1x128xf32>, vector<1x128xf32>, vector<1x128xf32>, vector<1x128xf32>, vector<1x128xf32>, vector<1x128xf32> -> vector<6x128xf32>
    %cst_51 = arith.constant dense<0.000000e+00> : vector<64x128xf32>
    %120 = tpu.matmul %58, %119, %cst_51 {dimension_numbers = #tpu.dot_dimension_numbers<[1], [0], [0], [1], [0, 0, 1, 1], [], []>} : vector<64x6xf32>, vector<6x128xf32>, vector<64x128xf32> -> vector<64x128xf32>
    %cst_52 = arith.constant 0.000000e+00 : f32
    %121 = vector.broadcast %cst_52 : f32 to vector<64x128xf32>
    %122 = arith.maximumf %120, %121 : vector<64x128xf32>
    %123 = arith.truncf %122 : vector<64x128xf32> to vector<64x128xbf16>
    %cst_53 = arith.constant dense<0.000000e+00> : vector<256x128xf32>
    %124 = tpu.matmul %59, %123, %cst_53 {dimension_numbers = #tpu.dot_dimension_numbers<[1], [0], [0], [1], [0, 0, 1, 1], [], []>} : vector<256x64xbf16>, vector<64x128xbf16>, vector<256x128xf32> -> vector<256x128xf32>
    %c0_54 = arith.constant 0 : index
    %c0_55 = arith.constant 0 : index
    %125 = vector.load %arg5[%c0_54, %c0_55] : memref<256x128xf32, #tpu.memory_space<vmem>>, vector<256x128xf32>
    %126 = arith.maximumf %125, %124 : vector<256x128xf32>
    %c0_56 = arith.constant 0 : index
    %c0_57 = arith.constant 0 : index
    %127 = vector.load %arg5[%c0_56, %c0_57] : memref<256x128xf32, #tpu.memory_space<vmem>>, vector<256x128xf32>
    tpu.vector_store %arg5[%c0_56, %c0_57], %126 {strides = array<i32>} : memref<256x128xf32, #tpu.memory_space<vmem>>, vector<256x128xf32>,
    %128 = vector.extract_strided_slice %2 {offsets = [5, 0], sizes = [1, 128], strides = [1, 1]} : vector<16x128xf32> to vector<1x128xf32>
    %129 = vector.extract_strided_slice %3 {offsets = [5, 0], sizes = [1, 128], strides = [1, 1]} : vector<16x128xf32> to vector<1x128xf32>
    %130 = vector.extract_strided_slice %56 {offsets = [5, 0], sizes = [1, 128], strides = [1, 1]} : vector<16x128xf32> to vector<1x128xf32>
    %131 = vector.extract_strided_slice %9 {offsets = [5, 0], sizes = [1, 128], strides = [1, 1]} : vector<16x128xf32> to vector<1x128xf32>
    %132 = vector.extract_strided_slice %11 {offsets = [5, 0], sizes = [1, 128], strides = [1, 1]} : vector<16x128xf32> to vector<1x128xf32>
    %133 = tpu.concatenate %128, %129, %130, %131, %132, %57 in 0 : vector<1x128xf32>, vector<1x128xf32>, vector<1x128xf32>, vector<1x128xf32>, vector<1x128xf32>, vector<1x128xf32> -> vector<6x128xf32>
    %cst_58 = arith.constant dense<0.000000e+00> : vector<64x128xf32>
    %134 = tpu.matmul %58, %133, %cst_58 {dimension_numbers = #tpu.dot_dimension_numbers<[1], [0], [0], [1], [0, 0, 1, 1], [], []>} : vector<64x6xf32>, vector<6x128xf32>, vector<64x128xf32> -> vector<64x128xf32>
    %cst_59 = arith.constant 0.000000e+00 : f32
    %135 = vector.broadcast %cst_59 : f32 to vector<64x128xf32>
    %136 = arith.maximumf %134, %135 : vector<64x128xf32>
    %137 = arith.truncf %136 : vector<64x128xf32> to vector<64x128xbf16>
    %cst_60 = arith.constant dense<0.000000e+00> : vector<256x128xf32>
    %138 = tpu.matmul %59, %137, %cst_60 {dimension_numbers = #tpu.dot_dimension_numbers<[1], [0], [0], [1], [0, 0, 1, 1], [], []>} : vector<256x64xbf16>, vector<64x128xbf16>, vector<256x128xf32> -> vector<256x128xf32>
    %c0_61 = arith.constant 0 : index
    %c0_62 = arith.constant 0 : index
    %139 = vector.load %arg5[%c0_61, %c0_62] : memref<256x128xf32, #tpu.memory_space<vmem>>, vector<256x128xf32>
    %140 = arith.maximumf %139, %138 : vector<256x128xf32>
    %c0_63 = arith.constant 0 : index
    %c0_64 = arith.constant 0 : index
    %141 = vector.load %arg5[%c0_63, %c0_64] : memref<256x128xf32, #tpu.memory_space<vmem>>, vector<256x128xf32>
    tpu.vector_store %arg5[%c0_63, %c0_64], %140 {strides = array<i32>} : memref<256x128xf32, #tpu.memory_space<vmem>>, vector<256x128xf32>,
    %142 = vector.extract_strided_slice %2 {offsets = [6, 0], sizes = [1, 128], strides = [1, 1]} : vector<16x128xf32> to vector<1x128xf32>
    %143 = vector.extract_strided_slice %3 {offsets = [6, 0], sizes = [1, 128], strides = [1, 1]} : vector<16x128xf32> to vector<1x128xf32>
    %144 = vector.extract_strided_slice %56 {offsets = [6, 0], sizes = [1, 128], strides = [1, 1]} : vector<16x128xf32> to vector<1x128xf32>
    %145 = vector.extract_strided_slice %9 {offsets = [6, 0], sizes = [1, 128], strides = [1, 1]} : vector<16x128xf32> to vector<1x128xf32>
    %146 = vector.extract_strided_slice %11 {offsets = [6, 0], sizes = [1, 128], strides = [1, 1]} : vector<16x128xf32> to vector<1x128xf32>
    %147 = tpu.concatenate %142, %143, %144, %145, %146, %57 in 0 : vector<1x128xf32>, vector<1x128xf32>, vector<1x128xf32>, vector<1x128xf32>, vector<1x128xf32>, vector<1x128xf32> -> vector<6x128xf32>
    %cst_65 = arith.constant dense<0.000000e+00> : vector<64x128xf32>
    %148 = tpu.matmul %58, %147, %cst_65 {dimension_numbers = #tpu.dot_dimension_numbers<[1], [0], [0], [1], [0, 0, 1, 1], [], []>} : vector<64x6xf32>, vector<6x128xf32>, vector<64x128xf32> -> vector<64x128xf32>
    %cst_66 = arith.constant 0.000000e+00 : f32
    %149 = vector.broadcast %cst_66 : f32 to vector<64x128xf32>
    %150 = arith.maximumf %148, %149 : vector<64x128xf32>
    %151 = arith.truncf %150 : vector<64x128xf32> to vector<64x128xbf16>
    %cst_67 = arith.constant dense<0.000000e+00> : vector<256x128xf32>
    %152 = tpu.matmul %59, %151, %cst_67 {dimension_numbers = #tpu.dot_dimension_numbers<[1], [0], [0], [1], [0, 0, 1, 1], [], []>} : vector<256x64xbf16>, vector<64x128xbf16>, vector<256x128xf32> -> vector<256x128xf32>
    %c0_68 = arith.constant 0 : index
    %c0_69 = arith.constant 0 : index
    %153 = vector.load %arg5[%c0_68, %c0_69] : memref<256x128xf32, #tpu.memory_space<vmem>>, vector<256x128xf32>
    %154 = arith.maximumf %153, %152 : vector<256x128xf32>
    %c0_70 = arith.constant 0 : index
    %c0_71 = arith.constant 0 : index
    %155 = vector.load %arg5[%c0_70, %c0_71] : memref<256x128xf32, #tpu.memory_space<vmem>>, vector<256x128xf32>
    tpu.vector_store %arg5[%c0_70, %c0_71], %154 {strides = array<i32>} : memref<256x128xf32, #tpu.memory_space<vmem>>, vector<256x128xf32>,
    %156 = vector.extract_strided_slice %2 {offsets = [7, 0], sizes = [1, 128], strides = [1, 1]} : vector<16x128xf32> to vector<1x128xf32>
    %157 = vector.extract_strided_slice %3 {offsets = [7, 0], sizes = [1, 128], strides = [1, 1]} : vector<16x128xf32> to vector<1x128xf32>
    %158 = vector.extract_strided_slice %56 {offsets = [7, 0], sizes = [1, 128], strides = [1, 1]} : vector<16x128xf32> to vector<1x128xf32>
    %159 = vector.extract_strided_slice %9 {offsets = [7, 0], sizes = [1, 128], strides = [1, 1]} : vector<16x128xf32> to vector<1x128xf32>
    %160 = vector.extract_strided_slice %11 {offsets = [7, 0], sizes = [1, 128], strides = [1, 1]} : vector<16x128xf32> to vector<1x128xf32>
    %161 = tpu.concatenate %156, %157, %158, %159, %160, %57 in 0 : vector<1x128xf32>, vector<1x128xf32>, vector<1x128xf32>, vector<1x128xf32>, vector<1x128xf32>, vector<1x128xf32> -> vector<6x128xf32>
    %cst_72 = arith.constant dense<0.000000e+00> : vector<64x128xf32>
    %162 = tpu.matmul %58, %161, %cst_72 {dimension_numbers = #tpu.dot_dimension_numbers<[1], [0], [0], [1], [0, 0, 1, 1], [], []>} : vector<64x6xf32>, vector<6x128xf32>, vector<64x128xf32> -> vector<64x128xf32>
    %cst_73 = arith.constant 0.000000e+00 : f32
    %163 = vector.broadcast %cst_73 : f32 to vector<64x128xf32>
    %164 = arith.maximumf %162, %163 : vector<64x128xf32>
    %165 = arith.truncf %164 : vector<64x128xf32> to vector<64x128xbf16>
    %cst_74 = arith.constant dense<0.000000e+00> : vector<256x128xf32>
    %166 = tpu.matmul %59, %165, %cst_74 {dimension_numbers = #tpu.dot_dimension_numbers<[1], [0], [0], [1], [0, 0, 1, 1], [], []>} : vector<256x64xbf16>, vector<64x128xbf16>, vector<256x128xf32> -> vector<256x128xf32>
    %c0_75 = arith.constant 0 : index
    %c0_76 = arith.constant 0 : index
    %167 = vector.load %arg5[%c0_75, %c0_76] : memref<256x128xf32, #tpu.memory_space<vmem>>, vector<256x128xf32>
    %168 = arith.maximumf %167, %166 : vector<256x128xf32>
    %c0_77 = arith.constant 0 : index
    %c0_78 = arith.constant 0 : index
    %169 = vector.load %arg5[%c0_77, %c0_78] : memref<256x128xf32, #tpu.memory_space<vmem>>, vector<256x128xf32>
    tpu.vector_store %arg5[%c0_77, %c0_78], %168 {strides = array<i32>} : memref<256x128xf32, #tpu.memory_space<vmem>>, vector<256x128xf32>,
    %170 = vector.extract_strided_slice %2 {offsets = [8, 0], sizes = [1, 128], strides = [1, 1]} : vector<16x128xf32> to vector<1x128xf32>
    %171 = vector.extract_strided_slice %3 {offsets = [8, 0], sizes = [1, 128], strides = [1, 1]} : vector<16x128xf32> to vector<1x128xf32>
    %172 = vector.extract_strided_slice %56 {offsets = [8, 0], sizes = [1, 128], strides = [1, 1]} : vector<16x128xf32> to vector<1x128xf32>
    %173 = vector.extract_strided_slice %9 {offsets = [8, 0], sizes = [1, 128], strides = [1, 1]} : vector<16x128xf32> to vector<1x128xf32>
    %174 = vector.extract_strided_slice %11 {offsets = [8, 0], sizes = [1, 128], strides = [1, 1]} : vector<16x128xf32> to vector<1x128xf32>
    %175 = tpu.concatenate %170, %171, %172, %173, %174, %57 in 0 : vector<1x128xf32>, vector<1x128xf32>, vector<1x128xf32>, vector<1x128xf32>, vector<1x128xf32>, vector<1x128xf32> -> vector<6x128xf32>
    %cst_79 = arith.constant dense<0.000000e+00> : vector<64x128xf32>
    %176 = tpu.matmul %58, %175, %cst_79 {dimension_numbers = #tpu.dot_dimension_numbers<[1], [0], [0], [1], [0, 0, 1, 1], [], []>} : vector<64x6xf32>, vector<6x128xf32>, vector<64x128xf32> -> vector<64x128xf32>
    %cst_80 = arith.constant 0.000000e+00 : f32
    %177 = vector.broadcast %cst_80 : f32 to vector<64x128xf32>
    %178 = arith.maximumf %176, %177 : vector<64x128xf32>
    %179 = arith.truncf %178 : vector<64x128xf32> to vector<64x128xbf16>
    %cst_81 = arith.constant dense<0.000000e+00> : vector<256x128xf32>
    %180 = tpu.matmul %59, %179, %cst_81 {dimension_numbers = #tpu.dot_dimension_numbers<[1], [0], [0], [1], [0, 0, 1, 1], [], []>} : vector<256x64xbf16>, vector<64x128xbf16>, vector<256x128xf32> -> vector<256x128xf32>
    %c0_82 = arith.constant 0 : index
    %c0_83 = arith.constant 0 : index
    %181 = vector.load %arg5[%c0_82, %c0_83] : memref<256x128xf32, #tpu.memory_space<vmem>>, vector<256x128xf32>
    %182 = arith.maximumf %181, %180 : vector<256x128xf32>
    %c0_84 = arith.constant 0 : index
    %c0_85 = arith.constant 0 : index
    %183 = vector.load %arg5[%c0_84, %c0_85] : memref<256x128xf32, #tpu.memory_space<vmem>>, vector<256x128xf32>
    tpu.vector_store %arg5[%c0_84, %c0_85], %182 {strides = array<i32>} : memref<256x128xf32, #tpu.memory_space<vmem>>, vector<256x128xf32>,
    %184 = vector.extract_strided_slice %2 {offsets = [9, 0], sizes = [1, 128], strides = [1, 1]} : vector<16x128xf32> to vector<1x128xf32>
    %185 = vector.extract_strided_slice %3 {offsets = [9, 0], sizes = [1, 128], strides = [1, 1]} : vector<16x128xf32> to vector<1x128xf32>
    %186 = vector.extract_strided_slice %56 {offsets = [9, 0], sizes = [1, 128], strides = [1, 1]} : vector<16x128xf32> to vector<1x128xf32>
    %187 = vector.extract_strided_slice %9 {offsets = [9, 0], sizes = [1, 128], strides = [1, 1]} : vector<16x128xf32> to vector<1x128xf32>
    %188 = vector.extract_strided_slice %11 {offsets = [9, 0], sizes = [1, 128], strides = [1, 1]} : vector<16x128xf32> to vector<1x128xf32>
    %189 = tpu.concatenate %184, %185, %186, %187, %188, %57 in 0 : vector<1x128xf32>, vector<1x128xf32>, vector<1x128xf32>, vector<1x128xf32>, vector<1x128xf32>, vector<1x128xf32> -> vector<6x128xf32>
    %cst_86 = arith.constant dense<0.000000e+00> : vector<64x128xf32>
    %190 = tpu.matmul %58, %189, %cst_86 {dimension_numbers = #tpu.dot_dimension_numbers<[1], [0], [0], [1], [0, 0, 1, 1], [], []>} : vector<64x6xf32>, vector<6x128xf32>, vector<64x128xf32> -> vector<64x128xf32>
    %cst_87 = arith.constant 0.000000e+00 : f32
    %191 = vector.broadcast %cst_87 : f32 to vector<64x128xf32>
    %192 = arith.maximumf %190, %191 : vector<64x128xf32>
    %193 = arith.truncf %192 : vector<64x128xf32> to vector<64x128xbf16>
    %cst_88 = arith.constant dense<0.000000e+00> : vector<256x128xf32>
    %194 = tpu.matmul %59, %193, %cst_88 {dimension_numbers = #tpu.dot_dimension_numbers<[1], [0], [0], [1], [0, 0, 1, 1], [], []>} : vector<256x64xbf16>, vector<64x128xbf16>, vector<256x128xf32> -> vector<256x128xf32>
    %c0_89 = arith.constant 0 : index
    %c0_90 = arith.constant 0 : index
    %195 = vector.load %arg5[%c0_89, %c0_90] : memref<256x128xf32, #tpu.memory_space<vmem>>, vector<256x128xf32>
    %196 = arith.maximumf %195, %194 : vector<256x128xf32>
    %c0_91 = arith.constant 0 : index
    %c0_92 = arith.constant 0 : index
    %197 = vector.load %arg5[%c0_91, %c0_92] : memref<256x128xf32, #tpu.memory_space<vmem>>, vector<256x128xf32>
    tpu.vector_store %arg5[%c0_91, %c0_92], %196 {strides = array<i32>} : memref<256x128xf32, #tpu.memory_space<vmem>>, vector<256x128xf32>,
    %198 = vector.extract_strided_slice %2 {offsets = [10, 0], sizes = [1, 128], strides = [1, 1]} : vector<16x128xf32> to vector<1x128xf32>
    %199 = vector.extract_strided_slice %3 {offsets = [10, 0], sizes = [1, 128], strides = [1, 1]} : vector<16x128xf32> to vector<1x128xf32>
    %200 = vector.extract_strided_slice %56 {offsets = [10, 0], sizes = [1, 128], strides = [1, 1]} : vector<16x128xf32> to vector<1x128xf32>
    %201 = vector.extract_strided_slice %9 {offsets = [10, 0], sizes = [1, 128], strides = [1, 1]} : vector<16x128xf32> to vector<1x128xf32>
    %202 = vector.extract_strided_slice %11 {offsets = [10, 0], sizes = [1, 128], strides = [1, 1]} : vector<16x128xf32> to vector<1x128xf32>
    %203 = tpu.concatenate %198, %199, %200, %201, %202, %57 in 0 : vector<1x128xf32>, vector<1x128xf32>, vector<1x128xf32>, vector<1x128xf32>, vector<1x128xf32>, vector<1x128xf32> -> vector<6x128xf32>
    %cst_93 = arith.constant dense<0.000000e+00> : vector<64x128xf32>
    %204 = tpu.matmul %58, %203, %cst_93 {dimension_numbers = #tpu.dot_dimension_numbers<[1], [0], [0], [1], [0, 0, 1, 1], [], []>} : vector<64x6xf32>, vector<6x128xf32>, vector<64x128xf32> -> vector<64x128xf32>
    %cst_94 = arith.constant 0.000000e+00 : f32
    %205 = vector.broadcast %cst_94 : f32 to vector<64x128xf32>
    %206 = arith.maximumf %204, %205 : vector<64x128xf32>
    %207 = arith.truncf %206 : vector<64x128xf32> to vector<64x128xbf16>
    %cst_95 = arith.constant dense<0.000000e+00> : vector<256x128xf32>
    %208 = tpu.matmul %59, %207, %cst_95 {dimension_numbers = #tpu.dot_dimension_numbers<[1], [0], [0], [1], [0, 0, 1, 1], [], []>} : vector<256x64xbf16>, vector<64x128xbf16>, vector<256x128xf32> -> vector<256x128xf32>
    %c0_96 = arith.constant 0 : index
    %c0_97 = arith.constant 0 : index
    %209 = vector.load %arg5[%c0_96, %c0_97] : memref<256x128xf32, #tpu.memory_space<vmem>>, vector<256x128xf32>
    %210 = arith.maximumf %209, %208 : vector<256x128xf32>
    %c0_98 = arith.constant 0 : index
    %c0_99 = arith.constant 0 : index
    %211 = vector.load %arg5[%c0_98, %c0_99] : memref<256x128xf32, #tpu.memory_space<vmem>>, vector<256x128xf32>
    tpu.vector_store %arg5[%c0_98, %c0_99], %210 {strides = array<i32>} : memref<256x128xf32, #tpu.memory_space<vmem>>, vector<256x128xf32>,
    %212 = vector.extract_strided_slice %2 {offsets = [11, 0], sizes = [1, 128], strides = [1, 1]} : vector<16x128xf32> to vector<1x128xf32>
    %213 = vector.extract_strided_slice %3 {offsets = [11, 0], sizes = [1, 128], strides = [1, 1]} : vector<16x128xf32> to vector<1x128xf32>
    %214 = vector.extract_strided_slice %56 {offsets = [11, 0], sizes = [1, 128], strides = [1, 1]} : vector<16x128xf32> to vector<1x128xf32>
    %215 = vector.extract_strided_slice %9 {offsets = [11, 0], sizes = [1, 128], strides = [1, 1]} : vector<16x128xf32> to vector<1x128xf32>
    %216 = vector.extract_strided_slice %11 {offsets = [11, 0], sizes = [1, 128], strides = [1, 1]} : vector<16x128xf32> to vector<1x128xf32>
    %217 = tpu.concatenate %212, %213, %214, %215, %216, %57 in 0 : vector<1x128xf32>, vector<1x128xf32>, vector<1x128xf32>, vector<1x128xf32>, vector<1x128xf32>, vector<1x128xf32> -> vector<6x128xf32>
    %cst_100 = arith.constant dense<0.000000e+00> : vector<64x128xf32>
    %218 = tpu.matmul %58, %217, %cst_100 {dimension_numbers = #tpu.dot_dimension_numbers<[1], [0], [0], [1], [0, 0, 1, 1], [], []>} : vector<64x6xf32>, vector<6x128xf32>, vector<64x128xf32> -> vector<64x128xf32>
    %cst_101 = arith.constant 0.000000e+00 : f32
    %219 = vector.broadcast %cst_101 : f32 to vector<64x128xf32>
    %220 = arith.maximumf %218, %219 : vector<64x128xf32>
    %221 = arith.truncf %220 : vector<64x128xf32> to vector<64x128xbf16>
    %cst_102 = arith.constant dense<0.000000e+00> : vector<256x128xf32>
    %222 = tpu.matmul %59, %221, %cst_102 {dimension_numbers = #tpu.dot_dimension_numbers<[1], [0], [0], [1], [0, 0, 1, 1], [], []>} : vector<256x64xbf16>, vector<64x128xbf16>, vector<256x128xf32> -> vector<256x128xf32>
    %c0_103 = arith.constant 0 : index
    %c0_104 = arith.constant 0 : index
    %223 = vector.load %arg5[%c0_103, %c0_104] : memref<256x128xf32, #tpu.memory_space<vmem>>, vector<256x128xf32>
    %224 = arith.maximumf %223, %222 : vector<256x128xf32>
    %c0_105 = arith.constant 0 : index
    %c0_106 = arith.constant 0 : index
    %225 = vector.load %arg5[%c0_105, %c0_106] : memref<256x128xf32, #tpu.memory_space<vmem>>, vector<256x128xf32>
    tpu.vector_store %arg5[%c0_105, %c0_106], %224 {strides = array<i32>} : memref<256x128xf32, #tpu.memory_space<vmem>>, vector<256x128xf32>,
    %226 = vector.extract_strided_slice %2 {offsets = [12, 0], sizes = [1, 128], strides = [1, 1]} : vector<16x128xf32> to vector<1x128xf32>
    %227 = vector.extract_strided_slice %3 {offsets = [12, 0], sizes = [1, 128], strides = [1, 1]} : vector<16x128xf32> to vector<1x128xf32>
    %228 = vector.extract_strided_slice %56 {offsets = [12, 0], sizes = [1, 128], strides = [1, 1]} : vector<16x128xf32> to vector<1x128xf32>
    %229 = vector.extract_strided_slice %9 {offsets = [12, 0], sizes = [1, 128], strides = [1, 1]} : vector<16x128xf32> to vector<1x128xf32>
    %230 = vector.extract_strided_slice %11 {offsets = [12, 0], sizes = [1, 128], strides = [1, 1]} : vector<16x128xf32> to vector<1x128xf32>
    %231 = tpu.concatenate %226, %227, %228, %229, %230, %57 in 0 : vector<1x128xf32>, vector<1x128xf32>, vector<1x128xf32>, vector<1x128xf32>, vector<1x128xf32>, vector<1x128xf32> -> vector<6x128xf32>
    %cst_107 = arith.constant dense<0.000000e+00> : vector<64x128xf32>
    %232 = tpu.matmul %58, %231, %cst_107 {dimension_numbers = #tpu.dot_dimension_numbers<[1], [0], [0], [1], [0, 0, 1, 1], [], []>} : vector<64x6xf32>, vector<6x128xf32>, vector<64x128xf32> -> vector<64x128xf32>
    %cst_108 = arith.constant 0.000000e+00 : f32
    %233 = vector.broadcast %cst_108 : f32 to vector<64x128xf32>
    %234 = arith.maximumf %232, %233 : vector<64x128xf32>
    %235 = arith.truncf %234 : vector<64x128xf32> to vector<64x128xbf16>
    %cst_109 = arith.constant dense<0.000000e+00> : vector<256x128xf32>
    %236 = tpu.matmul %59, %235, %cst_109 {dimension_numbers = #tpu.dot_dimension_numbers<[1], [0], [0], [1], [0, 0, 1, 1], [], []>} : vector<256x64xbf16>, vector<64x128xbf16>, vector<256x128xf32> -> vector<256x128xf32>
    %c0_110 = arith.constant 0 : index
    %c0_111 = arith.constant 0 : index
    %237 = vector.load %arg5[%c0_110, %c0_111] : memref<256x128xf32, #tpu.memory_space<vmem>>, vector<256x128xf32>
    %238 = arith.maximumf %237, %236 : vector<256x128xf32>
    %c0_112 = arith.constant 0 : index
    %c0_113 = arith.constant 0 : index
    %239 = vector.load %arg5[%c0_112, %c0_113] : memref<256x128xf32, #tpu.memory_space<vmem>>, vector<256x128xf32>
    tpu.vector_store %arg5[%c0_112, %c0_113], %238 {strides = array<i32>} : memref<256x128xf32, #tpu.memory_space<vmem>>, vector<256x128xf32>,
    %240 = vector.extract_strided_slice %2 {offsets = [13, 0], sizes = [1, 128], strides = [1, 1]} : vector<16x128xf32> to vector<1x128xf32>
    %241 = vector.extract_strided_slice %3 {offsets = [13, 0], sizes = [1, 128], strides = [1, 1]} : vector<16x128xf32> to vector<1x128xf32>
    %242 = vector.extract_strided_slice %56 {offsets = [13, 0], sizes = [1, 128], strides = [1, 1]} : vector<16x128xf32> to vector<1x128xf32>
    %243 = vector.extract_strided_slice %9 {offsets = [13, 0], sizes = [1, 128], strides = [1, 1]} : vector<16x128xf32> to vector<1x128xf32>
    %244 = vector.extract_strided_slice %11 {offsets = [13, 0], sizes = [1, 128], strides = [1, 1]} : vector<16x128xf32> to vector<1x128xf32>
    %245 = tpu.concatenate %240, %241, %242, %243, %244, %57 in 0 : vector<1x128xf32>, vector<1x128xf32>, vector<1x128xf32>, vector<1x128xf32>, vector<1x128xf32>, vector<1x128xf32> -> vector<6x128xf32>
    %cst_114 = arith.constant dense<0.000000e+00> : vector<64x128xf32>
    %246 = tpu.matmul %58, %245, %cst_114 {dimension_numbers = #tpu.dot_dimension_numbers<[1], [0], [0], [1], [0, 0, 1, 1], [], []>} : vector<64x6xf32>, vector<6x128xf32>, vector<64x128xf32> -> vector<64x128xf32>
    %cst_115 = arith.constant 0.000000e+00 : f32
    %247 = vector.broadcast %cst_115 : f32 to vector<64x128xf32>
    %248 = arith.maximumf %246, %247 : vector<64x128xf32>
    %249 = arith.truncf %248 : vector<64x128xf32> to vector<64x128xbf16>
    %cst_116 = arith.constant dense<0.000000e+00> : vector<256x128xf32>
    %250 = tpu.matmul %59, %249, %cst_116 {dimension_numbers = #tpu.dot_dimension_numbers<[1], [0], [0], [1], [0, 0, 1, 1], [], []>} : vector<256x64xbf16>, vector<64x128xbf16>, vector<256x128xf32> -> vector<256x128xf32>
    %c0_117 = arith.constant 0 : index
    %c0_118 = arith.constant 0 : index
    %251 = vector.load %arg5[%c0_117, %c0_118] : memref<256x128xf32, #tpu.memory_space<vmem>>, vector<256x128xf32>
    %252 = arith.maximumf %251, %250 : vector<256x128xf32>
    %c0_119 = arith.constant 0 : index
    %c0_120 = arith.constant 0 : index
    %253 = vector.load %arg5[%c0_119, %c0_120] : memref<256x128xf32, #tpu.memory_space<vmem>>, vector<256x128xf32>
    tpu.vector_store %arg5[%c0_119, %c0_120], %252 {strides = array<i32>} : memref<256x128xf32, #tpu.memory_space<vmem>>, vector<256x128xf32>,
    %254 = vector.extract_strided_slice %2 {offsets = [14, 0], sizes = [1, 128], strides = [1, 1]} : vector<16x128xf32> to vector<1x128xf32>
    %255 = vector.extract_strided_slice %3 {offsets = [14, 0], sizes = [1, 128], strides = [1, 1]} : vector<16x128xf32> to vector<1x128xf32>
    %256 = vector.extract_strided_slice %56 {offsets = [14, 0], sizes = [1, 128], strides = [1, 1]} : vector<16x128xf32> to vector<1x128xf32>
    %257 = vector.extract_strided_slice %9 {offsets = [14, 0], sizes = [1, 128], strides = [1, 1]} : vector<16x128xf32> to vector<1x128xf32>
    %258 = vector.extract_strided_slice %11 {offsets = [14, 0], sizes = [1, 128], strides = [1, 1]} : vector<16x128xf32> to vector<1x128xf32>
    %259 = tpu.concatenate %254, %255, %256, %257, %258, %57 in 0 : vector<1x128xf32>, vector<1x128xf32>, vector<1x128xf32>, vector<1x128xf32>, vector<1x128xf32>, vector<1x128xf32> -> vector<6x128xf32>
    %cst_121 = arith.constant dense<0.000000e+00> : vector<64x128xf32>
    %260 = tpu.matmul %58, %259, %cst_121 {dimension_numbers = #tpu.dot_dimension_numbers<[1], [0], [0], [1], [0, 0, 1, 1], [], []>} : vector<64x6xf32>, vector<6x128xf32>, vector<64x128xf32> -> vector<64x128xf32>
    %cst_122 = arith.constant 0.000000e+00 : f32
    %261 = vector.broadcast %cst_122 : f32 to vector<64x128xf32>
    %262 = arith.maximumf %260, %261 : vector<64x128xf32>
    %263 = arith.truncf %262 : vector<64x128xf32> to vector<64x128xbf16>
    %cst_123 = arith.constant dense<0.000000e+00> : vector<256x128xf32>
    %264 = tpu.matmul %59, %263, %cst_123 {dimension_numbers = #tpu.dot_dimension_numbers<[1], [0], [0], [1], [0, 0, 1, 1], [], []>} : vector<256x64xbf16>, vector<64x128xbf16>, vector<256x128xf32> -> vector<256x128xf32>
    %c0_124 = arith.constant 0 : index
    %c0_125 = arith.constant 0 : index
    %265 = vector.load %arg5[%c0_124, %c0_125] : memref<256x128xf32, #tpu.memory_space<vmem>>, vector<256x128xf32>
    %266 = arith.maximumf %265, %264 : vector<256x128xf32>
    %c0_126 = arith.constant 0 : index
    %c0_127 = arith.constant 0 : index
    %267 = vector.load %arg5[%c0_126, %c0_127] : memref<256x128xf32, #tpu.memory_space<vmem>>, vector<256x128xf32>
    tpu.vector_store %arg5[%c0_126, %c0_127], %266 {strides = array<i32>} : memref<256x128xf32, #tpu.memory_space<vmem>>, vector<256x128xf32>,
    %268 = vector.extract_strided_slice %2 {offsets = [15, 0], sizes = [1, 128], strides = [1, 1]} : vector<16x128xf32> to vector<1x128xf32>
    %269 = vector.extract_strided_slice %3 {offsets = [15, 0], sizes = [1, 128], strides = [1, 1]} : vector<16x128xf32> to vector<1x128xf32>
    %270 = vector.extract_strided_slice %56 {offsets = [15, 0], sizes = [1, 128], strides = [1, 1]} : vector<16x128xf32> to vector<1x128xf32>
    %271 = vector.extract_strided_slice %9 {offsets = [15, 0], sizes = [1, 128], strides = [1, 1]} : vector<16x128xf32> to vector<1x128xf32>
    %272 = vector.extract_strided_slice %11 {offsets = [15, 0], sizes = [1, 128], strides = [1, 1]} : vector<16x128xf32> to vector<1x128xf32>
    %273 = tpu.concatenate %268, %269, %270, %271, %272, %57 in 0 : vector<1x128xf32>, vector<1x128xf32>, vector<1x128xf32>, vector<1x128xf32>, vector<1x128xf32>, vector<1x128xf32> -> vector<6x128xf32>
    %cst_128 = arith.constant dense<0.000000e+00> : vector<64x128xf32>
    %274 = tpu.matmul %58, %273, %cst_128 {dimension_numbers = #tpu.dot_dimension_numbers<[1], [0], [0], [1], [0, 0, 1, 1], [], []>} : vector<64x6xf32>, vector<6x128xf32>, vector<64x128xf32> -> vector<64x128xf32>
    %cst_129 = arith.constant 0.000000e+00 : f32
    %275 = vector.broadcast %cst_129 : f32 to vector<64x128xf32>
    %276 = arith.maximumf %274, %275 : vector<64x128xf32>
    %277 = arith.truncf %276 : vector<64x128xf32> to vector<64x128xbf16>
    %cst_130 = arith.constant dense<0.000000e+00> : vector<256x128xf32>
    %278 = tpu.matmul %59, %277, %cst_130 {dimension_numbers = #tpu.dot_dimension_numbers<[1], [0], [0], [1], [0, 0, 1, 1], [], []>} : vector<256x64xbf16>, vector<64x128xbf16>, vector<256x128xf32> -> vector<256x128xf32>
    %c0_131 = arith.constant 0 : index
    %c0_132 = arith.constant 0 : index
    %279 = vector.load %arg5[%c0_131, %c0_132] : memref<256x128xf32, #tpu.memory_space<vmem>>, vector<256x128xf32>
    %280 = arith.maximumf %279, %278 : vector<256x128xf32>
    %c0_133 = arith.constant 0 : index
    %c0_134 = arith.constant 0 : index
    %281 = vector.load %arg5[%c0_133, %c0_134] : memref<256x128xf32, #tpu.memory_space<vmem>>, vector<256x128xf32>
    tpu.vector_store %arg5[%c0_133, %c0_134], %280 {strides = array<i32>} : memref<256x128xf32, #tpu.memory_space<vmem>>, vector<256x128xf32>,
    %c0_135 = arith.constant 0 : index
    %c0_136 = arith.constant 0 : index
    %282 = vector.load %arg5[%c0_135, %c0_136] : memref<256x128xf32, #tpu.memory_space<vmem>>, vector<256x128xf32>
    %c0_137 = arith.constant 0 : index
    %c0_138 = arith.constant 0 : index
    %283 = vector.load %arg4[%c0_137, %c0_138] : memref<256x1xf32, #tpu.memory_space<vmem>>, vector<256x1xf32>
    %284 = vector.broadcast %283 : vector<256x1xf32> to vector<256x128xf32>
    %285 = arith.addf %282, %284 : vector<256x128xf32>
    %c0_139 = arith.constant 0 : index
    %c0_140 = arith.constant 0 : index
    %286 = vector.load %arg5[%c0_139, %c0_140] : memref<256x128xf32, #tpu.memory_space<vmem>>, vector<256x128xf32>
    tpu.vector_store %arg5[%c0_139, %c0_140], %285 {strides = array<i32>} : memref<256x128xf32, #tpu.memory_space<vmem>>, vector<256x128xf32>,
    return
  }
  func.func @transform_0(%arg0: i32) -> (i32, i32) {
    %c0_i32 = arith.constant 0 : i32
    %c0_i32_0 = arith.constant 0 : i32
    return %c0_i32, %arg0 : i32, i32
  }
  func.func @transform_1(%arg0: i32) -> (i32, i32) {
    %c0_i32 = arith.constant 0 : i32
    %c0_i32_0 = arith.constant 0 : i32
    %c0_i32_1 = arith.constant 0 : i32
    return %c0_i32, %c0_i32_0 : i32, i32
  }
  func.func @transform_2(%arg0: i32) -> (i32, i32) {
    %c0_i32 = arith.constant 0 : i32
    %c0_i32_0 = arith.constant 0 : i32
    %c0_i32_1 = arith.constant 0 : i32
    return %c0_i32, %c0_i32_0 : i32, i32
  }
  func.func @transform_3(%arg0: i32) -> (i32, i32) {
    %c0_i32 = arith.constant 0 : i32
    %c0_i32_0 = arith.constant 0 : i32
    %c0_i32_1 = arith.constant 0 : i32
    return %c0_i32, %c0_i32_0 : i32, i32
  }
  func.func @transform_4(%arg0: i32) -> (i32, i32) {
    %c0_i32 = arith.constant 0 : i32
    %c0_i32_0 = arith.constant 0 : i32
    return %c0_i32, %arg0 : i32, i32
  }
}

</mosaic_0001>

<bundles_post_ra>
// kernel: tpu_custom_call.1
= control target key start
LH: loop header
LB: loop body
LE: loop exit
PB: predicated region body
PF: predicated region fallthrough
CT: control target
= control target key end

     0   :  { %s8137_s0 = inlined_call_operand.vmem [shape: f32[34,128], index: 0, kind: input, shape index: {}]   ;;  %s8138_s1 = inlined_call_operand.vmem [shape: f32[64,6], index: 1, kind: input, shape index: {}]   ;;  %s8139_s2 = inlined_call_operand.vmem [shape: bf16[256,64], index: 2, kind: input, shape index: {}]   ;;  %s8140_s3 = inlined_call_operand.vmem [shape: f32[256,1], index: 3, kind: input, shape index: {}]   ;;  %s8141_s4 = inlined_call_operand.hbm [shape: f32[256,128], index: 4, kind: output, shape index: {}]  }
   0x1   :  { %v5441_v0 = vld [vmem:[%s8137_s0] sm:$0xff] }
   0x2   :  { %9 = vsyncpa [#allocation3], 0  ;;  %v5444_v1 = vrot.slane %v5441_v0, 7  ;;  %v5454_v4 = vld [vmem:[%s8137_s0 + $0x11] sm:$0xff]  ;;  %v8144_v53 = vmov 0.0   ;;  %v656_v59 = vrot.slane %v5441_v0, 2 }
   0x3   :  { %v8146_v7 = vrot.slane %v5454_v4, 7  ;;  %v658_v60 = vrot.slane %v5454_v4, 1  ;;  %vm27_vm15 = vcmask 1040384   ;;  %v8142_v63 = vmov -1.0   ;;  %s5411_s23 = smov 128   ;;  %s5412_s24 = smov 8  }
   0x4   :  { %v5448_v2 = vsub.f32 %v5441_v0, %v5444_v1 }
   0x5   :  { %v45_v13 = vsub.f32 %v5454_v4, %v8146_v7 }
   0x6   :  { %v54_v3 = vmax.f32 %v5448_v2, 1e-06  ;;  %v5463_v57 = vmul.f32 10.0, %v5448_v2  ;;  %v912_v2 = vrot.slane %v5454_v4, 2 }
   0x7   :  { %v5468_v61 = vmul.f32 10.0, %v45_v13 }
   0x8   :  { %5288 = vrcp.f32 %v54_v3  ;;  %v68_v8 = vand.u32 2147483648, %v54_v3  ;;  %vm62_vm0 = vweird.f32 %v54_v3  ;;  %v66_v10 = vand.u32 2147483647, %v54_v3 }
   0xa   :  { %v69_v12 = vor.u32 1.1754944e-38, %v68_v8  ;;  %vm67_vm3 = vcmp.eq.f32.partialorder %v66_v10, 8.507059e+37  ;;  %v660_v10 = vrot.slane %v5463_v57, 7 }
   0xe   :  { %v5289_v5 = vpop.eup %5288 }
   0xf   :  { %v58_v6 = vmul.f32 %v5289_v5, %v54_v3  ;;  %vm63_vm1 = vweird.f32 %v5289_v5 }
  0x10   :  { %vm64_vm2 = vmor %vm62_vm0, %vm63_vm1  ;;  %vm316_vm0 = vcmask 1041408   ;;  %vm318_vm1 = vcmask 1042432  }
  0x11   :  { %v59_v9 = vsub.f32 1.0, %v58_v6  ;;  %v910_v6 = vrot.slane %v5441_v0, 3 }
  0x13   :  { %v60_v11 = vmul.f32 %v5289_v5, %v59_v9  ;;  %v310_v9 = vrot.slane %v5463_v57, 6 }
  0x15   :  { %v61_v14 = vadd.f32 %v5289_v5, %v60_v11  ;;  %v664_v11 = vsel %vm27_vm15, %v656_v59, %v658_v60 }
  0x17   :  { %v65_v15 = vsel %vm64_vm2, %v5289_v5, %v61_v14  ;;  %v304_v5 = vrot.slane %v5441_v0, 1  ;;  %v662_v14 = vrot.slane %v5468_v61, 6  ;;  %vm320_vm2 = vcmask 1043456  }
  0x18   :  { %v70_v16 = vsel %vm67_vm3, %v69_v12, %v65_v15  ;;  %vm322_vm3 = vcmask 1044480  }
  0x19   :  { %v71_v17 = vmul.f32 %v70_v16, %v45_v13  ;;  %v313_v13 = vrot.slane %v5468_v61, 5  ;;  %v315_v15 = vsel %vm27_vm15, %v304_v5, %v5454_v4  ;;  %v918_v16 = vsel %vm27_vm15, %v910_v6, %v912_v2 }
  0x1b   :  { %v108_v18 = vand.u32 2147483647, %v71_v17  ;;  %vm102_vm14 = vcmp.ge.f32.partialorder %v71_v17, 0.0 }
  0x1c   :  { %v105_v3 = vsel %vm102_vm14, 1.0, %v8142_v63 }
  0x1d   :  { %v117_v19 = vmax.f32 %v108_v18, 1e-30  ;;  %v168_v20 = vadd.f32 1.0, %v108_v18  ;;  %v4785_v36 = vadd.f32 -1.0, %v108_v18  ;;  %vm114_vm12 = vcmp.gt.f32.partialorder %v108_v18, 0.41421357 }
  0x1e   :  { %vm111_vm13 = vcmp.gt.f32.partialorder %v108_v18, 2.4142137  ;;  %v222_v54 = vsel %vm114_vm12, 0.7853982, %v8144_v53  ;;  %v1936_v53 = vrot.slane %v5468_v61, 3 }
  0x1f   :  { %5290 = vrcp.f32 %v117_v19  ;;  %vm125_vm4 = vweird.f32 %v117_v19  ;;  %v131_v24 = vand.u32 2147483648, %v117_v19  ;;  %v129_v27 = vand.u32 2147483647, %v117_v19 }
  0x20   :  { %5292 = vrcp.f32 %v168_v20  ;;  %v182_v28 = vand.u32 2147483648, %v168_v20  ;;  %vm176_vm6 = vweird.f32 %v168_v20  ;;  %v180_v30 = vand.u32 2147483647, %v168_v20 }
  0x21   :  { %v132_v32 = vor.u32 1.1754944e-38, %v131_v24  ;;  %vm130_vm9 = vcmp.eq.f32.partialorder %v129_v27, 8.507059e+37  ;;  %v225_v58 = vsel %vm111_vm13, 1.5707964, %v222_v54  ;;  %v5495_v24 = vld [vmem:[%s8138_s1] sm:$0xff] }
  0x22   :  { %v183_v35 = vor.u32 1.1754944e-38, %v182_v28  ;;  %vm181_vm11 = vcmp.eq.f32.partialorder %v180_v30, 8.507059e+37 }
  0x25   :  { %v5291_v21 = vpop.eup %5290 }
  0x26   :  { %v5293_v22 = vpop.eup %5292  ;;  %v121_v23 = vmul.f32 %v5291_v21, %v117_v19  ;;  %vm126_vm5 = vweird.f32 %v5291_v21  ;;  %v916_v19 = vrot.slane %v5468_v61, 7 }
  0x27   :  { %v172_v25 = vmul.f32 %v5293_v22, %v168_v20  ;;  %vm177_vm7 = vweird.f32 %v5293_v22  ;;  %vm127_vm8 = vmor %vm125_vm4, %vm126_vm5  ;;  %vm349_vm4 = vcmask 1045504   ;;  %vm324_vm5 = vcmask 48128  }
  0x28   :  { %v122_v26 = vsub.f32 1.0, %v121_v23  ;;  %vm178_vm10 = vmor %vm176_vm6, %vm177_vm7  ;;  %vm486_vm6 = vcmask 523264  }
  0x29   :  { %v173_v29 = vsub.f32 1.0, %v172_v25 }
  0x2a   :  { %v123_v31 = vmul.f32 %v5291_v21, %v122_v26 }
  0x2b   :  { %v174_v33 = vmul.f32 %v5293_v22, %v173_v29 }
  0x2c   :  { %v124_v34 = vadd.f32 %v5291_v21, %v123_v31 }
  0x2d   :  { %v175_v37 = vadd.f32 %v5293_v22, %v174_v33  ;;  %v5518_v33 = vld [vmem:[%s8138_s1 + $0x8] sm:$0xff] }
  0x2e   :  { %v128_v38 = vsel %vm127_vm8, %v5291_v21, %v124_v34  ;;  %v5529_v34 = vld [vmem:[%s8138_s1 + $0x10] sm:$0xff] }
  0x2f   :  { %v133_v39 = vsel %vm130_vm9, %v132_v32, %v128_v38  ;;  %v179_v40 = vsel %vm178_vm10, %v5293_v22, %v175_v37  ;;  %v1166_v37 = vrot.slane %v5454_v4, 3 }
  0x30   :  { %v134_v41 = vmul.f32 -1.0, %v133_v39  ;;  %v184_v42 = vsel %vm181_vm11, %v183_v35, %v179_v40  ;;  %v5540_v35 = vld [vmem:[%s8138_s1 + $0x18] sm:$0xff]  ;;  %v1170_v39 = vrot.slane %v5463_v57, 1 }
  0x31   :  { %v185_v43 = vmul.f32 %v4785_v36, %v184_v42  ;;  %v1164_v36 = vrot.slane %v5441_v0, 4 }
  0x33   :  { %v216_v44 = vsel %vm114_vm12, %v185_v43, %v108_v18  ;;  %v1172_v40 = vsel %vm27_vm15, %v1164_v36, %v1166_v37 }
  0x34   :  { %v219_v45 = vsel %vm111_vm13, %v134_v41, %v216_v44  ;;  %v5556_v41 = vld [vmem:[%s8138_s1 + $0x20] sm:$0xff] }
  0x35   :  { %v228_v46 = vmul.f32 %v219_v45, %v219_v45 }
  0x37   :  { %v231_v47 = vmul.f32 0.080537446, %v228_v46 }
  0x39   :  { %v4788_v48 = vadd.f32 -0.13877685, %v231_v47  ;;  %v5584_v47 = vld [vmem:[%s8138_s1 + $0x30] sm:$0xff] }
  0x3b   :  { %v237_v49 = vmul.f32 %v4788_v48, %v228_v46  ;;  %v5595_v48 = vld [vmem:[%s8138_s1 + $0x38] sm:$0xff] }
  0x3d   :  { %v240_v50 = vadd.f32 0.19977711, %v237_v49 }
  0x3f   :  { %v243_v51 = vmul.f32 %v240_v50, %v228_v46 }
  0x41   :  { %v4791_v52 = vadd.f32 -0.3333295, %v243_v51 }
  0x43   :  { %v249_v55 = vmul.f32 %v4791_v52, %v228_v46  ;;  %v5573_v46 = vld [vmem:[%s8138_s1 + $0x28] sm:$0xff] }
  0x45   :  { %v252_v56 = vmul.f32 %v249_v55, %v219_v45 }
  0x47   :  { %v255_v62 = vadd.f32 %v252_v56, %v219_v45 }
  0x49   :  { %v258_v8 = vadd.f32 %v255_v62, %v225_v58 }
  0x4b   :  { %v5477_v12 = vmul.f32 %v258_v8, %v105_v3 }
  0x4d   :  { %v307_v17 = vrot.slane %v5477_v12, 7  ;;  %v914_v18 = vrot.slane %v5477_v12, 1  ;;  %v665_v20 = vsel %vm316_vm0, %v664_v11, %v5477_v12  ;;  %v1168_v38 = vrot.slane %v5477_v12, 2 }
  0x4e   :  { %v666_v21 = vsel %vm318_vm1, %v665_v20, %v660_v10 }
  0x4f   :  { %v317_v22 = vsel %vm316_vm0, %v315_v15, %v307_v17  ;;  %v919_v23 = vsel %vm316_vm0, %v918_v16, %v914_v18  ;;  %v667_v25 = vsel %vm320_vm2, %v666_v21, %v662_v14  ;;  %v1173_v42 = vsel %vm316_vm0, %v1172_v40, %v1168_v38 }
  0x50   :  { %v319_v26 = vsel %vm318_vm1, %v317_v22, %v310_v9  ;;  %v920_v27 = vsel %vm318_vm1, %v919_v23, %v5463_v57  ;;  %v668_v28 = vsel %vm322_vm3, %v667_v25, 1.0  ;;  %v1174_v43 = vsel %vm318_vm1, %v1173_v42, %v1170_v39 }
  0x51   :  { %v321_v29 = vsel %vm320_vm2, %v319_v26, %v313_v13  ;;  %v921_v30 = vsel %vm320_vm2, %v920_v27, %v916_v19  ;;  %4883 = vmatpush.msk.msra.mxu2 %vm349_vm4, %v668_v28  ;;  %v1175_v44 = vsel %vm320_vm2, %v1174_v43, %v5468_v61 }
  0x52   :  { %v323_v31 = vsel %vm322_vm3, %v321_v29, 1.0  ;;  %v922_v32 = vsel %vm322_vm3, %v921_v30, 1.0  ;;  %4884 = vmatmul.msk.f32.vlgmr.msra.gmra.mxu2 %vm324_vm5, %v5495_v24  ;;  %v1176_v45 = vsel %vm322_vm3, %v1175_v44, 1.0 }
  0x53   :  { %4794 = vmatpush.msk.msra.mxu3 %vm349_vm4, %v323_v31  ;;  %4908 = vmatpush.msk.msra.mxu0 %vm349_vm4, %v922_v32 }
  0x54   :  { %4795 = vmatmul.msk.f32.vlgmr.msra.gmra.mxu3 %vm324_vm5, %v5495_v24  ;;  %4909 = vmatmul.msk.f32.vlgmr.msra.gmra.mxu0 %vm324_vm5, %v5495_v24 }
  0x55   :  { %4933 = vmatpush.msk.msrb.mxu0 %vm349_vm4, %v1176_v45 }
  0x5a   :  { %4885 = vmatmul.msk.f32.gmra.mxu2 %vm324_vm5, %v5518_v33 }
  0x5c   :  { %4796 = vmatmul.msk.f32.gmra.mxu3 %vm324_vm5, %v5518_v33  ;;  %4910 = vmatmul.msk.f32.gmra.mxu0 %vm324_vm5, %v5518_v33 }
  0x62   :  { %4886 = vmatmul.msk.f32.gmra.mxu2 %vm324_vm5, %v5529_v34 }
  0x64   :  { %4797 = vmatmul.msk.f32.gmra.mxu3 %vm324_vm5, %v5529_v34  ;;  %4911 = vmatmul.msk.f32.gmra.mxu0 %vm324_vm5, %v5529_v34 }
  0x6a   :  { %4887 = vmatmul.msk.f32.gmra.mxu2 %vm324_vm5, %v5540_v35 }
  0x6c   :  { %4798 = vmatmul.msk.f32.gmra.mxu3 %vm324_vm5, %v5540_v35  ;;  %4912 = vmatmul.msk.f32.gmra.mxu0 %vm324_vm5, %v5540_v35 }
  0x72   :  { %4888 = vmatmul.msk.f32.gmra.mxu2 %vm324_vm5, %v5556_v41 }
  0x74   :  { %4799 = vmatmul.msk.f32.gmra.mxu3 %vm324_vm5, %v5556_v41  ;;  %4913 = vmatmul.msk.f32.gmra.mxu0 %vm324_vm5, %v5556_v41 }
  0x7a   :  { %4889 = vmatmul.msk.f32.gmra.mxu2 %vm324_vm5, %v5573_v46 }
  0x7c   :  { %4800 = vmatmul.msk.f32.gmra.mxu3 %vm324_vm5, %v5573_v46  ;;  %4914 = vmatmul.msk.f32.gmra.mxu0 %vm324_vm5, %v5573_v46 }
  0x82   :  { %4890 = vmatmul.msk.f32.gmra.mxu2 %vm324_vm5, %v5584_v47 }
  0x84   :  { %4801 = vmatmul.msk.f32.gmra.mxu3 %vm324_vm5, %v5584_v47  ;;  %4915 = vmatmul.msk.f32.gmra.mxu0 %vm324_vm5, %v5584_v47 }
  0x8a   :  { %4891 = vmatmul.msk.f32.gmra.mxu2 %vm324_vm5, %v5595_v48 }
  0x8c   :  { %4802 = vmatmul.msk.f32.gmra.mxu3 %vm324_vm5, %v5595_v48  ;;  %4916 = vmatmul.msk.f32.gmra.mxu0 %vm324_vm5, %v5595_v48 }
  0x94   :  { %4934 = vmatmul.msk.f32.vlgmr.msrb.gmra.mxu0 %vm324_vm5, %v5495_v24 }
  0x9c   :  { %4935 = vmatmul.msk.f32.gmra.mxu0 %vm324_vm5, %v5518_v33 }
  0xa4   :  { %4936 = vmatmul.msk.f32.gmra.mxu0 %vm324_vm5, %v5529_v34 }
  0xac   :  { %4937 = vmatmul.msk.f32.gmra.mxu0 %vm324_vm5, %v5540_v35 }
  0xb4   :  { %4938 = vmatmul.msk.f32.gmra.mxu0 %vm324_vm5, %v5556_v41 }
  0xbc   :  { %4939 = vmatmul.msk.f32.gmra.mxu0 %vm324_vm5, %v5573_v46 }
  0xc4   :  { %4940 = vmatmul.msk.f32.gmra.mxu0 %vm324_vm5, %v5584_v47 }
  0xcc   :  { %4941 = vmatmul.msk.f32.gmra.mxu0 %vm324_vm5, %v5595_v48 }
  0xd1   :  { %v5619_v49 = vpop.f32.mrf.mxu0 }
  0xd5   :  { %v689_v50 = vpop.f32.mrf.mxu2 }
  0xd6   :  { %v713_v36 = vmax.f32 %v689_v50, 0.0 }
  0xd7   :  { %v370_v51 = vpop.f32.mrf.mxu3 }
  0xd9   :  { %v5621_v52 = vpop.f32.mrf.mxu0 }
  0xdd   :  { %v692_v54 = vpop.f32.mrf.mxu2 }
  0xde   :  { %v714_v37 = vmax.f32 %v692_v54, 0.0 }
  0xdf   :  { %v373_v55 = vpop.f32.mrf.mxu3 }
  0xe0   :  { %v395_v44 = vmax.f32 %v373_v55, 0.0 }
  0xe1   :  { %v5623_v56 = vpop.f32.mrf.mxu0 }
  0xe5   :  { %v695_v58 = vpop.f32.mrf.mxu2 }
  0xe6   :  { %v715_v26 = vmax.f32 %v695_v58, 0.0  ;;  %v721_v58 = vpack.c.bf16 %v714_v37, %v713_v36  ;;  %v968_v36 = vmax.f32 %v5621_v52, 0.0  ;;  %v5702_v52 = vld [vmem:[%s8139_s2 + $0x28] sm:$0xff] }
  0xe7   :  { %v376_v59 = vpop.f32.mrf.mxu3 }
  0xe8   :  { %v396_v42 = vmax.f32 %v376_v59, 0.0 }
  0xe9   :  { %v5625_v60 = vpop.f32.mrf.mxu0 }
  0xed   :  { %v698_v62 = vpop.f32.mrf.mxu2 }
  0xee   :  { %v716_v28 = vmax.f32 %v698_v62, 0.0  ;;  %v394_v62 = vmax.f32 %v370_v51, 0.0  ;;  %v5649_v51 = vld [vmem:[%s8139_s2 + $0x8] sm:$0xff] }
  0xef   :  { %v379_v3 = vpop.f32.mrf.mxu3 }
  0xf0   :  { %v397_v38 = vmax.f32 %v379_v3, 0.0  ;;  %v722_v40 = vpack.c.bf16 %v716_v28, %v715_v26  ;;  %v402_v50 = vpack.c.bf16 %v395_v44, %v394_v62  ;;  %v5753_v44 = vld [vmem:[%s8139_s2 + $0x58] sm:$0xff] }
  0xf1   :  { %v5627_v5 = vpop.f32.mrf.mxu0 }
  0xf2   :  { %v403_v45 = vpack.c.bf16 %v397_v38, %v396_v42  ;;  %v971_v26 = vmax.f32 %v5627_v5, 0.0  ;;  %v970_v5 = vmax.f32 %v5625_v60, 0.0  ;;  %v5709_v38 = vld [vmem:[%s8139_s2 + $0x40] sm:$0xff]  ;;  %v5739_v42 = vld [vmem:[%s8139_s2 + $0x50] sm:$0xff] }
  0xf5   :  { %v701_v6 = vpop.f32.mrf.mxu2 }
  0xf6   :  { %v717_v18 = vmax.f32 %v701_v6, 0.0  ;;  %v5640_v6 = vld [vmem:[%s8139_s2] sm:$0xff] }
  0xf7   :  { %v382_v2 = vpop.f32.mrf.mxu3 }
  0xf8   :  { %v398_v32 = vmax.f32 %v382_v2, 0.0  ;;  %v5658_v2 = vld [vmem:[%s8139_s2 + $0x10] sm:$0xff] }
  0xf9   :  { %v5629_v8 = vpop.f32.mrf.mxu0 }
  0xfa   :  { %v972_v28 = vmax.f32 %v5629_v8, 0.0 }
  0xfc   :  { %v977_v8 = vpack.c.bf16 %v972_v28, %v971_v26  ;;  %v5801_v26 = vld [vmem:[%s8139_s2 + $0x70] sm:$0xff] }
  0xfd   :  { %v704_v9 = vpop.f32.mrf.mxu2 }
  0xfe   :  { %v718_v19 = vmax.f32 %v704_v9, 0.0 }
  0xff   :  { %v385_v10 = vpop.f32.mrf.mxu3 }
 0x100   :  { %v399_v29 = vmax.f32 %v385_v10, 0.0  ;;  %v723_v31 = vpack.c.bf16 %v718_v19, %v717_v18 }
 0x101   :  { %v5631_v11 = vpop.f32.mrf.mxu0 }
 0x102   :  { %v404_v39 = vpack.c.bf16 %v399_v29, %v398_v32  ;;  %v973_v19 = vmax.f32 %v5631_v11, 0.0 }
 0x105   :  { %v707_v13 = vpop.f32.mrf.mxu2 }
 0x106   :  { %v719_v16 = vmax.f32 %v707_v13, 0.0 }
 0x107   :  { %v388_v14 = vpop.f32.mrf.mxu3 }
 0x108   :  { %v400_v22 = vmax.f32 %v388_v14, 0.0 }
 0x109   :  { %v5633_v15 = vpop.f32.mrf.mxu0 }
 0x10d   :  { %v710_v17 = vpop.f32.mrf.mxu2 }
 0x10e   :  { %v720_v20 = vmax.f32 %v710_v17, 0.0 }
 0x10f   :  { %v391_v21 = vpop.f32.mrf.mxu3 }
 0x110   :  { %v401_v23 = vmax.f32 %v391_v21, 0.0  ;;  %v724_v25 = vpack.c.bf16 %v720_v20, %v719_v16  ;;  %v5668_v20 = vld [vmem:[%s8139_s2 + $0x18] sm:$0xff]  ;;  %v974_v21 = vmax.f32 %v5633_v15, 0.0  ;;  %v969_v15 = vmax.f32 %v5623_v56, 0.0  ;;  %v5687_v56 = vld [vmem:[%s8139_s2 + $0x20] sm:$0xff] }
 0x111   :  { %v5635_v27 = vpop.f32.mrf.mxu0 }
 0x112   :  { %v405_v30 = vpack.c.bf16 %v401_v23, %v400_v22  ;;  %729 = vmatpush.bf16.msrb.mxu3 %v724_v25  ;;  %v1221_v11 = vmax.f32 %v5635_v27, 0.0  ;;  %v967_v27 = vmax.f32 %v5619_v49, 0.0  ;;  %v976_v37 = vpack.c.bf16 %v970_v5, %v969_v15  ;;  %v5265_v49 = vld [vmem:[%s8139_s2 + $0x38] sm:$0xff] }
 0x114   :  { %539 = vmatpush.bf16.msra.mxu1 %v405_v30  ;;  %v975_v60 = vpack.c.bf16 %v968_v36, %v967_v27 }
 0x116   :  { %730 = vmatpush.bf16.msrb.mxu3 %v723_v31  ;;  %v978_v31 = vpack.c.bf16 %v974_v21, %v973_v19 }
 0x118   :  { %540 = vmatpush.bf16.msra.mxu1 %v404_v39  ;;  %5274 = vmatpush.bf16.msrb.mxu2 %v978_v31  ;;  %v5720_v39 = vld [vmem:[%s8139_s2 + $0x30] sm:$0xff] }
 0x119   :  { %v1200_v43 = vpop.f32.mrf.mxu0 }
 0x11a   :  { %731 = vmatpush.bf16.msrb.mxu3 %v722_v40  ;;  %v1222_v29 = vmax.f32 %v1200_v43, 0.0  ;;  %v5727_v40 = vld [vmem:[%s8139_s2 + $0x48] sm:$0xff] }
 0x11c   :  { %541 = vmatpush.bf16.msra.mxu1 %v403_v45  ;;  %v1229_v32 = vpack.c.bf16 %v1222_v29, %v1221_v11  ;;  %5275 = vmatpush.bf16.msrb.mxu2 %v977_v8 }
 0x11e   :  { %732 = vmatpush.bf16.msrb.mxu3 %v721_v58 }
 0x120   :  { %542 = vmatpush.bf16.msra.mxu1 %v402_v50  ;;  %5276 = vmatpush.bf16.msrb.mxu2 %v976_v37 }
 0x121   :  { %v1203_v54 = vpop.f32.mrf.mxu0  ;;  %4892 = vmatmul.msk.bf16.vlgmr.msrb.gmra.mxu3 %vm486_vm6, %v5640_v6 }
 0x122   :  { %v1223_v22 = vmax.f32 %v1203_v54, 0.0 }
 0x123   :  { %4867 = vmatmul.msk.bf16.vlgmr.msra.gmra.mxu1 %vm486_vm6, %v5640_v6 }
 0x124   :  { %983 = vmatpush.bf16.msrb.mxu1 %v978_v31  ;;  %5277 = vmatpush.bf16.msrb.mxu2 %v975_v60 }
 0x127   :  { %4924 = vmatmul.msk.bf16.vlgmr.msrb.gmra.mxu2 %vm486_vm6, %v5265_v49 }
 0x128   :  { %984 = vmatpush.bf16.msrb.mxu1 %v977_v8 }
 0x129   :  { %v1206_v55 = vpop.f32.mrf.mxu0 }
 0x12a   :  { %v1224_v23 = vmax.f32 %v1206_v55, 0.0 }
 0x12c   :  { %v1230_v30 = vpack.c.bf16 %v1224_v23, %v1223_v22  ;;  %985 = vmatpush.bf16.msrb.mxu1 %v976_v37 }
 0x130   :  { %986 = vmatpush.bf16.msrb.mxu1 %v975_v60 }
 0x131   :  { %v1209_v59 = vpop.f32.mrf.mxu0  ;;  %4893 = vmatmul.msk.bf16.gmra.mxu3 %vm486_vm6, %v5649_v51 }
 0x132   :  { %v1225_v14 = vmax.f32 %v1209_v59, 0.0  ;;  %v5776_v59 = vld [vmem:[%s8139_s2 + $0x60] sm:$0xff] }
 0x133   :  { %4868 = vmatmul.msk.bf16.gmra.mxu1 %vm486_vm6, %v5649_v51 }
 0x137   :  { %4925 = vmatmul.msk.bf16.gmra.mxu2 %vm486_vm6, %v5709_v38 }
 0x139   :  { %v1212_v3 = vpop.f32.mrf.mxu0 }
 0x13a   :  { %v1226_v16 = vmax.f32 %v1212_v3, 0.0 }
 0x13c   :  { %v1231_v25 = vpack.c.bf16 %v1226_v16, %v1225_v14 }
 0x141   :  { %v1215_v9 = vpop.f32.mrf.mxu0  ;;  %4894 = vmatmul.msk.bf16.gmra.mxu3 %vm486_vm6, %v5658_v2 }
 0x142   :  { %v1227_v10 = vmax.f32 %v1215_v9, 0.0 }
 0x143   :  { %4869 = vmatmul.msk.bf16.gmra.mxu1 %vm486_vm6, %v5658_v2 }
 0x147   :  { %4926 = vmatmul.msk.bf16.gmra.mxu2 %vm486_vm6, %v5727_v40 }
 0x149   :  { %v1218_v13 = vpop.f32.mrf.mxu0 }
 0x14a   :  { %v1228_v17 = vmax.f32 %v1218_v13, 0.0 }
 0x14c   :  { %v1232_v18 = vpack.c.bf16 %v1228_v17, %v1227_v10  ;;  %v5789_v17 = vld [vmem:[%s8139_s2 + $0x68] sm:$0xff] }
 0x14e   :  { %1237 = vmatpush.bf16.msra.mxu0 %v1232_v18 }
 0x151   :  { %4895 = vmatmul.msk.bf16.gmra.mxu3 %vm486_vm6, %v5668_v20 }
 0x152   :  { %1238 = vmatpush.bf16.msra.mxu0 %v1231_v25 }
 0x153   :  { %4870 = vmatmul.msk.bf16.gmra.mxu1 %vm486_vm6, %v5668_v20 }
 0x156   :  { %1239 = vmatpush.bf16.msra.mxu0 %v1230_v30 }
 0x157   :  { %4927 = vmatmul.msk.bf16.gmra.mxu2 %vm486_vm6, %v5739_v42 }
 0x15a   :  { %1240 = vmatpush.bf16.msra.mxu0 %v1229_v32  ;;  %v5816_v32 = vld [vmem:[%s8139_s2 + $0x78] sm:$0xff] }
 0x15d   :  { %4942 = vmatmul.msk.bf16.vlgmr.msra.gmra.mxu0 %vm486_vm6, %v5640_v6 }
 0x161   :  { %4896 = vmatmul.msk.bf16.gmra.mxu3 %vm486_vm6, %v5687_v56 }
 0x163   :  { %4871 = vmatmul.msk.bf16.gmra.mxu1 %vm486_vm6, %v5687_v56 }
 0x167   :  { %4928 = vmatmul.msk.bf16.gmra.mxu2 %vm486_vm6, %v5753_v44 }
 0x16d   :  { %4943 = vmatmul.msk.bf16.gmra.mxu0 %vm486_vm6, %v5649_v51 }
 0x171   :  { %4897 = vmatmul.msk.bf16.gmra.mxu3 %vm486_vm6, %v5702_v52 }
 0x173   :  { %4872 = vmatmul.msk.bf16.gmra.mxu1 %vm486_vm6, %v5702_v52 }
 0x177   :  { %4929 = vmatmul.msk.bf16.gmra.mxu2 %vm486_vm6, %v5776_v59 }
 0x17d   :  { %4944 = vmatmul.msk.bf16.gmra.mxu0 %vm486_vm6, %v5658_v2 }
 0x181   :  { %4898 = vmatmul.msk.bf16.gmra.mxu3 %vm486_vm6, %v5720_v39 }
 0x183   :  { %4873 = vmatmul.msk.bf16.gmra.mxu1 %vm486_vm6, %v5720_v39 }
 0x187   :  { %4930 = vmatmul.msk.bf16.gmra.mxu2 %vm486_vm6, %v5789_v17 }
 0x18d   :  { %4945 = vmatmul.msk.bf16.gmra.mxu0 %vm486_vm6, %v5668_v20 }
 0x191   :  { %4899 = vmatmul.msk.bf16.gmra.mxu3 %vm486_vm6, %v5265_v49 }
 0x193   :  { %4874 = vmatmul.msk.bf16.gmra.mxu1 %vm486_vm6, %v5265_v49 }
 0x197   :  { %4931 = vmatmul.msk.bf16.gmra.mxu2 %vm486_vm6, %v5801_v26 }
 0x19d   :  { %4946 = vmatmul.msk.bf16.gmra.mxu0 %vm486_vm6, %v5687_v56 }
 0x1a0   :  { %v5746_v43 = vpop.f32.mrf.mxu1 }
 0x1a1   :  { %4900 = vmatmul.msk.bf16.gmra.mxu3 %vm486_vm6, %v5709_v38 }
 0x1a3   :  { %4875 = vmatmul.msk.bf16.gmra.mxu1 %vm486_vm6, %v5709_v38 }
 0x1a4   :  { %v5759_v45 = vpop.f32.mrf.mxu3 }
 0x1a7   :  { %4932 = vmatmul.msk.bf16.gmra.mxu2 %vm486_vm6, %v5816_v32 }
 0x1a8   :  { %v5763_v62 = vpop.f32.mrf.mxu1 }
 0x1aa   :  { %v5824_v37 = vpop.f32.mrf.mxu2 }
 0x1ac   :  { %v5765_v50 = vpop.f32.mrf.mxu3 }
 0x1ad   :  { %4947 = vmatmul.msk.bf16.gmra.mxu0 %vm486_vm6, %v5702_v52 }
 0x1b0   :  { %v549_v55 = vpop.f32.mrf.mxu1 }
 0x1b1   :  { %4901 = vmatmul.msk.bf16.gmra.mxu3 %vm486_vm6, %v5727_v40 }
 0x1b3   :  { %4876 = vmatmul.msk.bf16.gmra.mxu1 %vm486_vm6, %v5727_v40 }
 0x1b4   :  { %v739_v3 = vpop.f32.mrf.mxu3 }
 0x1b5   :  { %v848_v9 = vmax.f32 %v549_v55, %v739_v3  ;;  %v1676_v55 = vrot.slane %v5454_v4, 5 }
 0x1b7   :  { %880 = vst [vmem:[#allocation2 + $0x10] sm:$0xff] %v848_v9  ;;  %v1678_v9 = vrot.slane %v5477_v12, 4 }
 0x1b8   :  { %v551_v10 = vpop.f32.mrf.mxu1 }
 0x1bc   :  { %v741_v13 = vpop.f32.mrf.mxu3 }
 0x1bd   :  { %4948 = vmatmul.msk.bf16.gmra.mxu0 %vm486_vm6, %v5720_v39  ;;  %v849_v14 = vmax.f32 %v551_v10, %v741_v13  ;;  %v1680_v13 = vrot.slane %v5463_v57, 3 }
 0x1bf   :  { %881 = vst [vmem:[#allocation2 + $0x18] sm:$0xff] %v849_v14 }
 0x1c0   :  { %v554_v16 = vpop.f32.mrf.mxu1 }
 0x1c1   :  { %4902 = vmatmul.msk.bf16.gmra.mxu3 %vm486_vm6, %v5739_v42 }
 0x1c3   :  { %4877 = vmatmul.msk.bf16.gmra.mxu1 %vm486_vm6, %v5739_v42 }
 0x1c4   :  { %v744_v18 = vpop.f32.mrf.mxu3 }
 0x1c5   :  { %v850_v19 = vmax.f32 %v554_v16, %v744_v18  ;;  %v5835_v16 = vpop.f32.mrf.mxu2  ;;  %v1682_v18 = vrot.slane %v5468_v61, 2 }
 0x1c7   :  { %882 = vst [vmem:[#allocation2 + $0x20] sm:$0xff] %v850_v19 }
 0x1c8   :  { %v556_v21 = vpop.f32.mrf.mxu1 }
 0x1cc   :  { %v746_v22 = vpop.f32.mrf.mxu3 }
 0x1cd   :  { %4949 = vmatmul.msk.bf16.gmra.mxu0 %vm486_vm6, %v5265_v49  ;;  %v851_v23 = vmax.f32 %v556_v21, %v746_v22 }
 0x1cf   :  { %883 = vst [vmem:[#allocation2 + $0x28] sm:$0xff] %v851_v23 }
 0x1d0   :  { %v559_v25 = vpop.f32.mrf.mxu1 }
 0x1d1   :  { %4903 = vmatmul.msk.bf16.gmra.mxu3 %vm486_vm6, %v5753_v44 }
 0x1d3   :  { %4878 = vmatmul.msk.bf16.gmra.mxu1 %vm486_vm6, %v5753_v44 }
 0x1d4   :  { %v749_v28 = vpop.f32.mrf.mxu3 }
 0x1d5   :  { %v852_v11 = vmax.f32 %v559_v25, %v749_v28 }
 0x1d7   :  { %884 = vst [vmem:[#allocation2 + $0x30] sm:$0xff] %v852_v11  ;;  %v5851_v11 = vpop.f32.mrf.mxu2 }
 0x1d8   :  { %v561_v29 = vpop.f32.mrf.mxu1 }
 0x1da   :  { %v5807_v30 = vpop.f32.mrf.mxu0 }
 0x1db   :  { %8202 = vst [vmem:[#allocation5_spill] sm:$0xff] %v5807_v30 }
 0x1dc   :  { %v751_v31 = vpop.f32.mrf.mxu3 }
 0x1dd   :  { %4950 = vmatmul.msk.bf16.gmra.mxu0 %vm486_vm6, %v5709_v38  ;;  %v853_v15 = vmax.f32 %v561_v29, %v751_v31  ;;  %v1674_v38 = vrot.slane %v5441_v0, 6 }
 0x1df   :  { %885 = vst [vmem:[#allocation2 + $0x38] sm:$0xff] %v853_v15  ;;  %v1684_v14 = vsel %vm27_vm15, %v1674_v38, %v1676_v55 }
 0x1e0   :  { %v564_v5 = vpop.f32.mrf.mxu1  ;;  %v1685_v19 = vsel %vm316_vm0, %v1684_v14, %v1678_v9 }
 0x1e1   :  { %4904 = vmatmul.msk.bf16.gmra.mxu3 %vm486_vm6, %v5776_v59  ;;  %v1686_v0 = vsel %vm318_vm1, %v1685_v19, %v1680_v13 }
 0x1e2   :  { %v5818_v8 = vpop.f32.mrf.mxu0  ;;  %v1687_v22 = vsel %vm320_vm2, %v1686_v0, %v1682_v18 }
 0x1e3   :  { %8203 = vst [vmem:[#allocation6_spill] sm:$0xff] %v5818_v8  ;;  %4879 = vmatmul.msk.bf16.gmra.mxu1 %vm486_vm6, %v5776_v59 }
 0x1e4   :  { %v754_v27 = vpop.f32.mrf.mxu3 }
 0x1e5   :  { %v854_v36 = vmax.f32 %v564_v5, %v754_v27  ;;  %v5859_v27 = vpop.f32.mrf.mxu2 }
 0x1e7   :  { %886 = vst [vmem:[#allocation2 + $0x40] sm:$0xff] %v854_v36 }
 0x1e8   :  { %v566_v60 = vpop.f32.mrf.mxu1 }
 0x1ea   :  { %v5826_v49 = vpop.f32.mrf.mxu0 }
 0x1eb   :  { %8204 = vst [vmem:[#allocation7_spill] sm:$0xff] %v5826_v49 }
 0x1ec   :  { %v756_v3 = vpop.f32.mrf.mxu3 }
 0x1ed   :  { %4951 = vmatmul.msk.bf16.gmra.mxu0 %vm486_vm6, %v5727_v40  ;;  %v855_v10 = vmax.f32 %v566_v60, %v756_v3  ;;  %v1688_v40 = vsel %vm322_vm3, %v1687_v22, 1.0  ;;  %v5869_v3 = vpop.f32.mrf.mxu2 }
 0x1ee   :  { %4983 = vmatpush.msk.msra.mxu2 %vm349_vm4, %v1688_v40 }
 0x1ef   :  { %887 = vst [vmem:[#allocation2 + $0x48] sm:$0xff] %v855_v10  ;;  %4984 = vmatmul.msk.f32.vlgmr.msra.gmra.mxu2 %vm324_vm5, %v5495_v24 }
 0x1f0   :  { %v569_v21 = vpop.f32.mrf.mxu1 }
 0x1f1   :  { %4905 = vmatmul.msk.bf16.gmra.mxu3 %vm486_vm6, %v5789_v17 }
 0x1f2   :  { %v5844_v23 = vpop.f32.mrf.mxu0 }
 0x1f3   :  { %8205 = vst [vmem:[#allocation8_spill] sm:$0xff] %v5844_v23  ;;  %4880 = vmatmul.msk.bf16.gmra.mxu1 %vm486_vm6, %v5789_v17 }
 0x1f4   :  { %v759_v25 = vpop.f32.mrf.mxu3 }
 0x1f5   :  { %v856_v28 = vmax.f32 %v569_v21, %v759_v25  ;;  %v5877_v14 = vpop.f32.mrf.mxu2 }
 0x1f7   :  { %888 = vst [vmem:[#allocation2 + $0x50] sm:$0xff] %v856_v28  ;;  %4985 = vmatmul.msk.f32.gmra.mxu2 %vm324_vm5, %v5518_v33  ;;  %v5908_v28 = vld [vmem:[%s8137_s0 + $0x8] sm:$0xff] }
 0x1f8   :  { %v571_v29 = vpop.f32.mrf.mxu1 }
 0x1fa   :  { %v5853_v31 = vpop.f32.mrf.mxu0 }
 0x1fb   :  { %8206 = vst [vmem:[#allocation9_spill] sm:$0xff] %v5853_v31 }
 0x1fc   :  { %v761_v15 = vpop.f32.mrf.mxu3 }
 0x1fd   :  { %4952 = vmatmul.msk.bf16.gmra.mxu0 %vm486_vm6, %v5739_v42  ;;  %v857_v5 = vmax.f32 %v571_v29, %v761_v15  ;;  %v5889_v0 = vpop.f32.mrf.mxu2  ;;  %v5911_v29 = vrot.slane %v5908_v28, 7 }
 0x1ff   :  { %889 = vst [vmem:[#allocation2 + $0x58] sm:$0xff] %v857_v5  ;;  %4986 = vmatmul.msk.f32.gmra.mxu2 %vm324_vm5, %v5529_v34 }
 0x200   :  { %v574_v36 = vpop.f32.mrf.mxu1  ;;  %8211 = vst [vmem:[#allocation14_spill] sm:$0xff] %v5911_v29 }
 0x201   :  { %4906 = vmatmul.msk.bf16.gmra.mxu3 %vm486_vm6, %v5801_v26 }
 0x202   :  { %v5863_v60 = vpop.f32.mrf.mxu0 }
 0x203   :  { %8207 = vst [vmem:[#allocation10_spill] sm:$0xff] %v5863_v60  ;;  %4881 = vmatmul.msk.bf16.gmra.mxu1 %vm486_vm6, %v5801_v26 }
 0x204   :  { %v764_v38 = vpop.f32.mrf.mxu3 }
 0x205   :  { %v858_v55 = vmax.f32 %v574_v36, %v764_v38  ;;  %v5899_v22 = vpop.f32.mrf.mxu2 }
 0x207   :  { %890 = vst [vmem:[#allocation2 + $0x60] sm:$0xff] %v858_v55  ;;  %4987 = vmatmul.msk.f32.gmra.mxu2 %vm324_vm5, %v5540_v35 }
 0x208   :  { %v576_v42 = vpop.f32.mrf.mxu1 }
 0x20a   :  { %v5871_v9 = vpop.f32.mrf.mxu0 }
 0x20b   :  { %8208 = vst [vmem:[#allocation11_spill] sm:$0xff] %v5871_v9 }
 0x20c   :  { %v766_v10 = vpop.f32.mrf.mxu3 }
 0x20d   :  { %4953 = vmatmul.msk.bf16.gmra.mxu0 %vm486_vm6, %v5753_v44  ;;  %v859_v13 = vmax.f32 %v576_v42, %v766_v10  ;;  %v5925_v36 = vpop.f32.mrf.mxu2  ;;  %v1930_v10 = vrot.slane %v5454_v4, 6 }
 0x20f   :  { %891 = vst [vmem:[#allocation2 + $0x68] sm:$0xff] %v859_v13  ;;  %4988 = vmatmul.msk.f32.gmra.mxu2 %vm324_vm5, %v5556_v41  ;;  %v1932_v13 = vrot.slane %v5477_v12, 5  ;;  %v1938_v54 = vsel %vm27_vm15, %v5444_v1, %v1930_v10 }
 0x210   :  { %v5879_v18 = vpop.f32.mrf.mxu1 }
 0x211   :  { %4907 = vmatmul.msk.bf16.gmra.mxu3 %vm486_vm6, %v5816_v32  ;;  %v1939_v7 = vsel %vm316_vm0, %v1938_v54, %v1932_v13 }
 0x212   :  { %v5883_v19 = vpop.f32.mrf.mxu0 }
 0x213   :  { %8209 = vst [vmem:[#allocation12_spill] sm:$0xff] %v5883_v19  ;;  %4882 = vmatmul.msk.bf16.gmra.mxu1 %vm486_vm6, %v5816_v32 }
 0x214   :  { %v5901_v40 = vpop.f32.mrf.mxu3 }
 0x215   :  { %v5943_v63 = vpop.f32.mrf.mxu2 }
 0x217   :  { %4989 = vmatmul.msk.f32.gmra.mxu2 %vm324_vm5, %v5573_v46 }
 0x218   :  { %v5891_v44 = vpop.f32.mrf.mxu1 }
 0x21a   :  { %v5893_v21 = vpop.f32.mrf.mxu0 }
 0x21b   :  { %8210 = vst [vmem:[#allocation13_spill] sm:$0xff] %v5893_v21 }
 0x21c   :  { %v5930_v42 = vpop.f32.mrf.mxu3 }
 0x21d   :  { %4954 = vmatmul.msk.bf16.gmra.mxu0 %vm486_vm6, %v5776_v59  ;;  %v30_v59 = vsel %vm27_vm15, %v5444_v1, %v5911_v29  ;;  %v23_v1 = vld [vmem:[%s8137_s0 + $0x19] sm:$0xff]  ;;  %v861_v30 = vmax.f32 %v5891_v44, %v5930_v42 }
 0x21e   :  { %v5923_v5 = vsub.f32 %v5908_v28, %v30_v59  ;;  %v1934_v59 = vrot.slane %v5463_v57, 4 }
 0x21f   :  { %4990 = vmatmul.msk.f32.gmra.mxu2 %vm324_vm5, %v5584_v47 }
 0x220   :  { %v5903_v25 = vpop.f32.mrf.mxu1  ;;  %v55_v38 = vmax.f32 %v5923_v5, 1e-06  ;;  %v1940_v29 = vsel %vm318_vm1, %v1939_v7, %v1934_v59 }
 0x221   :  { %v1941_v21 = vsel %vm320_vm2, %v1940_v29, %v1936_v53  ;;  %v5964_v53 = vrot.slane %v23_v1, 7 }
 0x222   :  { %v5913_v15 = vpop.f32.mrf.mxu0  ;;  %5294 = vrcp.f32 %v55_v38  ;;  %vm77_vm7 = vweird.f32 %v55_v38  ;;  %v81_v10 = vand.u32 2147483647, %v55_v38 }
 0x223   :  { %8212 = vst [vmem:[#allocation15_spill] sm:$0xff] %v5913_v15  ;;  %4917 = vmatmul.msk.bf16.vlgmr.msrb.gmra.mxu1 %vm486_vm6, %v5640_v6 }
 0x224   :  { %v5962_v54 = vpop.f32.mrf.mxu3  ;;  %8215 = vst [vmem:[#allocation18_spill] sm:$0xff] %v5964_v53  ;;  %vm82_vm10 = vcmp.eq.f32.partialorder %v81_v10, 8.507059e+37 }
 0x227   :  { %4991 = vmatmul.msk.f32.gmra.mxu2 %vm324_vm5, %v5595_v48 }
 0x228   :  { %v5928_v55 = vpop.f32.mrf.mxu1  ;;  %v5295_v58 = vpop.eup %5294 }
 0x229   :  { %vm78_vm8 = vweird.f32 %v5295_v58 }
 0x22a   :  { %v5932_v6 = vpop.f32.mrf.mxu0  ;;  %vm79_vm9 = vmor %vm77_vm7, %vm78_vm8 }
 0x22b   :  { %8213 = vst [vmem:[#allocation16_spill] sm:$0xff] %v5932_v6  ;;  %v73_v6 = vmul.f32 %v5295_v58, %v55_v38 }
 0x22d   :  { %4955 = vmatmul.msk.bf16.gmra.mxu0 %vm486_vm6, %v5789_v17  ;;  %v1942_v17 = vsel %vm322_vm3, %v1941_v21, 1.0  ;;  %v74_v19 = vsub.f32 1.0, %v73_v6  ;;  %v83_v21 = vand.u32 2147483648, %v55_v38  ;;  %v5966_v6 = vpop.f32.mrf.mxu2  ;;  %v5988_v38 = vpop.f32.mrf.mxu3 }
 0x22e   :  { %5008 = vmatpush.msk.msrb.mxu2 %vm349_vm4, %v1942_v17 }
 0x22f   :  { %5009 = vmatmul.msk.f32.vlgmr.msrb.gmra.mxu2 %vm324_vm5, %v5495_v24  ;;  %v75_v7 = vmul.f32 %v5295_v58, %v74_v19  ;;  %v84_v13 = vor.u32 1.1754944e-38, %v83_v21 }
 0x230   :  { %v5948_v15 = vpop.f32.mrf.mxu1 }
 0x231   :  { %v76_v29 = vadd.f32 %v5295_v58, %v75_v7 }
 0x232   :  { %v5952_v9 = vpop.f32.mrf.mxu0 }
 0x233   :  { %8214 = vst [vmem:[#allocation17_spill] sm:$0xff] %v5952_v9  ;;  %4918 = vmatmul.msk.bf16.gmra.mxu1 %vm486_vm6, %v5649_v51  ;;  %v8216_v51 = vrot.slane %v5454_v4, 7  ;;  %v80_v19 = vsel %vm79_vm9, %v5295_v58, %v76_v29 }
 0x234   :  { %v85_v9 = vsel %vm82_vm10, %v84_v13, %v80_v19 }
 0x235   :  { %v41_v24 = vsel %vm27_vm15, %v8216_v51, %v5964_v53  ;;  %v5990_v58 = vpop.f32.mrf.mxu2  ;;  %v6006_v13 = vpop.f32.mrf.mxu3 }
 0x236   :  { %v5972_v59 = vsub.f32 %v23_v1, %v41_v24 }
 0x237   :  { %5010 = vmatmul.msk.f32.gmra.mxu2 %vm324_vm5, %v5518_v33  ;;  %v860_v33 = vmax.f32 %v5879_v18, %v5901_v40 }
 0x238   :  { %v5974_v17 = vpop.f32.mrf.mxu1  ;;  %v5979_v60 = vmul.f32 %v85_v9, %v5972_v59 }
 0x23a   :  { %v5976_v7 = vpop.f32.mrf.mxu0  ;;  %v5984_v4 = vand.u32 2147483647, %v5979_v60 }
 0x23b   :  { %8217 = vst [vmem:[#allocation19_spill] sm:$0xff] %v5976_v7 }
 0x23c   :  { %v118_v1 = vmax.f32 %v5984_v4, 1e-30  ;;  %v169_v21 = vadd.f32 1.0, %v5984_v4  ;;  %v4786_v44 = vadd.f32 -1.0, %v5984_v4 }
 0x23d   :  { %4956 = vmatmul.msk.bf16.gmra.mxu0 %vm486_vm6, %v5801_v26  ;;  %v6004_v51 = vpop.f32.mrf.mxu2 }
 0x23e   :  { %5296 = vrcp.f32 %v118_v1  ;;  %v197_v18 = vand.u32 2147483648, %v169_v21  ;;  %v146_v40 = vand.u32 2147483648, %v118_v1  ;;  %vm191_vm11 = vweird.f32 %v169_v21 }
 0x23f   :  { %5298 = vrcp.f32 %v169_v21  ;;  %5011 = vmatmul.msk.f32.gmra.mxu2 %vm324_vm5, %v5529_v34  ;;  %vm140_vm13 = vweird.f32 %v118_v1 }
 0x240   :  { %v5994_v29 = vpop.f32.mrf.mxu1  ;;  %v198_v42 = vor.u32 1.1754944e-38, %v197_v18 }
 0x242   :  { %v5996_v9 = vpop.f32.mrf.mxu0 }
 0x243   :  { %8218 = vst [vmem:[#allocation20_spill] sm:$0xff] %v5996_v9  ;;  %4919 = vmatmul.msk.bf16.gmra.mxu1 %vm486_vm6, %v5658_v2  ;;  %v1114_v9 = vmax.f32 %v860_v33, %v5824_v37 }
 0x244   :  { %v5297_v26 = vpop.eup %5296 }
 0x245   :  { %v5299_v24 = vpop.eup %5298  ;;  %v136_v10 = vmul.f32 %v5297_v26, %v118_v1  ;;  %vm141_vm14 = vweird.f32 %v5297_v26 }
 0x246   :  { %v187_v7 = vmul.f32 %v5299_v24, %v169_v21  ;;  %vm192_vm12 = vweird.f32 %v5299_v24  ;;  %vm142_vm8 = vmor %vm140_vm13, %vm141_vm14  ;;  %vm103_vm13 = vcmp.ge.f32.partialorder %v5979_v60, 0.0 }
 0x247   :  { %v137_v31 = vsub.f32 1.0, %v136_v10  ;;  %5012 = vmatmul.msk.f32.gmra.mxu2 %vm324_vm5, %v5540_v35  ;;  %vm6017_vm7 = vmor %vm191_vm11, %vm192_vm12  ;;  %v6021_v35 = vpop.f32.mrf.mxu2  ;;  %vm115_vm11 = vcmp.gt.f32.partialorder %v5984_v4, 0.41421357  ;;  %vm112_vm12 = vcmp.gt.f32.partialorder %v5984_v4, 2.4142137 }
 0x248   :  { %v6008_v19 = vpop.f32.mrf.mxu1  ;;  %v188_v23 = vsub.f32 1.0, %v187_v7  ;;  %8221 = vst [vmem:[#allocation21_spill] sm:$0xff] %v6021_v35  ;;  %v6029_v35 = vpop.f32.mrf.mxu3 }
 0x249   :  { %v138_v34 = vmul.f32 %v5297_v26, %v137_v31  ;;  %v147_v31 = vor.u32 1.1754944e-38, %v146_v40 }
 0x24a   :  { %v1277_v2 = vpop.f32.mrf.mxu0  ;;  %v189_v8 = vmul.f32 %v5299_v24, %v188_v23  ;;  %v144_v23 = vand.u32 2147483647, %v118_v1 }
 0x24b   :  { %v1368_v49 = vmax.f32 %v1114_v9, %v1277_v2  ;;  %v139_v37 = vadd.f32 %v5297_v26, %v138_v34  ;;  %v1115_v2 = vmax.f32 %v861_v30, %v5835_v16  ;;  %v862_v30 = vmax.f32 %v5903_v25, %v5962_v54 }
 0x24c   :  { %v190_v9 = vadd.f32 %v5299_v24, %v189_v8  ;;  %vm145_vm9 = vcmp.eq.f32.partialorder %v144_v23, 8.507059e+37 }
 0x24d   :  { %1400 = vst [vmem:[#allocation2 + $0x70] sm:$0xff] %v1368_v49  ;;  %4957 = vmatmul.msk.bf16.gmra.mxu0 %vm486_vm6, %v5816_v32  ;;  %v143_v33 = vsel %vm142_vm8, %v5297_v26, %v139_v37  ;;  %v195_v49 = vand.u32 2147483647, %v169_v21 }
 0x24e   :  { %v194_v32 = vsel %vm6017_vm7, %v5299_v24, %v190_v9  ;;  %v148_v34 = vsel %vm145_vm9, %v147_v31, %v143_v33  ;;  %v863_v9 = vmax.f32 %v5928_v55, %v5988_v38  ;;  %v864_v55 = vmax.f32 %v5948_v15, %v6006_v13 }
 0x24f   :  { %vm196_vm10 = vcmp.eq.f32.partialorder %v195_v49, 8.507059e+37  ;;  %v149_v8 = vmul.f32 -1.0, %v148_v34  ;;  %5013 = vmatmul.msk.f32.gmra.mxu2 %vm324_vm5, %v5556_v41  ;;  %v6042_v24 = vpop.f32.mrf.mxu2  ;;  %v1116_v41 = vmax.f32 %v862_v30, %v5851_v11  ;;  %v8223_v30 = vmov -1.0  }
 0x250   :  { %v6024_v10 = vpop.f32.mrf.mxu1  ;;  %v199_v26 = vsel %vm196_vm10, %v198_v42, %v194_v32  ;;  %v6051_v54 = vpop.f32.mrf.mxu3  ;;  %v1117_v11 = vmax.f32 %v863_v9, %v5859_v27  ;;  %v8222_v27 = vmov 0.0   ;;  %v1424_v9 = vrot.slane %v5463_v57, 2 }
 0x251   :  { %v200_v21 = vmul.f32 %v4786_v44, %v199_v26  ;;  %v223_v26 = vsel %vm115_vm11, 0.7853982, %v8222_v27 }
 0x252   :  { %v1279_v1 = vpop.f32.mrf.mxu0 }
 0x253   :  { %v1369_v40 = vmax.f32 %v1115_v2, %v1279_v1  ;;  %4920 = vmatmul.msk.bf16.gmra.mxu1 %vm486_vm6, %v5668_v20  ;;  %v217_v16 = vsel %vm115_vm11, %v200_v21, %v5984_v4  ;;  %v1422_v4 = vrot.slane %v5477_v12, 3 }
 0x254   :  { %v220_v18 = vsel %vm112_vm12, %v149_v8, %v217_v16  ;;  %v106_v16 = vsel %vm103_vm13, 1.0, %v8223_v30 }
 0x255   :  { %1401 = vst [vmem:[#allocation2 + $0x78] sm:$0xff] %v1369_v40  ;;  %v229_v20 = vmul.f32 %v220_v18, %v220_v18 }
 0x257   :  { %v232_v7 = vmul.f32 0.080537446, %v229_v20  ;;  %5014 = vmatmul.msk.f32.gmra.mxu2 %vm324_vm5, %v5573_v46  ;;  %v6055_v44 = vpop.f32.mrf.mxu2 }
 0x258   :  { %v6046_v37 = vpop.f32.mrf.mxu1  ;;  %v6066_v1 = vpop.f32.mrf.mxu3 }
 0x259   :  { %v4789_v25 = vadd.f32 -0.13877685, %v232_v7 }
 0x25a   :  { %v1282_v23 = vpop.f32.mrf.mxu0 }
 0x25b   :  { %v1370_v31 = vmax.f32 %v1116_v41, %v1282_v23  ;;  %v238_v33 = vmul.f32 %v4789_v25, %v229_v20  ;;  %v5306_v41 = vld [vmem:[%s8137_s0] sm:$0xff]  ;;  %v5307_v23 = vld [vmem:[%s8137_s0 + $0x11] sm:$0xff]  ;;  %v865_v25 = vmax.f32 %v5974_v17, %v6029_v35  ;;  %v2193_v17 = vsel %vm27_vm15, %v5908_v28, %v5964_v53 }
 0x25c   :  { %v1418_v7 = vrot.slane %v5306_v41, 5  ;;  %v1420_v60 = vrot.slane %v5307_v23, 4  ;;  %v867_v41 = vmax.f32 %v6008_v19, %v6066_v1  ;;  %v6146_v23 = vld [vmem:[%s8138_s1 + $0x8] sm:$0xff] }
 0x25d   :  { %1402 = vst [vmem:[#allocation2 + $0x80] sm:$0xff] %v1370_v31  ;;  %v241_v49 = vadd.f32 0.19977711, %v238_v33 }
 0x25e   :  { %v1428_v33 = vsel %vm27_vm15, %v1418_v7, %v1420_v60 }
 0x25f   :  { %v244_v32 = vmul.f32 %v241_v49, %v229_v20  ;;  %5015 = vmatmul.msk.f32.gmra.mxu2 %vm324_vm5, %v5584_v47  ;;  %v6068_v8 = vpop.f32.mrf.mxu2  ;;  %v1118_v47 = vmax.f32 %v864_v55, %v5869_v3  ;;  %v6089_v3 = vmul.f32 10.0, %v5923_v5  ;;  %v1426_v49 = vrot.slane %v5468_v61, 1 }
 0x260   :  { %v6057_v42 = vpop.f32.mrf.mxu1  ;;  %v789_v35 = vpop.f32.mrf.mxu3 }
 0x261   :  { %v4792_v46 = vadd.f32 -0.3333295, %v244_v32  ;;  %v868_v1 = vmax.f32 %v6024_v10, %v789_v35 }
 0x262   :  { %v1284_v2 = vpop.f32.mrf.mxu0 }
 0x263   :  { %v1371_v34 = vmax.f32 %v1117_v11, %v1284_v2  ;;  %4921 = vmatmul.msk.bf16.gmra.mxu1 %vm486_vm6, %v5687_v56  ;;  %v250_v38 = vmul.f32 %v4792_v46, %v229_v20  ;;  %v226_v56 = vsel %vm112_vm12, 1.5707964, %v223_v26 }
 0x265   :  { %1403 = vst [vmem:[#allocation2 + $0x88] sm:$0xff] %v1371_v34  ;;  %v253_v40 = vmul.f32 %v250_v38, %v220_v18  ;;  %v1119_v34 = vmax.f32 %v865_v25, %v5877_v14 }
 0x267   :  { %v256_v15 = vadd.f32 %v253_v40, %v220_v18  ;;  %5016 = vmatmul.msk.f32.gmra.mxu2 %vm324_vm5, %v5595_v48  ;;  %v6093_v18 = vmul.f32 10.0, %v5972_v59  ;;  %v1429_v48 = vsel %vm316_vm0, %v1428_v33, %v1422_v4  ;;  %v6101_v5 = vpop.f32.mrf.mxu2  ;;  %v2188_v59 = vrot.slane %v6089_v3, 5 }
 0x268   :  { %v6073_v21 = vpop.f32.mrf.mxu1  ;;  %v1430_v12 = vsel %vm318_vm1, %v1429_v48, %v1424_v9  ;;  %v6161_v9 = vld [vmem:[%s8138_s1 + $0x10] sm:$0xff]  ;;  %v1122_v33 = vmax.f32 %v868_v1, %v5925_v36 }
 0x269   :  { %v259_v31 = vadd.f32 %v256_v15, %v226_v56  ;;  %v1431_v32 = vsel %vm320_vm2, %v1430_v12, %v1426_v49  ;;  %v2191_v2 = vrot.slane %v6093_v18, 4  ;;  %v6132_v15 = vld [vmem:[%s8138_s1] sm:$0xff] }
 0x26a   :  { %v1287_v13 = vpop.f32.mrf.mxu0  ;;  %v1432_v46 = vsel %vm322_vm3, %v1431_v32, 1.0 }
 0x26b   :  { %v1372_v20 = vmax.f32 %v1118_v47, %v1287_v13  ;;  %v6103_v11 = vmul.f32 %v259_v31, %v106_v16  ;;  %4958 = vmatpush.msk.msra.mxu1 %vm349_vm4, %v1432_v46  ;;  %v866_v47 = vmax.f32 %v5994_v29, %v6051_v54  ;;  %v791_v29 = vpop.f32.mrf.mxu3 }
 0x26c   :  { %v869_v48 = vmax.f32 %v6046_v37, %v791_v29 }
 0x26d   :  { %1404 = vst [vmem:[#allocation2 + $0x90] sm:$0xff] %v1372_v20  ;;  %v2185_v61 = vrot.slane %v6103_v11, 6  ;;  %v1120_v16 = vmax.f32 %v866_v47, %v5889_v0  ;;  %v1121_v0 = vmax.f32 %v867_v41, %v5899_v22  ;;  %v8224_v47 = vmax.f32 %v5746_v43, %v5759_v45  ;;  %v6220_v41 = vld [vmem:[%s8138_s1 + $0x30] sm:$0xff] }
 0x26e   :  { %v1123_v36 = vmax.f32 %v869_v48, %v5943_v63 }
 0x26f   :  { %v2194_v38 = vsel %vm316_vm0, %v2193_v17, %v2185_v61 }
 0x270   :  { %v6110_v57 = vpop.f32.mrf.mxu1  ;;  %v2195_v28 = vsel %vm318_vm1, %v2194_v38, %v2188_v59  ;;  %v6174_v59 = vld [vmem:[%s8138_s1 + $0x18] sm:$0xff] }
 0x271   :  { %v2196_v40 = vsel %vm320_vm2, %v2195_v28, %v2191_v2  ;;  %v6189_v2 = vld [vmem:[%s8138_s1 + $0x20] sm:$0xff]  ;;  %v6204_v28 = vld [vmem:[%s8138_s1 + $0x28] sm:$0xff] }
 0x272   :  { %v1289_v55 = vpop.f32.mrf.mxu0  ;;  %v2197_v14 = vsel %vm322_vm3, %v2196_v40, 1.0  ;;  %v6127_v56 = vpop.f32.mrf.mxu2 }
 0x273   :  { %v1373_v26 = vmax.f32 %v1119_v34, %v1289_v55  ;;  %4922 = vmatmul.msk.bf16.gmra.mxu1 %vm486_vm6, %v5702_v52  ;;  %5033 = vmatpush.msk.msra.mxu2 %vm349_vm4, %v2197_v14  ;;  %v794_v19 = vpop.f32.mrf.mxu3 }
 0x274   :  { %5034 = vmatmul.msk.f32.vlgmr.msra.gmra.mxu2 %vm324_vm5, %v6132_v15  ;;  %v870_v37 = vmax.f32 %v6057_v42, %v794_v19 }
 0x275   :  { %1405 = vst [vmem:[#allocation2 + $0x98] sm:$0xff] %v1373_v26 }
 0x276   :  { %v1124_v46 = vmax.f32 %v870_v37, %v5966_v6 }
 0x278   :  { %v6136_v13 = vpop.f32.mrf.mxu1 }
 0x27a   :  { %v1292_v54 = vpop.f32.mrf.mxu0  ;;  %v6141_v7 = vpop.f32.mrf.mxu2 }
 0x27b   :  { %v1374_v20 = vmax.f32 %v1120_v16, %v1292_v54  ;;  %v796_v10 = vpop.f32.mrf.mxu3 }
 0x27c   :  { %5035 = vmatmul.msk.f32.gmra.mxu2 %vm324_vm5, %v6146_v23  ;;  %v871_v42 = vmax.f32 %v6073_v21, %v796_v10 }
 0x27d   :  { %1406 = vst [vmem:[#allocation2 + $0xa0] sm:$0xff] %v1374_v20 }
 0x27e   :  { %v1125_v6 = vmax.f32 %v871_v42, %v5990_v58  ;;  %v8225_v58 = vmax.f32 %v5763_v62, %v5765_v50  ;;  %v8226_v50 = vld [vmem:[#allocation21_spill] sm:$0xff] }
 0x280   :  { %v6150_v60 = vpop.f32.mrf.mxu1 }
 0x282   :  { %v1294_v4 = vpop.f32.mrf.mxu0  ;;  %v6156_v25 = vpop.f32.mrf.mxu2 }
 0x283   :  { %v1375_v31 = vmax.f32 %v1121_v0, %v1294_v4  ;;  %4923 = vmatmul.msk.bf16.gmra.mxu1 %vm486_vm6, %v5720_v39  ;;  %v799_v34 = vpop.f32.mrf.mxu3 }
 0x284   :  { %5036 = vmatmul.msk.f32.gmra.mxu2 %vm324_vm5, %v6161_v9  ;;  %v872_v54 = vmax.f32 %v6110_v57, %v799_v34 }
 0x285   :  { %1407 = vst [vmem:[#allocation2 + $0xa8] sm:$0xff] %v1375_v31 }
 0x286   :  { %v1126_v45 = vmax.f32 %v872_v54, %v6004_v51  ;;  %v1735_v54 = vmax.f32 %v6156_v25, 0.0 }
 0x288   :  { %v6165_v22 = vpop.f32.mrf.mxu1 }
 0x28a   :  { %v1297_v49 = vpop.f32.mrf.mxu0  ;;  %v6169_v12 = vpop.f32.mrf.mxu2 }
 0x28b   :  { %v1376_v39 = vmax.f32 %v1122_v33, %v1297_v49  ;;  %v801_v21 = vpop.f32.mrf.mxu3  ;;  %v6236_v33 = vld [vmem:[%s8138_s1 + $0x38] sm:$0xff] }
 0x28c   :  { %5037 = vmatmul.msk.f32.gmra.mxu2 %vm324_vm5, %v6174_v59  ;;  %v873_v19 = vmax.f32 %v6136_v13, %v801_v21 }
 0x28d   :  { %1408 = vst [vmem:[#allocation2 + $0xb0] sm:$0xff] %v1376_v39 }
 0x28e   :  { %v1127_v51 = vmax.f32 %v873_v19, %v8226_v50 }
 0x290   :  { %v6178_v17 = vpop.f32.mrf.mxu1 }
 0x292   :  { %v1299_v35 = vpop.f32.mrf.mxu0  ;;  %v6184_v61 = vpop.f32.mrf.mxu2 }
 0x293   :  { %v1377_v32 = vmax.f32 %v1123_v36, %v1299_v35  ;;  %4959 = vmatmul.msk.f32.vlgmr.msra.gmra.mxu1 %vm324_vm5, %v6132_v15  ;;  %v804_v31 = vpop.f32.mrf.mxu3 }
 0x294   :  { %5038 = vmatmul.msk.f32.gmra.mxu2 %vm324_vm5, %v6189_v2  ;;  %v874_v13 = vmax.f32 %v6150_v60, %v804_v31 }
 0x295   :  { %1409 = vst [vmem:[#allocation2 + $0xb8] sm:$0xff] %v1377_v32 }
 0x296   :  { %v1128_v35 = vmax.f32 %v874_v13, %v6042_v24 }
 0x298   :  { %v6193_v63 = vpop.f32.mrf.mxu1 }
 0x29a   :  { %v1302_v55 = vpop.f32.mrf.mxu0  ;;  %v6199_v26 = vpop.f32.mrf.mxu2 }
 0x29b   :  { %v1378_v38 = vmax.f32 %v1124_v46, %v1302_v55  ;;  %4960 = vmatmul.msk.f32.gmra.mxu1 %vm324_vm5, %v6146_v23  ;;  %v806_v48 = vpop.f32.mrf.mxu3  ;;  %v1738_v21 = vmax.f32 %v6199_v26, 0.0  ;;  %v1734_v26 = vmax.f32 %v6141_v7, 0.0 }
 0x29c   :  { %5039 = vmatmul.msk.f32.gmra.mxu2 %vm324_vm5, %v6204_v28  ;;  %v875_v34 = vmax.f32 %v6165_v22, %v806_v48 }
 0x29d   :  { %1410 = vst [vmem:[#allocation2 + $0xc0] sm:$0xff] %v1378_v38 }
 0x29e   :  { %v1129_v38 = vmax.f32 %v875_v34, %v6055_v44  ;;  %v1736_v44 = vmax.f32 %v6169_v12, 0.0 }
 0x2a0   :  { %v988_v40 = vpop.f32.mrf.mxu1 }
 0x2a1   :  { %v6212_v14 = vmax.f32 %v8224_v47, %v988_v40  ;;  %v1737_v47 = vmax.f32 %v6184_v61, 0.0 }
 0x2a2   :  { %v1304_v16 = vpop.f32.mrf.mxu0  ;;  %v1727_v20 = vpop.f32.mrf.mxu2 }
 0x2a3   :  { %v1379_v29 = vmax.f32 %v1125_v6, %v1304_v16  ;;  %4961 = vmatmul.msk.f32.gmra.mxu1 %vm324_vm5, %v6161_v9  ;;  %v809_v55 = vpop.f32.mrf.mxu3  ;;  %v1739_v42 = vmax.f32 %v1727_v20, 0.0 }
 0x2a4   :  { %5040 = vmatmul.msk.f32.gmra.mxu2 %vm324_vm5, %v6220_v41  ;;  %v876_v22 = vmax.f32 %v6178_v17, %v809_v55  ;;  %v1733_v17 = vmax.f32 %v6127_v56, 0.0  ;;  %v6280_v56 = vld [vmem:[%s8139_s2] sm:$0xff] }
 0x2a5   :  { %1411 = vst [vmem:[#allocation2 + $0xc8] sm:$0xff] %v1379_v29 }
 0x2a6   :  { %v1741_v31 = vpack.c.bf16 %v1734_v26, %v1733_v17  ;;  %v6326_v26 = vld [vmem:[%s8139_s2 + $0x20] sm:$0xff] }
 0x2a8   :  { %v990_v43 = vpop.f32.mrf.mxu1 }
 0x2a9   :  { %v6228_v0 = vmax.f32 %v8225_v58, %v990_v43  ;;  %v1743_v43 = vpack.c.bf16 %v1738_v21, %v1737_v47 }
 0x2aa   :  { %v1307_v4 = vpop.f32.mrf.mxu0  ;;  %v1730_v1 = vpop.f32.mrf.mxu2 }
 0x2ab   :  { %v1380_v57 = vmax.f32 %v1126_v45, %v1307_v4  ;;  %4962 = vmatmul.msk.f32.gmra.mxu1 %vm324_vm5, %v6174_v59  ;;  %v1740_v24 = vmax.f32 %v1730_v1, 0.0  ;;  %v1130_v45 = vmax.f32 %v876_v22, %v6068_v8  ;;  %v811_v58 = vpop.f32.mrf.mxu3 }
 0x2ac   :  { %5041 = vmatmul.msk.f32.gmra.mxu2 %vm324_vm5, %v6236_v33  ;;  %v877_v25 = vmax.f32 %v6193_v63, %v811_v58 }
 0x2ad   :  { %1412 = vst [vmem:[#allocation2 + $0xd0] sm:$0xff] %v1380_v57  ;;  %v1744_v16 = vpack.c.bf16 %v1740_v24, %v1739_v42  ;;  %v1742_v57 = vpack.c.bf16 %v1736_v44, %v1735_v54  ;;  %v6313_v54 = vld [vmem:[%s8139_s2 + $0x18] sm:$0xff] }
 0x2ae   :  { %v1131_v8 = vmax.f32 %v877_v25, %v6101_v5  ;;  %v6291_v5 = vld [vmem:[%s8139_s2 + $0x8] sm:$0xff] }
 0x2af   :  { %1749 = vmatpush.bf16.msrb.mxu1 %v1744_v16 }
 0x2b0   :  { %v6240_v62 = vpop.f32.mrf.mxu1 }
 0x2b2   :  { %v1309_v49 = vpop.f32.mrf.mxu0  ;;  %v6246_v10 = vpop.f32.mrf.mxu2 }
 0x2b3   :  { %v1381_v39 = vmax.f32 %v1127_v51, %v1309_v49  ;;  %4963 = vmatmul.msk.f32.gmra.mxu1 %vm324_vm5, %v6189_v2 }
 0x2b4   :  { %1750 = vmatpush.bf16.msrb.mxu1 %v1743_v43  ;;  %v1987_v43 = vmax.f32 %v6246_v10, 0.0 }
 0x2b5   :  { %1413 = vst [vmem:[#allocation2 + $0xd8] sm:$0xff] %v1381_v39 }
 0x2b8   :  { %v6248_v36 = vpop.f32.mrf.mxu1  ;;  %1751 = vmatpush.bf16.msrb.mxu1 %v1742_v57 }
 0x2ba   :  { %v1312_v32 = vpop.f32.mrf.mxu0  ;;  %v6254_v46 = vpop.f32.mrf.mxu2 }
 0x2bb   :  { %v1382_v37 = vmax.f32 %v1128_v35, %v1312_v32  ;;  %4964 = vmatmul.msk.f32.gmra.mxu1 %vm324_vm5, %v6204_v28  ;;  %v6302_v32 = vld [vmem:[%s8139_s2 + $0x10] sm:$0xff] }
 0x2bc   :  { %1752 = vmatpush.bf16.msrb.mxu1 %v1741_v31 }
 0x2bd   :  { %1414 = vst [vmem:[#allocation2 + $0xe0] sm:$0xff] %v1382_v37 }
 0x2c0   :  { %v6256_v60 = vpop.f32.mrf.mxu1 }
 0x2c2   :  { %v1314_v40 = vpop.f32.mrf.mxu0  ;;  %v1969_v29 = vpop.f32.mrf.mxu2 }
 0x2c3   :  { %v1383_v6 = vmax.f32 %v1129_v38, %v1314_v40  ;;  %4965 = vmatmul.msk.f32.gmra.mxu1 %vm324_vm5, %v6220_v41  ;;  %v1989_v21 = vmax.f32 %v1969_v29, 0.0 }
 0x2c5   :  { %1415 = vst [vmem:[#allocation2 + $0xe8] sm:$0xff] %v1383_v6 }
 0x2c8   :  { %v6266_v20 = vpop.f32.mrf.mxu1 }
 0x2ca   :  { %v1317_v4 = vpop.f32.mrf.mxu0  ;;  %v1972_v12 = vpop.f32.mrf.mxu2 }
 0x2cb   :  { %v1384_v61 = vmax.f32 %v1130_v45, %v1317_v4  ;;  %4966 = vmatmul.msk.f32.gmra.mxu1 %vm324_vm5, %v6236_v33  ;;  %v1990_v22 = vmax.f32 %v1972_v12, 0.0  ;;  %v1988_v45 = vmax.f32 %v6254_v46, 0.0 }
 0x2cd   :  { %1416 = vst [vmem:[#allocation2 + $0xf0] sm:$0xff] %v1384_v61  ;;  %v1996_v58 = vpack.c.bf16 %v1990_v22, %v1989_v21  ;;  %v1995_v4 = vpack.c.bf16 %v1988_v45, %v1987_v43  ;;  %v6350_v45 = vld [vmem:[%s8139_s2 + $0x38] sm:$0xff] }
 0x2d0   :  { %v6274_v19 = vpop.f32.mrf.mxu1 }
 0x2d2   :  { %v1319_v1 = vpop.f32.mrf.mxu0  ;;  %v1975_v51 = vpop.f32.mrf.mxu2 }
 0x2d3   :  { %v1385_v50 = vmax.f32 %v1131_v8, %v1319_v1  ;;  %4992 = vmatmul.msk.bf16.vlgmr.msrb.gmra.mxu1 %vm486_vm6, %v6280_v56  ;;  %v1991_v42 = vmax.f32 %v1975_v51, 0.0 }
 0x2d5   :  { %1417 = vst [vmem:[#allocation2 + $0xf8] sm:$0xff] %v1385_v50 }
 0x2d8   :  { %v6284_v7 = vpop.f32.mrf.mxu1 }
 0x2da   :  { %v1978_v63 = vpop.f32.mrf.mxu2 }
 0x2db   :  { %v1992_v40 = vmax.f32 %v1978_v63, 0.0 }
 0x2dd   :  { %v1997_v16 = vpack.c.bf16 %v1992_v40, %v1991_v42 }
 0x2e0   :  { %v6286_v49 = vpop.f32.mrf.mxu1 }
 0x2e2   :  { %v1981_v39 = vpop.f32.mrf.mxu2 }
 0x2e3   :  { %4993 = vmatmul.msk.bf16.gmra.mxu1 %vm486_vm6, %v6291_v5  ;;  %v1993_v55 = vmax.f32 %v1981_v39, 0.0 }
 0x2e8   :  { %v6295_v13 = vpop.f32.mrf.mxu1 }
 0x2ea   :  { %v1984_v35 = vpop.f32.mrf.mxu2 }
 0x2eb   :  { %v1994_v6 = vmax.f32 %v1984_v35, 0.0 }
 0x2ed   :  { %v1998_v47 = vpack.c.bf16 %v1994_v6, %v1993_v55 }
 0x2ef   :  { %2003 = vmatpush.bf16.msrb.mxu0 %v1998_v47 }
 0x2f0   :  { %v6297_v48 = vpop.f32.mrf.mxu1 }
 0x2f3   :  { %4994 = vmatmul.msk.bf16.gmra.mxu1 %vm486_vm6, %v6302_v32  ;;  %2004 = vmatpush.bf16.msrb.mxu0 %v1997_v16 }
 0x2f7   :  { %v2218_v34 = vpop.f32.mrf.mxu2  ;;  %2005 = vmatpush.bf16.msrb.mxu0 %v1996_v58 }
 0x2f8   :  { %v6306_v37 = vpop.f32.mrf.mxu1  ;;  %v2242_v47 = vmax.f32 %v2218_v34, 0.0 }
 0x2fb   :  { %2006 = vmatpush.bf16.msrb.mxu0 %v1995_v4 }
 0x2fe   :  { %5017 = vmatmul.msk.bf16.vlgmr.msrb.gmra.mxu0 %vm486_vm6, %v6280_v56 }
 0x2ff   :  { %v2221_v24 = vpop.f32.mrf.mxu2 }
 0x300   :  { %v6308_v38 = vpop.f32.mrf.mxu1  ;;  %v2243_v21 = vmax.f32 %v2221_v24, 0.0 }
 0x302   :  { %v2250_v16 = vpack.c.bf16 %v2243_v21, %v2242_v47 }
 0x303   :  { %4995 = vmatmul.msk.bf16.gmra.mxu1 %vm486_vm6, %v6313_v54 }
 0x307   :  { %v2224_v29 = vpop.f32.mrf.mxu2 }
 0x308   :  { %v6317_v44 = vpop.f32.mrf.mxu1  ;;  %v2244_v55 = vmax.f32 %v2224_v29, 0.0 }
 0x30e   :  { %5018 = vmatmul.msk.bf16.gmra.mxu0 %vm486_vm6, %v6291_v5 }
 0x30f   :  { %v2227_v17 = vpop.f32.mrf.mxu2 }
 0x310   :  { %v1453_v61 = vpop.f32.mrf.mxu1  ;;  %v2245_v42 = vmax.f32 %v2227_v17, 0.0 }
 0x312   :  { %v2251_v22 = vpack.c.bf16 %v2245_v42, %v2244_v55 }
 0x313   :  { %4996 = vmatmul.msk.bf16.gmra.mxu1 %vm486_vm6, %v6326_v26 }
 0x317   :  { %v2230_v46 = vpop.f32.mrf.mxu2 }
 0x318   :  { %v1456_v10 = vpop.f32.mrf.mxu1  ;;  %v2246_v51 = vmax.f32 %v2230_v46, 0.0 }
 0x31e   :  { %5019 = vmatmul.msk.bf16.gmra.mxu0 %vm486_vm6, %v6302_v32 }
 0x31f   :  { %v2233_v25 = vpop.f32.mrf.mxu2 }
 0x320   :  { %v1459_v57 = vpop.f32.mrf.mxu1  ;;  %v2247_v63 = vmax.f32 %v2233_v25, 0.0 }
 0x322   :  { %v2252_v40 = vpack.c.bf16 %v2247_v63, %v2246_v51  ;;  %v1477_v51 = vmax.f32 %v1453_v61, 0.0  ;;  %v6370_v61 = vld [vmem:[%s8139_s2 + $0x28] sm:$0xff] }
 0x323   :  { %4997 = vmatmul.msk.bf16.gmra.mxu1 %vm486_vm6, %v5702_v52  ;;  %v6339_v52 = vld [vmem:[%s8139_s2 + $0x30] sm:$0xff] }
 0x327   :  { %v2236_v31 = vpop.f32.mrf.mxu2 }
 0x328   :  { %v1462_v12 = vpop.f32.mrf.mxu1  ;;  %v2248_v1 = vmax.f32 %v2236_v31, 0.0  ;;  %v1479_v31 = vmax.f32 %v1459_v57, 0.0  ;;  %v6392_v57 = vld [vmem:[%s8139_s2 + $0x50] sm:$0xff] }
 0x329   :  { %v1480_v46 = vmax.f32 %v1462_v12, 0.0  ;;  %v6405_v12 = vld [vmem:[%s8139_s2 + $0x58] sm:$0xff] }
 0x32e   :  { %5020 = vmatmul.msk.bf16.gmra.mxu0 %vm486_vm6, %v6313_v54 }
 0x32f   :  { %v2239_v50 = vpop.f32.mrf.mxu2 }
 0x330   :  { %v1465_v8 = vpop.f32.mrf.mxu1  ;;  %v2249_v39 = vmax.f32 %v2239_v50, 0.0  ;;  %v1486_v50 = vpack.c.bf16 %v1480_v46, %v1479_v31  ;;  %v8229_v31 = vld [vmem:[#allocation6_spill] sm:$0xff] }
 0x331   :  { %v1481_v17 = vmax.f32 %v1465_v8, 0.0  ;;  %v6361_v8 = vld [vmem:[%s8139_s2 + $0x40] sm:$0xff] }
 0x332   :  { %v2253_v35 = vpack.c.bf16 %v2249_v39, %v2248_v1  ;;  %v1478_v1 = vmax.f32 %v1456_v10, 0.0  ;;  %8227 = vst [vmem:[#allocation21_spill] sm:$0xff] %v6361_v8  ;;  %v6379_v10 = vld [vmem:[%s8139_s2 + $0x48] sm:$0xff] }
 0x333   :  { %4998 = vmatmul.msk.bf16.gmra.mxu1 %vm486_vm6, %v6339_v52 }
 0x334   :  { %2258 = vmatpush.bf16.msrb.mxu2 %v2253_v35  ;;  %v1485_v63 = vpack.c.bf16 %v1478_v1, %v1477_v51  ;;  %v6436_v35 = vld [vmem:[%s8139_s2 + $0x60] sm:$0xff]  ;;  %v1355_v1 = vmax.f32 %v6228_v0, %v8229_v31 }
 0x338   :  { %v1468_v6 = vpop.f32.mrf.mxu1  ;;  %2259 = vmatpush.bf16.msrb.mxu2 %v2252_v40 }
 0x339   :  { %v1482_v29 = vmax.f32 %v1468_v6, 0.0 }
 0x33b   :  { %v1487_v25 = vpack.c.bf16 %v1482_v29, %v1481_v17 }
 0x33c   :  { %2260 = vmatpush.bf16.msrb.mxu2 %v2251_v22  ;;  %v6449_v22 = vld [vmem:[%s8139_s2 + $0x68] sm:$0xff] }
 0x33e   :  { %5021 = vmatmul.msk.bf16.gmra.mxu0 %vm486_vm6, %v6326_v26 }
 0x340   :  { %v1471_v43 = vpop.f32.mrf.mxu1  ;;  %2261 = vmatpush.bf16.msrb.mxu2 %v2250_v16 }
 0x341   :  { %v1483_v24 = vmax.f32 %v1471_v43, 0.0  ;;  %v8228_v43 = vld [vmem:[#allocation5_spill] sm:$0xff] }
 0x343   :  { %5042 = vmatmul.msk.bf16.vlgmr.msrb.gmra.mxu2 %vm486_vm6, %v6280_v56  ;;  %4999 = vmatmul.msk.bf16.gmra.mxu1 %vm486_vm6, %v6350_v45 }
 0x348   :  { %v1474_v34 = vpop.f32.mrf.mxu1 }
 0x349   :  { %v1484_v58 = vmax.f32 %v1474_v34, 0.0  ;;  %v1354_v34 = vmax.f32 %v6212_v14, %v8228_v43 }
 0x34b   :  { %v1488_v4 = vpack.c.bf16 %v1484_v58, %v1483_v24 }
 0x34d   :  { %1493 = vmatpush.bf16.msra.mxu3 %v1488_v4 }
 0x34e   :  { %5022 = vmatmul.msk.bf16.gmra.mxu0 %vm486_vm6, %v6370_v61 }
 0x351   :  { %1494 = vmatpush.bf16.msra.mxu3 %v1487_v25 }
 0x353   :  { %5043 = vmatmul.msk.bf16.gmra.mxu2 %vm486_vm6, %v6291_v5  ;;  %5000 = vmatmul.msk.bf16.gmra.mxu1 %vm486_vm6, %v6361_v8 }
 0x355   :  { %1495 = vmatpush.bf16.msra.mxu3 %v1486_v50 }
 0x359   :  { %1496 = vmatpush.bf16.msra.mxu3 %v1485_v63  ;;  %v1070_v63 = vld [vmem:[#allocation2 + $0x10] sm:$0xff] }
 0x35a   :  { %v1102_v0 = vmax.f32 %v1070_v63, %v6240_v62 }
 0x35c   :  { %4967 = vmatmul.msk.bf16.vlgmr.msra.gmra.mxu3 %vm486_vm6, %v6280_v56 }
 0x35e   :  { %5023 = vmatmul.msk.bf16.gmra.mxu0 %vm486_vm6, %v6339_v52 }
 0x363   :  { %5044 = vmatmul.msk.bf16.gmra.mxu2 %vm486_vm6, %v6302_v32  ;;  %5001 = vmatmul.msk.bf16.gmra.mxu1 %vm486_vm6, %v6379_v10 }
 0x36c   :  { %4968 = vmatmul.msk.bf16.gmra.mxu3 %vm486_vm6, %v6291_v5 }
 0x36e   :  { %5024 = vmatmul.msk.bf16.gmra.mxu0 %vm486_vm6, %v6350_v45 }
 0x373   :  { %5045 = vmatmul.msk.bf16.gmra.mxu2 %vm486_vm6, %v6313_v54  ;;  %5002 = vmatmul.msk.bf16.gmra.mxu1 %vm486_vm6, %v6392_v57 }
 0x37c   :  { %4969 = vmatmul.msk.bf16.gmra.mxu3 %vm486_vm6, %v6302_v32  ;;  %v1754_v32 = vpop.f32.mrf.mxu1 }
 0x37e   :  { %5025 = vmatmul.msk.bf16.gmra.mxu0 %vm486_vm6, %v6361_v8 }
 0x383   :  { %5046 = vmatmul.msk.bf16.gmra.mxu2 %vm486_vm6, %v6326_v26  ;;  %5003 = vmatmul.msk.bf16.gmra.mxu1 %vm486_vm6, %v6405_v12 }
 0x38c   :  { %4970 = vmatmul.msk.bf16.gmra.mxu3 %vm486_vm6, %v6313_v54  ;;  %v2008_v54 = vpop.f32.mrf.mxu0 }
 0x38e   :  { %5026 = vmatmul.msk.bf16.gmra.mxu0 %vm486_vm6, %v6379_v10 }
 0x393   :  { %5047 = vmatmul.msk.bf16.gmra.mxu2 %vm486_vm6, %v6370_v61 }
 0x394   :  { %v2010_v55 = vpop.f32.mrf.mxu0 }
 0x39c   :  { %4971 = vmatmul.msk.bf16.gmra.mxu3 %vm486_vm6, %v6326_v26  ;;  %v1756_v26 = vpop.f32.mrf.mxu1  ;;  %5004 = vmatmul.msk.bf16.gmra.mxu1 %vm486_vm6, %v6436_v35  ;;  %v2013_v6 = vpop.f32.mrf.mxu0 }
 0x39e   :  { %5027 = vmatmul.msk.bf16.gmra.mxu0 %vm486_vm6, %v6392_v57 }
 0x3a3   :  { %5048 = vmatmul.msk.bf16.gmra.mxu2 %vm486_vm6, %v6339_v52 }
 0x3a4   :  { %v1759_v42 = vpop.f32.mrf.mxu1  ;;  %v2015_v16 = vpop.f32.mrf.mxu0 }
 0x3ac   :  { %4972 = vmatmul.msk.bf16.gmra.mxu3 %vm486_vm6, %v6370_v61  ;;  %v1761_v47 = vpop.f32.mrf.mxu1  ;;  %5005 = vmatmul.msk.bf16.gmra.mxu1 %vm486_vm6, %v6449_v22  ;;  %v6457_v46 = vpop.f32.mrf.mxu0 }
 0x3ae   :  { %5028 = vmatmul.msk.bf16.gmra.mxu0 %vm486_vm6, %v6405_v12 }
 0x3b3   :  { %5049 = vmatmul.msk.bf16.gmra.mxu2 %vm486_vm6, %v6350_v45 }
 0x3b4   :  { %v1764_v29 = vpop.f32.mrf.mxu1 }
 0x3bc   :  { %4973 = vmatmul.msk.bf16.gmra.mxu3 %vm486_vm6, %v6339_v52  ;;  %v1766_v43 = vpop.f32.mrf.mxu1 }
 0x3be   :  { %5029 = vmatmul.msk.bf16.gmra.mxu0 %vm486_vm6, %v6436_v35 }
 0x3c3   :  { %5050 = vmatmul.msk.bf16.gmra.mxu2 %vm486_vm6, %v6361_v8 }
 0x3c6   :  { %v2263_v39 = vpop.f32.mrf.mxu2 }
 0x3cc   :  { %4974 = vmatmul.msk.bf16.gmra.mxu3 %vm486_vm6, %v6350_v45 }
 0x3ce   :  { %v2265_v40 = vpop.f32.mrf.mxu2  ;;  %5030 = vmatmul.msk.bf16.gmra.mxu0 %vm486_vm6, %v6449_v22 }
 0x3d3   :  { %5051 = vmatmul.msk.bf16.gmra.mxu2 %vm486_vm6, %v6379_v10 }
 0x3d6   :  { %v2268_v21 = vpop.f32.mrf.mxu2 }
 0x3dc   :  { %4975 = vmatmul.msk.bf16.gmra.mxu3 %vm486_vm6, %v6361_v8 }
 0x3de   :  { %v2270_v4 = vpop.f32.mrf.mxu2 }
 0x3df   :  { %v1498_v24 = vpop.f32.mrf.mxu3 }
 0x3e0   :  { %v1610_v58 = vmax.f32 %v1354_v34, %v1498_v24 }
 0x3e2   :  { %v1866_v17 = vmax.f32 %v1610_v58, %v1754_v32  ;;  %v6468_v32 = vld [vmem:[%s8139_s2 + $0x70] sm:$0xff] }
 0x3e3   :  { %5052 = vmatmul.msk.bf16.gmra.mxu2 %vm486_vm6, %v6392_v57  ;;  %5006 = vmatmul.msk.bf16.gmra.mxu1 %vm486_vm6, %v6468_v32  ;;  %v8230_v58 = vld [vmem:[#allocation7_spill] sm:$0xff] }
 0x3e4   :  { %v2120_v25 = vmax.f32 %v1866_v17, %v2008_v54  ;;  %v1356_v17 = vmax.f32 %v1102_v0, %v8230_v58  ;;  %v1072_v0 = vld [vmem:[#allocation2 + $0x20] sm:$0xff] }
 0x3e6   :  { %v2375_v50 = vmax.f32 %v2120_v25, %v2263_v39  ;;  %v2273_v34 = vpop.f32.mrf.mxu2  ;;  %v2020_v39 = vpop.f32.mrf.mxu0  ;;  %5031 = vmatmul.msk.bf16.gmra.mxu0 %vm486_vm6, %v6468_v32 }
 0x3e7   :  { %v1500_v51 = vpop.f32.mrf.mxu3 }
 0x3e8   :  { %v1611_v14 = vmax.f32 %v1355_v1, %v1500_v51  ;;  %2407 = vst [vmem:[#allocation2] sm:$0xff] %v2375_v50  ;;  %v1071_v50 = vld [vmem:[#allocation2 + $0x18] sm:$0xff]  ;;  %v1769_v51 = vpop.f32.mrf.mxu1 }
 0x3e9   :  { %v1103_v27 = vmax.f32 %v1071_v50, %v6248_v36  ;;  %v6485_v36 = vld [vmem:[%s8139_s2 + $0x78] sm:$0xff] }
 0x3ea   :  { %v1867_v54 = vmax.f32 %v1611_v14, %v1756_v26  ;;  %v8231_v26 = vld [vmem:[#allocation8_spill] sm:$0xff] }
 0x3eb   :  { %v1357_v14 = vmax.f32 %v1103_v27, %v8231_v26 }
 0x3ec   :  { %4976 = vmatmul.msk.bf16.gmra.mxu3 %vm486_vm6, %v6379_v10  ;;  %v2121_v24 = vmax.f32 %v1867_v54, %v2010_v55 }
 0x3ee   :  { %v2376_v25 = vmax.f32 %v2121_v24, %v2265_v40  ;;  %v2275_v30 = vpop.f32.mrf.mxu2  ;;  %v2023_v8 = vpop.f32.mrf.mxu0 }
 0x3ef   :  { %v1503_v31 = vpop.f32.mrf.mxu3 }
 0x3f0   :  { %v1612_v1 = vmax.f32 %v1356_v17, %v1503_v31  ;;  %2408 = vst [vmem:[#allocation2 + $0x8] sm:$0xff] %v2376_v25  ;;  %v1771_v54 = vpop.f32.mrf.mxu1 }
 0x3f2   :  { %v1868_v53 = vmax.f32 %v1612_v1, %v1759_v42  ;;  %v1073_v1 = vld [vmem:[#allocation2 + $0x28] sm:$0xff] }
 0x3f3   :  { %5053 = vmatmul.msk.bf16.gmra.mxu2 %vm486_vm6, %v6405_v12  ;;  %5007 = vmatmul.msk.bf16.gmra.mxu1 %vm486_vm6, %v6485_v36  ;;  %v1105_v26 = vmax.f32 %v1073_v1, %v6266_v20 }
 0x3f4   :  { %v2122_v62 = vmax.f32 %v1868_v53, %v2013_v6  ;;  %v1104_v53 = vmax.f32 %v1072_v0, %v6256_v60  ;;  %v1074_v0 = vld [vmem:[#allocation2 + $0x30] sm:$0xff] }
 0x3f5   :  { %v1106_v20 = vmax.f32 %v1074_v0, %v6274_v19 }
 0x3f6   :  { %v2377_v55 = vmax.f32 %v2122_v62, %v2268_v21  ;;  %v2278_v24 = vpop.f32.mrf.mxu2  ;;  %v2025_v42 = vpop.f32.mrf.mxu0  ;;  %v8232_v21 = vld [vmem:[#allocation9_spill] sm:$0xff]  ;;  %5032 = vmatmul.msk.bf16.gmra.mxu0 %vm486_vm6, %v6485_v36 }
 0x3f7   :  { %v1505_v40 = vpop.f32.mrf.mxu3  ;;  %v1358_v58 = vmax.f32 %v1104_v53, %v8232_v21  ;;  %v8234_v21 = vld [vmem:[#allocation11_spill] sm:$0xff] }
 0x3f8   :  { %v1613_v63 = vmax.f32 %v1357_v14, %v1505_v40  ;;  %2409 = vst [vmem:[#allocation2 + $0x10] sm:$0xff] %v2377_v55  ;;  %v1774_v50 = vpop.f32.mrf.mxu1 }
 0x3fa   :  { %v1869_v27 = vmax.f32 %v1613_v63, %v1761_v47  ;;  %v8233_v47 = vld [vmem:[#allocation10_spill] sm:$0xff] }
 0x3fc   :  { %4977 = vmatmul.msk.bf16.gmra.mxu3 %vm486_vm6, %v6392_v57  ;;  %v2123_v6 = vmax.f32 %v1869_v27, %v2015_v16  ;;  %v1359_v16 = vmax.f32 %v1105_v26, %v8233_v47  ;;  %v8235_v47 = vld [vmem:[#allocation12_spill] sm:$0xff] }
 0x3fe   :  { %v2378_v17 = vmax.f32 %v2123_v6, %v2270_v4  ;;  %v2280_v62 = vpop.f32.mrf.mxu2  ;;  %v2028_v55 = vpop.f32.mrf.mxu0 }
 0x3ff   :  { %v1508_v25 = vpop.f32.mrf.mxu3 }
 0x400   :  { %v1614_v31 = vmax.f32 %v1358_v58, %v1508_v25  ;;  %2410 = vst [vmem:[#allocation2 + $0x18] sm:$0xff] %v2378_v17  ;;  %v1776_v53 = vpop.f32.mrf.mxu1  ;;  %v1360_v58 = vmax.f32 %v1106_v20, %v8234_v21 }
 0x402   :  { %v1870_v14 = vmax.f32 %v1614_v31, %v1764_v29  ;;  %v1075_v31 = vld [vmem:[#allocation2 + $0x38] sm:$0xff] }
 0x403   :  { %5054 = vmatmul.msk.bf16.gmra.mxu2 %vm486_vm6, %v6436_v35 }
 0x404   :  { %v2124_v60 = vmax.f32 %v1870_v14, %v6457_v46  ;;  %v1107_v14 = vmax.f32 %v1075_v31, %v6284_v7 }
 0x406   :  { %v2379_v40 = vmax.f32 %v2124_v60, %v2273_v34  ;;  %v2283_v27 = vpop.f32.mrf.mxu2  ;;  %v2030_v6 = vpop.f32.mrf.mxu0 }
 0x407   :  { %v1510_v4 = vpop.f32.mrf.mxu3 }
 0x408   :  { %v1615_v63 = vmax.f32 %v1359_v16, %v1510_v4  ;;  %2411 = vst [vmem:[#allocation2 + $0x20] sm:$0xff] %v2379_v40  ;;  %v6504_v1 = vpop.f32.mrf.mxu1  ;;  %v1361_v16 = vmax.f32 %v1107_v14, %v8235_v47  ;;  %v1076_v4 = vld [vmem:[#allocation2 + $0x40] sm:$0xff] }
 0x409   :  { %v1108_v20 = vmax.f32 %v1076_v4, %v6286_v49  ;;  %v2441_v4 = vrot.slane %v6103_v11, 7 }
 0x40a   :  { %v1871_v29 = vmax.f32 %v1615_v63, %v1766_v43 }
 0x40c   :  { %4978 = vmatmul.msk.bf16.gmra.mxu3 %vm486_vm6, %v6405_v12  ;;  %v2125_v46 = vmax.f32 %v1871_v29, %v2020_v39 }
 0x40e   :  { %v2380_v34 = vmax.f32 %v2125_v46, %v2275_v30  ;;  %v2285_v26 = vpop.f32.mrf.mxu2  ;;  %v6507_v19 = vpop.f32.mrf.mxu0 }
 0x40f   :  { %v1513_v17 = vpop.f32.mrf.mxu3 }
 0x410   :  { %v1616_v25 = vmax.f32 %v1360_v58, %v1513_v17  ;;  %2412 = vst [vmem:[#allocation2 + $0x28] sm:$0xff] %v2380_v34  ;;  %v6512_v63 = vpop.f32.mrf.mxu1  ;;  %v1077_v34 = vld [vmem:[#allocation2 + $0x48] sm:$0xff] }
 0x412   :  { %v1872_v60 = vmax.f32 %v1616_v25, %v1769_v51  ;;  %v1109_v25 = vmax.f32 %v1077_v34, %v6295_v13 }
 0x413   :  { %5055 = vmatmul.msk.bf16.gmra.mxu2 %vm486_vm6, %v6449_v22 }
 0x414   :  { %v2126_v43 = vmax.f32 %v1872_v60, %v2023_v8  ;;  %v8237_v60 = vld [vmem:[#allocation15_spill] sm:$0xff] }
 0x416   :  { %v2381_v40 = vmax.f32 %v2126_v43, %v2278_v24  ;;  %v2288_v0 = vpop.f32.mrf.mxu2  ;;  %v6515_v51 = vpop.f32.mrf.mxu0  ;;  %v8236_v24 = vld [vmem:[#allocation13_spill] sm:$0xff]  ;;  %v1363_v43 = vmax.f32 %v1109_v25, %v8237_v60  ;;  %v1079_v25 = vld [vmem:[#allocation2 + $0x58] sm:$0xff] }
 0x417   :  { %v1515_v30 = vpop.f32.mrf.mxu3  ;;  %v1362_v29 = vmax.f32 %v1108_v20, %v8236_v24  ;;  %v2443_v20 = vrot.slane %v6089_v3, 6 }
 0x418   :  { %v1617_v39 = vmax.f32 %v1361_v16, %v1515_v30  ;;  %2413 = vst [vmem:[#allocation2 + $0x30] sm:$0xff] %v2381_v40  ;;  %v6520_v17 = vpop.f32.mrf.mxu1  ;;  %v1078_v16 = vld [vmem:[#allocation2 + $0x50] sm:$0xff] }
 0x419   :  { %v1110_v30 = vmax.f32 %v1078_v16, %v6297_v48  ;;  %v2445_v48 = vrot.slane %v6093_v18, 5 }
 0x41a   :  { %v1873_v7 = vmax.f32 %v1617_v39, %v1771_v54 }
 0x41c   :  { %4979 = vmatmul.msk.bf16.gmra.mxu3 %vm486_vm6, %v6436_v35  ;;  %v2127_v8 = vmax.f32 %v1873_v7, %v2025_v42  ;;  %v8238_v7 = vld [vmem:[#allocation16_spill] sm:$0xff] }
 0x41e   :  { %v2382_v46 = vmax.f32 %v2127_v8, %v2280_v62  ;;  %v6523_v49 = vpop.f32.mrf.mxu0  ;;  %v2290_v54 = vpop.f32.mrf.mxu2  ;;  %v1364_v8 = vmax.f32 %v1110_v30, %v8238_v7 }
 0x41f   :  { %v1518_v21 = vpop.f32.mrf.mxu3 }
 0x420   :  { %v1618_v58 = vmax.f32 %v1362_v29, %v1518_v21  ;;  %2414 = vst [vmem:[#allocation2 + $0x38] sm:$0xff] %v2382_v46  ;;  %v1786_v40 = vpop.f32.mrf.mxu1 }
 0x422   :  { %v1874_v31 = vmax.f32 %v1618_v58, %v1774_v50 }
 0x423   :  { %5056 = vmatmul.msk.bf16.gmra.mxu2 %vm486_vm6, %v6468_v32 }
 0x424   :  { %v2128_v14 = vmax.f32 %v1874_v31, %v2028_v55  ;;  %v6536_v55 = vld [vmem:[%s8137_s0 + $0x8] sm:$0xff] }
 0x426   :  { %v2383_v47 = vmax.f32 %v2128_v14, %v2283_v27  ;;  %v6529_v13 = vpop.f32.mrf.mxu0  ;;  %v2439_v27 = vrot.slane %v6536_v55, 1 }
 0x427   :  { %v1520_v42 = vpop.f32.mrf.mxu3 }
 0x428   :  { %v1619_v62 = vmax.f32 %v1363_v43, %v1520_v42  ;;  %2415 = vst [vmem:[#allocation2 + $0x40] sm:$0xff] %v2383_v47  ;;  %v1789_v14 = vpop.f32.mrf.mxu1 }
 0x42a   :  { %v1875_v39 = vmax.f32 %v1619_v62, %v1776_v53  ;;  %v2293_v53 = vpop.f32.mrf.mxu2  ;;  %v8239_v62 = vld [vmem:[#allocation17_spill] sm:$0xff] }
 0x42c   :  { %4980 = vmatmul.msk.bf16.gmra.mxu3 %vm486_vm6, %v6449_v22  ;;  %v2129_v50 = vmax.f32 %v1875_v39, %v2030_v6  ;;  %v6546_v6 = vld [vmem:[%s8137_s0 + $0x19] sm:$0xff] }
 0x42d   :  { %v2447_v29 = vsel %vm27_vm15, %v2439_v27, %v6546_v6 }
 0x42e   :  { %v2384_v24 = vmax.f32 %v2129_v50, %v2285_v26  ;;  %v2448_v21 = vsel %vm316_vm0, %v2447_v29, %v2441_v4  ;;  %v1111_v26 = vmax.f32 %v1079_v25, %v6306_v37  ;;  %v6557_v47 = vpop.f32.mrf.mxu0  ;;  %v1080_v37 = vld [vmem:[#allocation2 + $0x60] sm:$0xff] }
 0x42f   :  { %v1523_v46 = vpop.f32.mrf.mxu3  ;;  %v2449_v34 = vsel %vm318_vm1, %v2448_v21, %v2443_v20  ;;  %v1112_v4 = vmax.f32 %v1080_v37, %v6308_v38 }
 0x430   :  { %v1620_v58 = vmax.f32 %v1364_v8, %v1523_v46  ;;  %2416 = vst [vmem:[#allocation2 + $0x48] sm:$0xff] %v2384_v24  ;;  %v2450_v31 = vsel %vm320_vm2, %v2449_v34, %v2445_v48  ;;  %v1365_v16 = vmax.f32 %v1111_v26, %v8239_v62  ;;  %v1081_v46 = vld [vmem:[#allocation2 + $0x68] sm:$0xff] }
 0x431   :  { %v2451_v43 = vsel %vm322_vm3, %v2450_v31, 1.0  ;;  %v8242_v31 = vld [vmem:[#allocation20_spill] sm:$0xff] }
 0x432   :  { %v1876_v60 = vmax.f32 %v1620_v58, %v6504_v1  ;;  %5058 = vmatpush.msk.msrb.mxu3 %vm349_vm4, %v2451_v43  ;;  %v2295_v50 = vpop.f32.mrf.mxu2  ;;  %v1791_v1 = vpop.f32.mrf.mxu1  ;;  %v1113_v58 = vmax.f32 %v1081_v46, %v6317_v44 }
 0x433   :  { %5057 = vmatmul.msk.bf16.gmra.mxu2 %vm486_vm6, %v6485_v36 }
 0x434   :  { %v2130_v42 = vmax.f32 %v1876_v60, %v6507_v19 }
 0x436   :  { %v2385_v30 = vmax.f32 %v2130_v42, %v2288_v0  ;;  %v2045_v48 = vpop.f32.mrf.mxu0  ;;  %v8240_v0 = vld [vmem:[#allocation19_spill] sm:$0xff] }
 0x437   :  { %v1525_v39 = vpop.f32.mrf.mxu3  ;;  %v1366_v7 = vmax.f32 %v1112_v4, %v8240_v0  ;;  %v1593_v4 = vld [vmem:[#allocation2 + $0x78] sm:$0xff] }
 0x438   :  { %v1621_v27 = vmax.f32 %v1365_v16, %v1525_v39  ;;  %2417 = vst [vmem:[#allocation2 + $0x50] sm:$0xff] %v2385_v30  ;;  %v1592_v30 = vld [vmem:[#allocation2 + $0x70] sm:$0xff] }
 0x43a   :  { %v1877_v20 = vmax.f32 %v1621_v27, %v6512_v63  ;;  %v6569_v21 = vpop.f32.mrf.mxu2  ;;  %v1794_v63 = vpop.f32.mrf.mxu1 }
 0x43c   :  { %4981 = vmatmul.msk.bf16.gmra.mxu3 %vm486_vm6, %v6468_v32  ;;  %v2131_v19 = vmax.f32 %v1877_v20, %v6515_v51  ;;  %v1367_v51 = vmax.f32 %v1113_v58, %v8242_v31 }
 0x43e   :  { %v2386_v8 = vmax.f32 %v2131_v19, %v2290_v54  ;;  %v6574_v25 = vpop.f32.mrf.mxu0 }
 0x43f   :  { %v1528_v24 = vpop.f32.mrf.mxu3  ;;  %8241 = vst [vmem:[#allocation5_spill] sm:$0xff] %v6574_v25 }
 0x440   :  { %v1622_v29 = vmax.f32 %v1366_v7, %v1528_v24  ;;  %2418 = vst [vmem:[#allocation2 + $0x58] sm:$0xff] %v2386_v8  ;;  %v1594_v8 = vld [vmem:[#allocation2 + $0x80] sm:$0xff] }
 0x442   :  { %v1878_v38 = vmax.f32 %v1622_v29, %v6520_v17  ;;  %v2300_v42 = vpop.f32.mrf.mxu2  ;;  %v1796_v62 = vpop.f32.mrf.mxu1 }
 0x444   :  { %v2132_v34 = vmax.f32 %v1878_v38, %v6523_v49 }
 0x446   :  { %v2387_v26 = vmax.f32 %v2132_v34, %v2293_v53  ;;  %v2050_v49 = vpop.f32.mrf.mxu0  ;;  %v1595_v34 = vld [vmem:[#allocation2 + $0x88] sm:$0xff] }
 0x447   :  { %v1530_v60 = vpop.f32.mrf.mxu3 }
 0x448   :  { %v1623_v54 = vmax.f32 %v1367_v51, %v1530_v60  ;;  %2419 = vst [vmem:[#allocation2 + $0x60] sm:$0xff] %v2387_v26 }
 0x44a   :  { %v1879_v43 = vmax.f32 %v1623_v54, %v1786_v40  ;;  %v6582_v53 = vpop.f32.mrf.mxu2  ;;  %v1799_v40 = vpop.f32.mrf.mxu1 }
 0x44c   :  { %4982 = vmatmul.msk.bf16.gmra.mxu3 %vm486_vm6, %v6485_v36  ;;  %v2133_v44 = vmax.f32 %v1879_v43, %v6529_v13 }
 0x44e   :  { %v2388_v17 = vmax.f32 %v2133_v44, %v2295_v50  ;;  %v6584_v19 = vpop.f32.mrf.mxu0 }
 0x44f   :  { %v1533_v16 = vpop.f32.mrf.mxu3  ;;  %8243 = vst [vmem:[#allocation6_spill] sm:$0xff] %v6584_v19 }
 0x450   :  { %v1624_v39 = vmax.f32 %v1592_v30, %v1533_v16  ;;  %2420 = vst [vmem:[#allocation2 + $0x68] sm:$0xff] %v2388_v17  ;;  %v2693_v17 = vrot.slane %v6536_v55, 2  ;;  %v2697_v30 = vrot.slane %v6089_v3, 7 }
 0x452   :  { %v6580_v27 = vmax.f32 %v1624_v39, %v1789_v14  ;;  %v2305_v24 = vpop.f32.mrf.mxu2  ;;  %v1801_v29 = vpop.f32.mrf.mxu1 }
 0x456   :  { %v2055_v58 = vpop.f32.mrf.mxu0 }
 0x457   :  { %v1535_v37 = vpop.f32.mrf.mxu3 }
 0x458   :  { %v1625_v20 = vmax.f32 %v1593_v4, %v1535_v37  ;;  %v1597_v37 = vld [vmem:[#allocation2 + $0x98] sm:$0xff] }
 0x45a   :  { %v1881_v0 = vmax.f32 %v1625_v20, %v1791_v1  ;;  %v1804_v51 = vpop.f32.mrf.mxu1 }
 0x45c   :  { %5059 = vmatmul.msk.f32.vlgmr.msrb.gmra.mxu3 %vm324_vm5, %v6132_v15  ;;  %v2135_v13 = vmax.f32 %v1881_v0, %v2045_v48  ;;  %v6596_v48 = vpop.f32.mrf.mxu2 }
 0x45d   :  { %8244 = vst [vmem:[#allocation7_spill] sm:$0xff] %v6596_v48 }
 0x45e   :  { %v6588_v50 = vmax.f32 %v2135_v13, %v2300_v42 }
 0x45f   :  { %v1538_v7 = vpop.f32.mrf.mxu3 }
 0x460   :  { %v1626_v14 = vmax.f32 %v1594_v8, %v1538_v7 }
 0x462   :  { %v6590_v46 = vmax.f32 %v1626_v14, %v1794_v63  ;;  %v6600_v63 = vpop.f32.mrf.mxu0  ;;  %v1806_v16 = vpop.f32.mrf.mxu1 }
 0x463   :  { %8245 = vst [vmem:[#allocation8_spill] sm:$0xff] %v6600_v63 }
 0x464   :  { %5060 = vmatmul.msk.f32.gmra.mxu3 %vm324_vm5, %v6146_v23  ;;  %v1596_v23 = vld [vmem:[#allocation2 + $0x90] sm:$0xff]  ;;  %v2310_v44 = vpop.f32.mrf.mxu2 }
 0x467   :  { %v1540_v38 = vpop.f32.mrf.mxu3 }
 0x468   :  { %v1627_v15 = vmax.f32 %v1595_v34, %v1540_v38 }
 0x46a   :  { %v1883_v31 = vmax.f32 %v1627_v15, %v1796_v62  ;;  %v2060_v4 = vpop.f32.mrf.mxu0  ;;  %v1598_v15 = vld [vmem:[#allocation2 + $0xa0] sm:$0xff] }
 0x46c   :  { %5061 = vmatmul.msk.f32.gmra.mxu3 %vm324_vm5, %v6161_v9  ;;  %v2137_v26 = vmax.f32 %v1883_v31, %v2050_v49  ;;  %v2695_v9 = vrot.slane %v6546_v6, 1  ;;  %v6623_v14 = vpop.f32.mrf.mxu2  ;;  %v1809_v31 = vpop.f32.mrf.mxu1 }
 0x46d   :  { %8248 = vst [vmem:[#allocation11_spill] sm:$0xff] %v6623_v14 }
 0x46e   :  { %v6602_v60 = vmax.f32 %v2137_v26, %v2305_v24  ;;  %v2701_v49 = vsel %vm27_vm15, %v2693_v17, %v2695_v9  ;;  %v2951_v17 = vrot.slane %v6103_v11, 1 }
 0x46f   :  { %v1543_v54 = vpop.f32.mrf.mxu3 }
 0x470   :  { %8246 = vst [vmem:[#allocation9_spill] sm:$0xff] %v6602_v60  ;;  %v1628_v43 = vmax.f32 %v1596_v23, %v1543_v54 }
 0x472   :  { %v6604_v42 = vmax.f32 %v1628_v43, %v1799_v40  ;;  %v2699_v40 = vrot.slane %v6093_v18, 6  ;;  %v6627_v54 = vpop.f32.mrf.mxu0  ;;  %v2949_v43 = vrot.slane %v6546_v6, 2 }
 0x473   :  { %8250 = vst [vmem:[#allocation13_spill] sm:$0xff] %v6627_v54 }
 0x474   :  { %8247 = vst [vmem:[#allocation10_spill] sm:$0xff] %v6604_v42  ;;  %5062 = vmatmul.msk.f32.gmra.mxu3 %vm324_vm5, %v6174_v59  ;;  %v2702_v59 = vsel %vm316_vm0, %v2701_v49, %v6103_v11  ;;  %v1599_v49 = vld [vmem:[#allocation2 + $0xa8] sm:$0xff] }
 0x475   :  { %v2703_v0 = vsel %vm318_vm1, %v2702_v59, %v2697_v30  ;;  %v1811_v59 = vpop.f32.mrf.mxu1 }
 0x476   :  { %v2704_v13 = vsel %vm320_vm2, %v2703_v0, %v2699_v40  ;;  %v6649_v0 = vld [vmem:[%s8138_s1] sm:$0xff] }
 0x477   :  { %v1545_v39 = vpop.f32.mrf.mxu3  ;;  %v2705_v8 = vsel %vm322_vm3, %v2704_v13, 1.0 }
 0x478   :  { %v1629_v20 = vmax.f32 %v1597_v37, %v1545_v39  ;;  %5083 = vmatpush.msk.msra.mxu3 %vm349_vm4, %v2705_v8  ;;  %v2315_v39 = vpop.f32.mrf.mxu2 }
 0x47a   :  { %v1885_v7 = vmax.f32 %v1629_v20, %v1801_v29  ;;  %v2947_v29 = vrot.slane %v6536_v55, 3  ;;  %v2065_v13 = vpop.f32.mrf.mxu0 }
 0x47c   :  { %5063 = vmatmul.msk.f32.gmra.mxu3 %vm324_vm5, %v6189_v2  ;;  %v2139_v24 = vmax.f32 %v1885_v7, %v2055_v58  ;;  %v2955_v58 = vsel %vm27_vm15, %v2947_v29, %v2949_v43  ;;  %v6664_v29 = vld [vmem:[%s8138_s1 + $0x8] sm:$0xff] }
 0x47d   :  { %v2956_v9 = vsel %vm316_vm0, %v2955_v58, %v2951_v17  ;;  %v1814_v43 = vpop.f32.mrf.mxu1 }
 0x47e   :  { %v6625_v38 = vmax.f32 %v2139_v24, %v2310_v44  ;;  %v2953_v44 = vrot.slane %v6093_v18, 7 }
 0x47f   :  { %v1548_v34 = vpop.f32.mrf.mxu3 }
 0x480   :  { %8249 = vst [vmem:[#allocation12_spill] sm:$0xff] %v6625_v38  ;;  %v1630_v26 = vmax.f32 %v1598_v15, %v1548_v34  ;;  %v1600_v34 = vld [vmem:[#allocation2 + $0xb0] sm:$0xff] }
 0x482   :  { %v6629_v23 = vmax.f32 %v1630_v26, %v1804_v51  ;;  %v2957_v51 = vsel %vm318_vm1, %v2956_v9, %v6089_v3  ;;  %v6657_v26 = vpop.f32.mrf.mxu2  ;;  %v6677_v9 = vld [vmem:[%s8138_s1 + $0x10] sm:$0xff] }
 0x483   :  { %v2958_v37 = vsel %vm320_vm2, %v2957_v51, %v2953_v44  ;;  %8253 = vst [vmem:[#allocation17_spill] sm:$0xff] %v6657_v26 }
 0x484   :  { %8251 = vst [vmem:[#allocation15_spill] sm:$0xff] %v6629_v23  ;;  %5064 = vmatmul.msk.f32.gmra.mxu3 %vm324_vm5, %v6204_v28  ;;  %v2959_v28 = vsel %vm322_vm3, %v2958_v37, 1.0  ;;  %v1602_v37 = vld [vmem:[#allocation2 + $0xc0] sm:$0xff] }
 0x485   :  { %5108 = vmatpush.msk.msra.mxu0 %vm349_vm4, %v2959_v28 }
 0x486   :  { %5109 = vmatmul.msk.f32.vlgmr.msra.gmra.mxu0 %vm324_vm5, %v6649_v0 }
 0x487   :  { %v1550_v30 = vpop.f32.mrf.mxu3 }
 0x488   :  { %v1631_v40 = vmax.f32 %v1599_v49, %v1550_v30  ;;  %v6683_v30 = vpop.f32.mrf.mxu1 }
 0x48a   :  { %v1887_v20 = vmax.f32 %v1631_v40, %v1806_v16  ;;  %v2320_v51 = vpop.f32.mrf.mxu2 }
 0x48c   :  { %5065 = vmatmul.msk.f32.gmra.mxu3 %vm324_vm5, %v6220_v41  ;;  %v2141_v7 = vmax.f32 %v1887_v20, %v2060_v4  ;;  %v6672_v4 = vpop.f32.mrf.mxu0  ;;  %v6694_v20 = vld [vmem:[%s8138_s1 + $0x18] sm:$0xff] }
 0x48d   :  { %8255 = vst [vmem:[#allocation20_spill] sm:$0xff] %v6672_v4  ;;  %v6750_v41 = vld [vmem:[%s8138_s1 + $0x38] sm:$0xff] }
 0x48e   :  { %v6655_v8 = vmax.f32 %v2141_v7, %v2315_v39  ;;  %5110 = vmatmul.msk.f32.gmra.mxu0 %vm324_vm5, %v6664_v29 }
 0x48f   :  { %v1553_v24 = vpop.f32.mrf.mxu3 }
 0x490   :  { %8252 = vst [vmem:[#allocation16_spill] sm:$0xff] %v6655_v8  ;;  %v1632_v15 = vmax.f32 %v1600_v34, %v1553_v24  ;;  %v1819_v24 = vpop.f32.mrf.mxu1 }
 0x492   :  { %v6659_v16 = vmax.f32 %v1632_v15, %v1809_v31  ;;  %v1601_v31 = vld [vmem:[#allocation2 + $0xb8] sm:$0xff]  ;;  %v6709_v15 = vld [vmem:[%s8138_s1 + $0x20] sm:$0xff] }
 0x494   :  { %8254 = vst [vmem:[#allocation19_spill] sm:$0xff] %v6659_v16  ;;  %5066 = vmatmul.msk.f32.gmra.mxu3 %vm324_vm5, %v6236_v33  ;;  %v6687_v40 = vpop.f32.mrf.mxu0 }
 0x495   :  { %8257 = vst [vmem:[#allocation23_spill] sm:$0xff] %v6687_v40 }
 0x496   :  { %5111 = vmatmul.msk.f32.gmra.mxu0 %vm324_vm5, %v6677_v9 }
 0x497   :  { %v1555_v17 = vpop.f32.mrf.mxu3 }
 0x498   :  { %v1633_v58 = vmax.f32 %v1601_v31, %v1555_v17  ;;  %v1604_v17 = vld [vmem:[#allocation2 + $0xd0] sm:$0xff] }
 0x49a   :  { %v1889_v44 = vmax.f32 %v1633_v58, %v1811_v59  ;;  %v6715_v58 = vpop.f32.mrf.mxu1 }
 0x49b   :  { %8260 = vst [vmem:[#allocation26_spill] sm:$0xff] %v6715_v58 }
 0x49c   :  { %5084 = vmatmul.msk.f32.vlgmr.msra.gmra.mxu3 %vm324_vm5, %v6649_v0  ;;  %v2143_v33 = vmax.f32 %v1889_v44, %v2065_v13  ;;  %v6704_v34 = vpop.f32.mrf.mxu0 }
 0x49d   :  { %8259 = vst [vmem:[#allocation25_spill] sm:$0xff] %v6704_v34 }
 0x49e   :  { %v6685_v49 = vmax.f32 %v2143_v33, %v2320_v51  ;;  %5112 = vmatmul.msk.f32.gmra.mxu0 %vm324_vm5, %v6694_v20  ;;  %v6722_v51 = vld [vmem:[%s8138_s1 + $0x28] sm:$0xff] }
 0x49f   :  { %v1558_v39 = vpop.f32.mrf.mxu3 }
 0x4a0   :  { %8256 = vst [vmem:[#allocation22_spill] sm:$0xff] %v6685_v49  ;;  %v1634_v28 = vmax.f32 %v1602_v37, %v1558_v39 }
 0x4a2   :  { %v6689_v59 = vmax.f32 %v1634_v28, %v1814_v43  ;;  %v6737_v28 = vld [vmem:[%s8138_s1 + $0x30] sm:$0xff] }
 0x4a4   :  { %8258 = vst [vmem:[#allocation24_spill] sm:$0xff] %v6689_v59  ;;  %5085 = vmatmul.msk.f32.gmra.mxu3 %vm324_vm5, %v6664_v29  ;;  %v6726_v33 = vpop.f32.mrf.mxu0 }
 0x4a5   :  { %8262 = vst [vmem:[#allocation28_spill] sm:$0xff] %v6726_v33 }
 0x4a6   :  { %5113 = vmatmul.msk.f32.gmra.mxu0 %vm324_vm5, %v6709_v15 }
 0x4a7   :  { %v6702_v7 = vpop.f32.mrf.mxu3 }
 0x4ac   :  { %5086 = vmatmul.msk.f32.gmra.mxu3 %vm324_vm5, %v6677_v9 }
 0x4ae   :  { %5114 = vmatmul.msk.f32.gmra.mxu0 %vm324_vm5, %v6722_v51 }
 0x4af   :  { %v1563_v43 = vpop.f32.mrf.mxu3 }
 0x4b0   :  { %v1636_v31 = vmax.f32 %v1604_v17, %v1563_v43  ;;  %v6743_v43 = vpop.f32.mrf.mxu0 }
 0x4b1   :  { %8264 = vst [vmem:[#allocation30_spill] sm:$0xff] %v6743_v43 }
 0x4b2   :  { %v6717_v44 = vmax.f32 %v1636_v31, %v1819_v24  ;;  %v1824_v24 = vpop.f32.mrf.mxu1  ;;  %v1606_v31 = vld [vmem:[#allocation2 + $0xe0] sm:$0xff] }
 0x4b4   :  { %8261 = vst [vmem:[#allocation27_spill] sm:$0xff] %v6717_v44  ;;  %5087 = vmatmul.msk.f32.gmra.mxu3 %vm324_vm5, %v6694_v20 }
 0x4b6   :  { %5115 = vmatmul.msk.f32.gmra.mxu0 %vm324_vm5, %v6737_v28 }
 0x4b7   :  { %v6732_v37 = vpop.f32.mrf.mxu3 }
 0x4b8   :  { %8263 = vst [vmem:[#allocation29_spill] sm:$0xff] %v6732_v37 }
 0x4ba   :  { %v6758_v62 = vpop.f32.mrf.mxu1 }
 0x4bb   :  { %8266 = vst [vmem:[#allocation32_spill] sm:$0xff] %v6758_v62 }
 0x4bc   :  { %5088 = vmatmul.msk.f32.gmra.mxu3 %vm324_vm5, %v6709_v15 }
 0x4be   :  { %5116 = vmatmul.msk.f32.gmra.mxu0 %vm324_vm5, %v6750_v41 }
 0x4bf   :  { %v1568_v17 = vpop.f32.mrf.mxu3 }
 0x4c0   :  { %v1638_v13 = vmax.f32 %v1606_v31, %v1568_v17  ;;  %v1608_v17 = vld [vmem:[#allocation2 + $0xf0] sm:$0xff] }
 0x4c2   :  { %v6745_v39 = vmax.f32 %v1638_v13, %v1824_v24  ;;  %v6762_v13 = vpop.f32.mrf.mxu0  ;;  %v1829_v31 = vpop.f32.mrf.mxu1 }
 0x4c3   :  { %8268 = vst [vmem:[#allocation34_spill] sm:$0xff] %v6762_v13 }
 0x4c4   :  { %8265 = vst [vmem:[#allocation31_spill] sm:$0xff] %v6745_v39  ;;  %5089 = vmatmul.msk.f32.gmra.mxu3 %vm324_vm5, %v6722_v51 }
 0x4c7   :  { %v6760_v1 = vpop.f32.mrf.mxu3 }
 0x4c8   :  { %8267 = vst [vmem:[#allocation33_spill] sm:$0xff] %v6760_v1 }
 0x4ca   :  { %v6766_v44 = vpop.f32.mrf.mxu0 }
 0x4cb   :  { %8269 = vst [vmem:[#allocation35_spill] sm:$0xff] %v6766_v44 }
 0x4cc   :  { %5090 = vmatmul.msk.f32.gmra.mxu3 %vm324_vm5, %v6737_v28 }
 0x4cf   :  { %v1573_v24 = vpop.f32.mrf.mxu3 }
 0x4d0   :  { %v1640_v34 = vmax.f32 %v1608_v17, %v1573_v24 }
 0x4d2   :  { %v6768_v4 = vmax.f32 %v1640_v34, %v1829_v31  ;;  %v6776_v26 = vpop.f32.mrf.mxu0 }
 0x4d3   :  { %8272 = vst [vmem:[#allocation38_spill] sm:$0xff] %v6776_v26 }
 0x4d4   :  { %8270 = vst [vmem:[#allocation36_spill] sm:$0xff] %v6768_v4  ;;  %5091 = vmatmul.msk.f32.gmra.mxu3 %vm324_vm5, %v6750_v41 }
 0x4d7   :  { %v6774_v43 = vpop.f32.mrf.mxu3 }
 0x4d8   :  { %8271 = vst [vmem:[#allocation37_spill] sm:$0xff] %v6774_v43 }
 0x4da   :  { %v8366_v8 = vld [vmem:[#allocation38_spill] sm:$0xff] }
 0x4df   :  { %v2472_v39 = vpop.f32.mrf.mxu3 }
 0x4e0   :  { %v2496_v58 = vmax.f32 %v2472_v39, 0.0 }
 0x4e7   :  { %v2475_v59 = vpop.f32.mrf.mxu3 }
 0x4e8   :  { %v2497_v26 = vmax.f32 %v2475_v59, 0.0 }
 0x4ea   :  { %v2504_v37 = vpack.c.bf16 %v2497_v26, %v2496_v58 }
 0x4ef   :  { %v2478_v54 = vpop.f32.mrf.mxu3 }
 0x4f0   :  { %v2498_v42 = vmax.f32 %v2478_v54, 0.0 }
 0x4f7   :  { %v2481_v16 = vpop.f32.mrf.mxu3 }
 0x4f8   :  { %v2499_v44 = vmax.f32 %v2481_v16, 0.0 }
 0x4fa   :  { %v2505_v48 = vpack.c.bf16 %v2499_v44, %v2498_v42 }
 0x4ff   :  { %v2484_v13 = vpop.f32.mrf.mxu3 }
 0x500   :  { %v2500_v2 = vmax.f32 %v2484_v13, 0.0 }
 0x503   :  { %v2980_v17 = vpop.f32.mrf.mxu0 }
 0x507   :  { %v2487_v24 = vpop.f32.mrf.mxu3 }
 0x508   :  { %v2501_v1 = vmax.f32 %v2487_v24, 0.0 }
 0x50a   :  { %v2506_v4 = vpack.c.bf16 %v2501_v1, %v2500_v2 }
 0x50b   :  { %v2983_v34 = vpop.f32.mrf.mxu0 }
 0x50c   :  { %v3005_v39 = vmax.f32 %v2983_v34, 0.0 }
 0x50f   :  { %v2490_v63 = vpop.f32.mrf.mxu3 }
 0x510   :  { %v2502_v14 = vmax.f32 %v2490_v63, 0.0 }
 0x513   :  { %v2986_v23 = vpop.f32.mrf.mxu0 }
 0x514   :  { %v3006_v59 = vmax.f32 %v2986_v23, 0.0 }
 0x517   :  { %v2493_v31 = vpop.f32.mrf.mxu3 }
 0x518   :  { %v2503_v62 = vmax.f32 %v2493_v31, 0.0 }
 0x51a   :  { %v2507_v33 = vpack.c.bf16 %v2503_v62, %v2502_v14 }
 0x51b   :  { %v2989_v19 = vpop.f32.mrf.mxu0 }
 0x51c   :  { %2512 = vmatpush.bf16.msra.mxu1 %v2507_v33  ;;  %v3007_v58 = vmax.f32 %v2989_v19, 0.0  ;;  %v6792_v19 = vld [vmem:[%s8139_s2] sm:$0xff] }
 0x51f   :  { %v2726_v43 = vpop.f32.mrf.mxu3 }
 0x520   :  { %2513 = vmatpush.bf16.msra.mxu1 %v2506_v4 }
 0x523   :  { %v2992_v25 = vpop.f32.mrf.mxu0 }
 0x524   :  { %2514 = vmatpush.bf16.msra.mxu1 %v2505_v48  ;;  %v3008_v42 = vmax.f32 %v2992_v25, 0.0 }
 0x527   :  { %v2729_v40 = vpop.f32.mrf.mxu3 }
 0x528   :  { %2515 = vmatpush.bf16.msra.mxu1 %v2504_v37  ;;  %v3013_v37 = vpack.c.bf16 %v3007_v58, %v3006_v59  ;;  %v3207_v58 = vrot.slane %v6089_v3, 1 }
 0x52b   :  { %5067 = vmatmul.msk.bf16.vlgmr.msra.gmra.mxu1 %vm486_vm6, %v6280_v56  ;;  %v2995_v62 = vpop.f32.mrf.mxu0  ;;  %v3004_v56 = vmax.f32 %v2980_v17, 0.0 }
 0x52c   :  { %v3009_v4 = vmax.f32 %v2995_v62, 0.0 }
 0x52d   :  { %v3012_v25 = vpack.c.bf16 %v3005_v39, %v3004_v56 }
 0x52e   :  { %v3014_v44 = vpack.c.bf16 %v3009_v4, %v3008_v42  ;;  %v2750_v4 = vmax.f32 %v2726_v43, 0.0  ;;  %v3203_v43 = vrot.slane %v6546_v6, 3 }
 0x52f   :  { %v2732_v63 = vpop.f32.mrf.mxu3 }
 0x533   :  { %v2998_v16 = vpop.f32.mrf.mxu0 }
 0x534   :  { %v3010_v1 = vmax.f32 %v2998_v16, 0.0  ;;  %v6799_v16 = vld [vmem:[%s8139_s2 + $0x18] sm:$0xff] }
 0x537   :  { %v2735_v14 = vpop.f32.mrf.mxu3 }
 0x53b   :  { %5068 = vmatmul.msk.bf16.gmra.mxu1 %vm486_vm6, %v6291_v5  ;;  %v3001_v2 = vpop.f32.mrf.mxu0  ;;  %v6785_v5 = vld [vmem:[%s8139_s2 + $0x10] sm:$0xff] }
 0x53c   :  { %v3011_v48 = vmax.f32 %v3001_v2, 0.0  ;;  %v2753_v2 = vmax.f32 %v2735_v14, 0.0  ;;  %v3205_v14 = vrot.slane %v6103_v11, 2 }
 0x53e   :  { %v3015_v26 = vpack.c.bf16 %v3011_v48, %v3010_v1  ;;  %v2752_v1 = vmax.f32 %v2732_v63, 0.0  ;;  %v2751_v48 = vmax.f32 %v2729_v40, 0.0  ;;  %v6813_v63 = vld [vmem:[%s8139_s2 + $0x20] sm:$0xff]  ;;  %v3201_v40 = vrot.slane %v6536_v55, 4 }
 0x53f   :  { %v2738_v54 = vpop.f32.mrf.mxu3 }
 0x540   :  { %3020 = vmatpush.bf16.msrb.mxu0 %v3015_v26  ;;  %v2754_v17 = vmax.f32 %v2738_v54, 0.0  ;;  %v2759_v26 = vpack.c.bf16 %v2753_v2, %v2752_v1  ;;  %v6806_v54 = vld [vmem:[%s8139_s2 + $0x8] sm:$0xff]  ;;  %v2758_v59 = vpack.c.bf16 %v2751_v48, %v2750_v4  ;;  %v6904_v1 = vld [vmem:[%s8139_s2 + $0x40] sm:$0xff] }
 0x541   :  { %8276 = vst [vmem:[#allocation40_spill] sm:$0xff] %v6904_v1 }
 0x544   :  { %3021 = vmatpush.bf16.msrb.mxu0 %v3014_v44  ;;  %v3209_v44 = vsel %vm27_vm15, %v3201_v40, %v3203_v43 }
 0x547   :  { %v2741_v33 = vpop.f32.mrf.mxu3 }
 0x548   :  { %3022 = vmatpush.bf16.msrb.mxu0 %v3013_v37  ;;  %v2755_v34 = vmax.f32 %v2741_v33, 0.0  ;;  %v3210_v33 = vsel %vm316_vm0, %v3209_v44, %v3205_v14  ;;  %v6851_v37 = vpop.f32.mrf.mxu1  ;;  %v2597_v14 = vld [vmem:[#allocation2] sm:$0xff] }
 0x54a   :  { %v2760_v42 = vpack.c.bf16 %v2755_v34, %v2754_v17  ;;  %v6883_v34 = vld [vmem:[%s8139_s2 + $0x38] sm:$0xff] }
 0x54b   :  { %5069 = vmatmul.msk.bf16.gmra.mxu1 %vm486_vm6, %v6785_v5 }
 0x54c   :  { %3023 = vmatpush.bf16.msrb.mxu0 %v3012_v25 }
 0x54f   :  { %v2744_v13 = vpop.f32.mrf.mxu3  ;;  %5117 = vmatmul.msk.bf16.vlgmr.msrb.gmra.mxu0 %vm486_vm6, %v6792_v19 }
 0x550   :  { %v2756_v23 = vmax.f32 %v2744_v13, 0.0  ;;  %v8273_v13 = vld [vmem:[#allocation21_spill] sm:$0xff] }
 0x551   :  { %8274 = vst [vmem:[#allocation21_spill] sm:$0xff] %v6883_v34 }
 0x557   :  { %v2747_v24 = vpop.f32.mrf.mxu3 }
 0x558   :  { %v2757_v31 = vmax.f32 %v2747_v24, 0.0 }
 0x55a   :  { %v2761_v62 = vpack.c.bf16 %v2757_v31, %v2756_v23  ;;  %v6868_v23 = vld [vmem:[%s8139_s2 + $0x30] sm:$0xff] }
 0x55b   :  { %5070 = vmatmul.msk.bf16.gmra.mxu1 %vm486_vm6, %v6799_v16 }
 0x55c   :  { %2766 = vmatpush.bf16.msrb.mxu3 %v2761_v62 }
 0x55f   :  { %5118 = vmatmul.msk.bf16.gmra.mxu0 %vm486_vm6, %v6806_v54 }
 0x560   :  { %2767 = vmatpush.bf16.msrb.mxu3 %v2760_v42 }
 0x564   :  { %2768 = vmatpush.bf16.msrb.mxu3 %v2759_v26 }
 0x568   :  { %2769 = vmatpush.bf16.msrb.mxu3 %v2758_v59  ;;  %v6927_v59 = vld [vmem:[%s8139_s2 + $0x48] sm:$0xff] }
 0x569   :  { %8279 = vst [vmem:[#allocation43_spill] sm:$0xff] %v6927_v59 }
 0x56b   :  { %5071 = vmatmul.msk.bf16.gmra.mxu1 %vm486_vm6, %v6813_v63  ;;  %5092 = vmatmul.msk.bf16.vlgmr.msrb.gmra.mxu3 %vm486_vm6, %v6792_v19 }
 0x56f   :  { %5119 = vmatmul.msk.bf16.gmra.mxu0 %vm486_vm6, %v6785_v5 }
 0x57b   :  { %5072 = vmatmul.msk.bf16.gmra.mxu1 %vm486_vm6, %v6370_v61  ;;  %5093 = vmatmul.msk.bf16.gmra.mxu3 %vm486_vm6, %v6806_v54 }
 0x57f   :  { %5120 = vmatmul.msk.bf16.gmra.mxu0 %vm486_vm6, %v6799_v16 }
 0x58b   :  { %5073 = vmatmul.msk.bf16.gmra.mxu1 %vm486_vm6, %v6339_v52  ;;  %5094 = vmatmul.msk.bf16.gmra.mxu3 %vm486_vm6, %v6785_v5  ;;  %v3211_v52 = vsel %vm318_vm1, %v3210_v33, %v3207_v58 }
 0x58c   :  { %v3212_v56 = vsel %vm320_vm2, %v3211_v52, %v6093_v18 }
 0x58d   :  { %v3213_v39 = vsel %vm322_vm3, %v3212_v56, 1.0 }
 0x58e   :  { %5278 = vmatpush.msk.msra.mxu2 %vm349_vm4, %v3213_v39  ;;  %5133 = vmatpush.msk.msrb.mxu1 %vm349_vm4, %v3213_v39 }
 0x58f   :  { %5121 = vmatmul.msk.bf16.gmra.mxu0 %vm486_vm6, %v6813_v63  ;;  %5135 = vmatmul.msk.f32.vlgmr.msra.gmra.mxu2 %vm324_vm5, %v6664_v29 }
 0x597   :  { %5136 = vmatmul.msk.f32.gmra.mxu2 %vm324_vm5, %v6677_v9 }
 0x59b   :  { %5074 = vmatmul.msk.bf16.gmra.mxu1 %vm486_vm6, %v6350_v45  ;;  %5095 = vmatmul.msk.bf16.gmra.mxu3 %vm486_vm6, %v6799_v16 }
 0x59f   :  { %5122 = vmatmul.msk.bf16.gmra.mxu0 %vm486_vm6, %v6370_v61  ;;  %5137 = vmatmul.msk.f32.gmra.mxu2 %vm324_vm5, %v6694_v20 }
 0x5a7   :  { %5138 = vmatmul.msk.f32.gmra.mxu2 %vm324_vm5, %v6709_v15 }
 0x5a8   :  { %v2517_v25 = vpop.f32.mrf.mxu1 }
 0x5a9   :  { %v2629_v58 = vmax.f32 %v2597_v14, %v2517_v25 }
 0x5ab   :  { %5075 = vmatmul.msk.bf16.gmra.mxu1 %vm486_vm6, %v8273_v13  ;;  %5096 = vmatmul.msk.bf16.gmra.mxu3 %vm486_vm6, %v6813_v63  ;;  %v6952_v13 = vld [vmem:[%s8139_s2 + $0x50] sm:$0xff] }
 0x5ac   :  { %8284 = vst [vmem:[#allocation48_spill] sm:$0xff] %v6952_v13 }
 0x5af   :  { %5123 = vmatmul.msk.bf16.gmra.mxu0 %vm486_vm6, %v6868_v23  ;;  %5139 = vmatmul.msk.f32.gmra.mxu2 %vm324_vm5, %v6722_v51 }
 0x5b0   :  { %v2519_v45 = vpop.f32.mrf.mxu1 }
 0x5b7   :  { %5140 = vmatmul.msk.f32.gmra.mxu2 %vm324_vm5, %v6737_v28 }
 0x5b8   :  { %v2522_v24 = vpop.f32.mrf.mxu1 }
 0x5bb   :  { %5076 = vmatmul.msk.bf16.gmra.mxu1 %vm486_vm6, %v6379_v10  ;;  %5097 = vmatmul.msk.bf16.gmra.mxu3 %vm486_vm6, %v6370_v61  ;;  %v6895_v61 = vpop.f32.mrf.mxu2 }
 0x5bf   :  { %5124 = vmatmul.msk.bf16.gmra.mxu0 %vm486_vm6, %v6883_v34  ;;  %5141 = vmatmul.msk.f32.gmra.mxu2 %vm324_vm5, %v6750_v41 }
 0x5c0   :  { %v2524_v17 = vpop.f32.mrf.mxu1 }
 0x5c3   :  { %v6908_v2 = vpop.f32.mrf.mxu2 }
 0x5c8   :  { %v6887_v31 = vpop.f32.mrf.mxu1 }
 0x5cb   :  { %5077 = vmatmul.msk.bf16.gmra.mxu1 %vm486_vm6, %v6392_v57  ;;  %5098 = vmatmul.msk.bf16.gmra.mxu3 %vm486_vm6, %v6868_v23  ;;  %v6922_v26 = vpop.f32.mrf.mxu2 }
 0x5cc   :  { %v6899_v62 = vpop.f32.mrf.mxu0 }
 0x5cd   :  { %8275 = vst [vmem:[#allocation39_spill] sm:$0xff] %v6899_v62  ;;  %v2599_v62 = vld [vmem:[#allocation2 + $0x10] sm:$0xff] }
 0x5cf   :  { %5125 = vmatmul.msk.bf16.gmra.mxu0 %vm486_vm6, %v6904_v1 }
 0x5d0   :  { %v6897_v10 = vpop.f32.mrf.mxu1 }
 0x5d3   :  { %v6935_v43 = vpop.f32.mrf.mxu2 }
 0x5d4   :  { %v6912_v42 = vpop.f32.mrf.mxu0 }
 0x5d5   :  { %8277 = vst [vmem:[#allocation41_spill] sm:$0xff] %v6912_v42 }
 0x5d8   :  { %v6910_v57 = vpop.f32.mrf.mxu1 }
 0x5db   :  { %5078 = vmatmul.msk.bf16.gmra.mxu1 %vm486_vm6, %v6405_v12  ;;  %5099 = vmatmul.msk.bf16.gmra.mxu3 %vm486_vm6, %v6883_v34  ;;  %v6956_v25 = vpop.f32.mrf.mxu2 }
 0x5dc   :  { %v6920_v48 = vpop.f32.mrf.mxu0 }
 0x5dd   :  { %8278 = vst [vmem:[#allocation42_spill] sm:$0xff] %v6920_v48 }
 0x5df   :  { %5126 = vmatmul.msk.bf16.gmra.mxu0 %vm486_vm6, %v6927_v59 }
 0x5e0   :  { %v6918_v4 = vpop.f32.mrf.mxu1 }
 0x5e4   :  { %v6933_v12 = vpop.f32.mrf.mxu0 }
 0x5e5   :  { %8281 = vst [vmem:[#allocation45_spill] sm:$0xff] %v6933_v12 }
 0x5e8   :  { %v6931_v40 = vpop.f32.mrf.mxu1 }
 0x5e9   :  { %8280 = vst [vmem:[#allocation44_spill] sm:$0xff] %v6931_v40 }
 0x5eb   :  { %5079 = vmatmul.msk.bf16.gmra.mxu1 %vm486_vm6, %v6436_v35  ;;  %5100 = vmatmul.msk.bf16.gmra.mxu3 %vm486_vm6, %v6904_v1  ;;  %v2598_v35 = vld [vmem:[#allocation2 + $0x8] sm:$0xff] }
 0x5ec   :  { %v6945_v56 = vpop.f32.mrf.mxu0  ;;  %v2630_v14 = vmax.f32 %v2598_v35, %v2519_v45  ;;  %v6970_v45 = vpop.f32.mrf.mxu2 }
 0x5ee   :  { %v2771_v44 = vpop.f32.mrf.mxu3 }
 0x5ef   :  { %v6941_v33 = vmax.f32 %v2629_v58, %v2771_v44  ;;  %5127 = vmatmul.msk.bf16.gmra.mxu0 %vm486_vm6, %v6952_v13 }
 0x5f0   :  { %v6943_v52 = vpop.f32.mrf.mxu1 }
 0x5f1   :  { %8282 = vst [vmem:[#allocation46_spill] sm:$0xff] %v6941_v33  ;;  %v2631_v33 = vmax.f32 %v2599_v62, %v2522_v24  ;;  %v2600_v24 = vld [vmem:[#allocation2 + $0x18] sm:$0xff] }
 0x5f2   :  { %8283 = vst [vmem:[#allocation47_spill] sm:$0xff] %v6943_v52  ;;  %v2632_v62 = vmax.f32 %v2600_v24, %v2524_v17  ;;  %v3455_v17 = vrot.slane %v6536_v55, 5  ;;  %v2601_v24 = vld [vmem:[#allocation2 + $0x20] sm:$0xff] }
 0x5f4   :  { %v6962_v40 = vpop.f32.mrf.mxu0  ;;  %v6995_v48 = vpop.f32.mrf.mxu2 }
 0x5f5   :  { %8287 = vst [vmem:[#allocation51_spill] sm:$0xff] %v6962_v40 }
 0x5f6   :  { %v2773_v58 = vpop.f32.mrf.mxu3 }
 0x5f7   :  { %v6958_v44 = vmax.f32 %v2630_v14, %v2773_v58 }
 0x5f8   :  { %v6960_v52 = vpop.f32.mrf.mxu1 }
 0x5f9   :  { %8285 = vst [vmem:[#allocation49_spill] sm:$0xff] %v6958_v44 }
 0x5fa   :  { %8286 = vst [vmem:[#allocation50_spill] sm:$0xff] %v6960_v52 }
 0x5fb   :  { %5080 = vmatmul.msk.bf16.gmra.mxu1 %vm486_vm6, %v6449_v22  ;;  %5101 = vmatmul.msk.bf16.gmra.mxu3 %vm486_vm6, %v6927_v59  ;;  %v6983_v22 = vld [vmem:[%s8139_s2 + $0x58] sm:$0xff] }
 0x5fc   :  { %v6976_v58 = vpop.f32.mrf.mxu0  ;;  %8291 = vst [vmem:[#allocation55_spill] sm:$0xff] %v6983_v22 }
 0x5fd   :  { %8290 = vst [vmem:[#allocation54_spill] sm:$0xff] %v6976_v58 }
 0x5fe   :  { %v2776_v1 = vpop.f32.mrf.mxu3 }
 0x5ff   :  { %v6972_v35 = vmax.f32 %v2631_v33, %v2776_v1  ;;  %5128 = vmatmul.msk.bf16.gmra.mxu0 %vm486_vm6, %v6983_v22 }
 0x600   :  { %v6974_v14 = vpop.f32.mrf.mxu1 }
 0x601   :  { %8288 = vst [vmem:[#allocation52_spill] sm:$0xff] %v6972_v35  ;;  %v3461_v35 = vrot.slane %v6089_v3, 2 }
 0x602   :  { %8289 = vst [vmem:[#allocation53_spill] sm:$0xff] %v6974_v14 }
 0x604   :  { %v6991_v14 = vpop.f32.mrf.mxu0 }
 0x605   :  { %8294 = vst [vmem:[#allocation58_spill] sm:$0xff] %v6991_v14  ;;  %v7120_v14 = vld [vmem:[%s8139_s2 + $0x78] sm:$0xff] }
 0x606   :  { %v2778_v52 = vpop.f32.mrf.mxu3 }
 0x607   :  { %v6987_v1 = vmax.f32 %v2632_v62, %v2778_v52  ;;  %v3457_v52 = vrot.slane %v6546_v6, 4  ;;  %v3459_v62 = vrot.slane %v6103_v11, 3 }
 0x608   :  { %v6989_v33 = vpop.f32.mrf.mxu1 }
 0x609   :  { %8292 = vst [vmem:[#allocation56_spill] sm:$0xff] %v6987_v1  ;;  %v3465_v39 = vsel %vm27_vm15, %v3455_v17, %v3457_v52  ;;  %v3463_v1 = vrot.slane %v6093_v18, 1 }
 0x60a   :  { %8293 = vst [vmem:[#allocation57_spill] sm:$0xff] %v6989_v33  ;;  %v2633_v33 = vmax.f32 %v2601_v24, %v6887_v31  ;;  %v2604_v31 = vld [vmem:[#allocation2 + $0x38] sm:$0xff] }
 0x60b   :  { %5081 = vmatmul.msk.bf16.gmra.mxu1 %vm486_vm6, %v6468_v32  ;;  %5102 = vmatmul.msk.bf16.gmra.mxu3 %vm486_vm6, %v6952_v13  ;;  %v3466_v32 = vsel %vm316_vm0, %v3465_v39, %v3459_v62  ;;  %v7028_v39 = vpop.f32.mrf.mxu2  ;;  %v2603_v62 = vld [vmem:[#allocation2 + $0x30] sm:$0xff] }
 0x60c   :  { %v3467_v13 = vsel %vm318_vm1, %v3466_v32, %v3461_v35  ;;  %v7015_v34 = vpop.f32.mrf.mxu0 }
 0x60d   :  { %v3468_v44 = vsel %vm320_vm2, %v3467_v13, %v3463_v1  ;;  %8296 = vst [vmem:[#allocation60_spill] sm:$0xff] %v7015_v34  ;;  %v2602_v13 = vld [vmem:[#allocation2 + $0x28] sm:$0xff] }
 0x60e   :  { %v2781_v12 = vpop.f32.mrf.mxu3  ;;  %v3469_v17 = vsel %vm322_vm3, %v3468_v44, 1.0  ;;  %v2634_v35 = vmax.f32 %v2602_v13, %v6897_v10  ;;  %v2635_v10 = vmax.f32 %v2603_v62, %v6910_v57  ;;  %v2636_v62 = vmax.f32 %v2604_v31, %v6918_v4 }
 0x60f   :  { %v7009_v59 = vmax.f32 %v2633_v33, %v2781_v12  ;;  %5158 = vmatpush.msk.msra.mxu1 %vm349_vm4, %v3469_v17  ;;  %v7024_v12 = vld [vmem:[%s8139_s2 + $0x60] sm:$0xff] }
 0x610   :  { %v7012_v42 = vpop.f32.mrf.mxu1  ;;  %8297 = vst [vmem:[#allocation61_spill] sm:$0xff] %v7024_v12  ;;  %5129 = vmatmul.msk.bf16.gmra.mxu0 %vm486_vm6, %v7024_v12 }
 0x611   :  { %8295 = vst [vmem:[#allocation59_spill] sm:$0xff] %v7012_v42 }
 0x613   :  { %v7043_v32 = vpop.f32.mrf.mxu2 }
 0x614   :  { %v7035_v44 = vpop.f32.mrf.mxu0 }
 0x615   :  { %8299 = vst [vmem:[#allocation63_spill] sm:$0xff] %v7035_v44 }
 0x616   :  { %v2783_v1 = vpop.f32.mrf.mxu3 }
 0x617   :  { %v7031_v33 = vmax.f32 %v2634_v35, %v2783_v1 }
 0x618   :  { %v7033_v52 = vpop.f32.mrf.mxu1 }
 0x619   :  { %8298 = vst [vmem:[#allocation62_spill] sm:$0xff] %v7031_v33 }
 0x61b   :  { %5082 = vmatmul.msk.bf16.gmra.mxu1 %vm486_vm6, %v6485_v36  ;;  %5103 = vmatmul.msk.bf16.gmra.mxu3 %vm486_vm6, %v6983_v22  ;;  %v7057_v36 = vld [vmem:[%s8139_s2 + $0x68] sm:$0xff]  ;;  %v7061_v57 = vpop.f32.mrf.mxu2 }
 0x61c   :  { %v7050_v1 = vpop.f32.mrf.mxu0  ;;  %8302 = vst [vmem:[#allocation66_spill] sm:$0xff] %v7057_v36 }
 0x61d   :  { %8301 = vst [vmem:[#allocation65_spill] sm:$0xff] %v7050_v1 }
 0x61e   :  { %v2786_v17 = vpop.f32.mrf.mxu3 }
 0x61f   :  { %v7046_v13 = vmax.f32 %v2635_v10, %v2786_v17 }
 0x620   :  { %v7048_v35 = vpop.f32.mrf.mxu1  ;;  %5130 = vmatmul.msk.bf16.gmra.mxu0 %vm486_vm6, %v7057_v36 }
 0x621   :  { %8300 = vst [vmem:[#allocation64_spill] sm:$0xff] %v7046_v13 }
 0x623   :  { %v7076_v44 = vpop.f32.mrf.mxu2 }
 0x624   :  { %v7068_v1 = vpop.f32.mrf.mxu0 }
 0x625   :  { %8304 = vst [vmem:[#allocation68_spill] sm:$0xff] %v7068_v1 }
 0x626   :  { %v2788_v10 = vpop.f32.mrf.mxu3 }
 0x627   :  { %v7064_v17 = vmax.f32 %v2636_v62, %v2788_v10  ;;  %v7091_v10 = vld [vmem:[%s8139_s2 + $0x70] sm:$0xff] }
 0x628   :  { %v7066_v42 = vpop.f32.mrf.mxu1  ;;  %8308 = vst [vmem:[#allocation72_spill] sm:$0xff] %v7091_v10 }
 0x629   :  { %8303 = vst [vmem:[#allocation67_spill] sm:$0xff] %v7064_v17 }
 0x62b   :  { %5104 = vmatmul.msk.bf16.gmra.mxu3 %vm486_vm6, %v7024_v12  ;;  %5134 = vmatmul.msk.f32.vlgmr.msrb.gmra.mxu1 %vm324_vm5, %v6649_v0  ;;  %v3246_v24 = vpop.f32.mrf.mxu2 }
 0x62c   :  { %v7082_v31 = vpop.f32.mrf.mxu0 }
 0x62d   :  { %8307 = vst [vmem:[#allocation71_spill] sm:$0xff] %v7082_v31 }
 0x62e   :  { %v7078_v34 = vpop.f32.mrf.mxu3 }
 0x62f   :  { %8305 = vst [vmem:[#allocation69_spill] sm:$0xff] %v7078_v34 }
 0x630   :  { %v7080_v4 = vpop.f32.mrf.mxu1  ;;  %5131 = vmatmul.msk.bf16.gmra.mxu0 %vm486_vm6, %v7091_v10 }
 0x631   :  { %8306 = vst [vmem:[#allocation70_spill] sm:$0xff] %v7080_v4 }
 0x633   :  { %5159 = vmatmul.msk.f32.vlgmr.msra.gmra.mxu1 %vm324_vm5, %v6649_v0  ;;  %v3249_v62 = vpop.f32.mrf.mxu2 }
 0x634   :  { %v7099_v31 = vpop.f32.mrf.mxu0 }
 0x635   :  { %8310 = vst [vmem:[#allocation74_spill] sm:$0xff] %v7099_v31  ;;  %v3711_v31 = vrot.slane %v6536_v55, 6  ;;  %v3719_v55 = vrot.slane %v6093_v18, 2 }
 0x636   :  { %v7095_v1 = vpop.f32.mrf.mxu3 }
 0x637   :  { %8309 = vst [vmem:[#allocation73_spill] sm:$0xff] %v7095_v1  ;;  %v3717_v1 = vrot.slane %v6089_v3, 3 }
 0x638   :  { %v7097_v12 = vpop.f32.mrf.mxu1 }
 0x63b   :  { %5105 = vmatmul.msk.bf16.gmra.mxu3 %vm486_vm6, %v7057_v36  ;;  %5160 = vmatmul.msk.f32.gmra.mxu1 %vm324_vm5, %v6664_v29  ;;  %v3713_v36 = vrot.slane %v6546_v6, 5 }
 0x63c   :  { %v7109_v34 = vpop.f32.mrf.mxu0 }
 0x63d   :  { %8313 = vst [vmem:[#allocation77_spill] sm:$0xff] %v7109_v34  ;;  %v3715_v34 = vrot.slane %v6103_v11, 4 }
 0x63e   :  { %v7105_v4 = vpop.f32.mrf.mxu3 }
 0x63f   :  { %8311 = vst [vmem:[#allocation75_spill] sm:$0xff] %v7105_v4  ;;  %v3252_v4 = vpop.f32.mrf.mxu2 }
 0x640   :  { %v7107_v60 = vpop.f32.mrf.mxu1  ;;  %5132 = vmatmul.msk.bf16.gmra.mxu0 %vm486_vm6, %v7120_v14 }
 0x641   :  { %8312 = vst [vmem:[#allocation76_spill] sm:$0xff] %v7107_v60  ;;  %v3721_v60 = vsel %vm27_vm15, %v3711_v31, %v3713_v36 }
 0x642   :  { %v3722_v17 = vsel %vm316_vm0, %v3721_v60, %v3715_v34  ;;  %v3264_v60 = vmax.f32 %v3252_v4, 0.0  ;;  %v3260_v4 = vmax.f32 %v7061_v57, 0.0 }
 0x643   :  { %5161 = vmatmul.msk.f32.gmra.mxu1 %vm324_vm5, %v6677_v9  ;;  %v3723_v58 = vsel %vm318_vm1, %v3722_v17, %v3717_v1 }
 0x644   :  { %v3724_v22 = vsel %vm320_vm2, %v3723_v58, %v3719_v55  ;;  %v7135_v40 = vpop.f32.mrf.mxu0  ;;  %v3262_v55 = vmax.f32 %v3246_v24, 0.0  ;;  %v3261_v24 = vmax.f32 %v7076_v44, 0.0 }
 0x645   :  { %8314 = vst [vmem:[#allocation78_spill] sm:$0xff] %v7135_v40  ;;  %v3725_v33 = vsel %vm322_vm3, %v3724_v22, 1.0  ;;  %v3969_v40 = vrot.slane %v6103_v11, 5 }
 0x646   :  { %v7127_v38 = vpop.f32.mrf.mxu3  ;;  %5183 = vmatpush.msk.msra.mxu3 %vm349_vm4, %v3725_v33  ;;  %v3967_v33 = vrot.slane %v6546_v6, 6  ;;  %v3267_v57 = vpack.c.bf16 %v3261_v24, %v3260_v4 }
 0x647   :  { %v3255_v36 = vpop.f32.mrf.mxu2 }
 0x648   :  { %v7132_v13 = vpop.f32.mrf.mxu1  ;;  %v3265_v34 = vmax.f32 %v3255_v36, 0.0  ;;  %v3971_v36 = vrot.slane %v6089_v3, 4  ;;  %v2134_v3 = vmax.f32 %v6580_v27, %v6557_v47 }
 0x64a   :  { %v3269_v17 = vpack.c.bf16 %v3265_v34, %v3264_v60  ;;  %v8317_v60 = vld [vmem:[#allocation14_spill] sm:$0xff] }
 0x64b   :  { %5106 = vmatmul.msk.bf16.gmra.mxu3 %vm486_vm6, %v7091_v10  ;;  %5162 = vmatmul.msk.f32.gmra.mxu1 %vm324_vm5, %v6694_v20  ;;  %v3263_v10 = vmax.f32 %v3249_v62, 0.0  ;;  %v3975_v34 = vsel %vm27_vm15, %v8317_v60, %v3967_v33 }
 0x64c   :  { %v7147_v58 = vpop.f32.mrf.mxu0  ;;  %3274 = vmatpush.bf16.msrb.mxu2 %v3269_v17  ;;  %v3976_v22 = vsel %vm316_vm0, %v3975_v34, %v3969_v40  ;;  %v2389_v40 = vmax.f32 %v2134_v3, %v6569_v21  ;;  %v1603_v21 = vld [vmem:[#allocation2 + $0xc8] sm:$0xff]  ;;  %v8322_v3 = vld [vmem:[#allocation23_spill] sm:$0xff] }
 0x64d   :  { %v3268_v6 = vpack.c.bf16 %v3263_v10, %v3262_v55  ;;  %v3977_v11 = vsel %vm318_vm1, %v3976_v22, %v3971_v36  ;;  %v1635_v55 = vmax.f32 %v1603_v21, %v6702_v7  ;;  %v8320_v7 = vld [vmem:[#allocation5_spill] sm:$0xff]  ;;  %v8326_v21 = vld [vmem:[#allocation26_spill] sm:$0xff] }
 0x64e   :  { %v7143_v1 = vpop.f32.mrf.mxu3  ;;  %v2643_v47 = vmax.f32 %v2389_v40, %v7033_v52  ;;  %v2644_v52 = vmax.f32 %v6588_v50, %v7048_v35  ;;  %v8342_v22 = vld [vmem:[#allocation34_spill] sm:$0xff] }
 0x64f   :  { %8315 = vst [vmem:[#allocation79_spill] sm:$0xff] %v7143_v1  ;;  %v3973_v1 = vrot.slane %v6093_v18, 3  ;;  %v1891_v36 = vmax.f32 %v1635_v55, %v6683_v30 }
 0x650   :  { %v7145_v31 = vpop.f32.mrf.mxu1  ;;  %3275 = vmatpush.bf16.msrb.mxu2 %v3268_v6 }
 0x651   :  { %8316 = vst [vmem:[#allocation80_spill] sm:$0xff] %v7145_v31  ;;  %v3978_v17 = vsel %vm320_vm2, %v3977_v11, %v3973_v1  ;;  %v8321_v11 = vmax.f32 %v6590_v46, %v8320_v7  ;;  %v8329_v7 = vld [vmem:[#allocation10_spill] sm:$0xff] }
 0x652   :  { %v3979_v33 = vsel %vm322_vm3, %v3978_v17, 1.0 }
 0x653   :  { %5163 = vmatmul.msk.f32.gmra.mxu1 %vm324_vm5, %v6709_v15  ;;  %5208 = vmatpush.msk.msra.mxu0 %vm349_vm4, %v3979_v33  ;;  %v2391_v17 = vmax.f32 %v8321_v11, %v6582_v53  ;;  %v8330_v11 = vld [vmem:[#allocation6_spill] sm:$0xff] }
 0x654   :  { %v7171_v18 = vpop.f32.mrf.mxu0  ;;  %5209 = vmatmul.msk.f32.vlgmr.msra.gmra.mxu0 %vm324_vm5, %v6649_v0  ;;  %3276 = vmatpush.bf16.msrb.mxu2 %v3267_v57  ;;  %v2145_v57 = vmax.f32 %v1891_v36, %v8322_v3  ;;  %v8328_v36 = vld [vmem:[#allocation7_spill] sm:$0xff] }
 0x655   :  { %v2645_v50 = vmax.f32 %v2391_v17, %v7066_v42  ;;  %v8325_v42 = vld [vmem:[#allocation29_spill] sm:$0xff]  ;;  %v8331_v17 = vmax.f32 %v8329_v7, %v8330_v11  ;;  %v8336_v11 = vld [vmem:[#allocation32_spill] sm:$0xff] }
 0x656   :  { %v7163_v62 = vpop.f32.mrf.mxu3  ;;  %v7217_v35 = vmax.f32 %v2145_v57, %v6908_v2  ;;  %v8332_v57 = vld [vmem:[#allocation28_spill] sm:$0xff] }
 0x657   :  { %v2393_v3 = vmax.f32 %v8331_v17, %v8328_v36 }
 0x658   :  { %v7169_v31 = vpop.f32.mrf.mxu1  ;;  %8323 = vst [vmem:[#allocation5_spill] sm:$0xff] %v7217_v35  ;;  %v8359_v35 = vld [vmem:[#allocation31_spill] sm:$0xff] }
 0x65b   :  { %5107 = vmatmul.msk.bf16.gmra.mxu3 %vm486_vm6, %v7120_v14  ;;  %5164 = vmatmul.msk.f32.gmra.mxu1 %vm324_vm5, %v6722_v51 }
 0x65c   :  { %v7186_v1 = vpop.f32.mrf.mxu0  ;;  %5210 = vmatmul.msk.f32.gmra.mxu0 %vm324_vm5, %v6664_v29 }
 0x65e   :  { %v2806_v27 = vpop.f32.mrf.mxu3 }
 0x65f   :  { %v7182_v44 = vmax.f32 %v2643_v47, %v2806_v27 }
 0x660   :  { %v7184_v10 = vpop.f32.mrf.mxu1 }
 0x661   :  { %8318 = vst [vmem:[#allocation14_spill] sm:$0xff] %v7184_v10  ;;  %v8362_v10 = vld [vmem:[#allocation37_spill] sm:$0xff] }
 0x663   :  { %5165 = vmatmul.msk.f32.gmra.mxu1 %vm324_vm5, %v6737_v28 }
 0x664   :  { %v7202_v24 = vpop.f32.mrf.mxu0  ;;  %5211 = vmatmul.msk.f32.gmra.mxu0 %vm324_vm5, %v6677_v9 }
 0x665   :  { %8319 = vst [vmem:[#allocation81_spill] sm:$0xff] %v7202_v24 }
 0x666   :  { %v2808_v4 = vpop.f32.mrf.mxu3 }
 0x667   :  { %v7198_v34 = vmax.f32 %v2644_v52, %v2808_v4 }
 0x668   :  { %v7200_v6 = vpop.f32.mrf.mxu1 }
 0x66b   :  { %5166 = vmatmul.msk.f32.gmra.mxu1 %vm324_vm5, %v6750_v41  ;;  %5184 = vmatmul.msk.f32.vlgmr.msra.gmra.mxu3 %vm324_vm5, %v6649_v0  ;;  %v1605_v0 = vld [vmem:[#allocation2 + $0xd8] sm:$0xff] }
 0x66c   :  { %v7223_v46 = vpop.f32.mrf.mxu0  ;;  %5212 = vmatmul.msk.f32.gmra.mxu0 %vm324_vm5, %v6694_v20  ;;  %v1637_v27 = vmax.f32 %v1605_v0, %v8325_v42 }
 0x66e   :  { %v2811_v30 = vpop.f32.mrf.mxu3  ;;  %v1893_v55 = vmax.f32 %v1637_v27, %v8326_v21 }
 0x66f   :  { %v7219_v33 = vmax.f32 %v2645_v50, %v2811_v30 }
 0x670   :  { %v7221_v40 = vpop.f32.mrf.mxu1  ;;  %v2147_v50 = vmax.f32 %v1893_v55, %v8332_v57 }
 0x671   :  { %8324 = vst [vmem:[#allocation23_spill] sm:$0xff] %v7221_v40 }
 0x672   :  { %v7252_v0 = vmax.f32 %v2147_v50, %v6935_v43  ;;  %v8338_v50 = vld [vmem:[#allocation11_spill] sm:$0xff] }
 0x673   :  { %5185 = vmatmul.msk.f32.gmra.mxu3 %vm324_vm5, %v6664_v29  ;;  %v2647_v29 = vmax.f32 %v2393_v3, %v7097_v12  ;;  %v8335_v12 = vld [vmem:[#allocation33_spill] sm:$0xff] }
 0x674   :  { %v7239_v4 = vpop.f32.mrf.mxu0  ;;  %5213 = vmatmul.msk.f32.gmra.mxu0 %vm324_vm5, %v6709_v15  ;;  %8333 = vst [vmem:[#allocation26_spill] sm:$0xff] %v7252_v0 }
 0x675   :  { %8327 = vst [vmem:[#allocation29_spill] sm:$0xff] %v7239_v4 }
 0x676   :  { %v7234_v2 = vpop.f32.mrf.mxu3 }
 0x678   :  { %v7237_v52 = vpop.f32.mrf.mxu1 }
 0x67b   :  { %5186 = vmatmul.msk.f32.gmra.mxu3 %vm324_vm5, %v6677_v9  ;;  %v1607_v9 = vld [vmem:[#allocation2 + $0xe8] sm:$0xff] }
 0x67c   :  { %v7258_v21 = vpop.f32.mrf.mxu0  ;;  %5214 = vmatmul.msk.f32.gmra.mxu0 %vm324_vm5, %v6722_v51  ;;  %v1639_v7 = vmax.f32 %v1607_v9, %v8335_v12 }
 0x67e   :  { %v2816_v30 = vpop.f32.mrf.mxu3  ;;  %v1895_v17 = vmax.f32 %v1639_v7, %v8336_v11 }
 0x67f   :  { %v7254_v42 = vmax.f32 %v2647_v29, %v2816_v30  ;;  %v8339_v29 = vld [vmem:[#allocation15_spill] sm:$0xff]  ;;  %v8340_v30 = vld [vmem:[#allocation8_spill] sm:$0xff] }
 0x680   :  { %v7256_v27 = vpop.f32.mrf.mxu1  ;;  %v8341_v36 = vmax.f32 %v8339_v29, %v8340_v30  ;;  %v2149_v9 = vmax.f32 %v1895_v17, %v8342_v22 }
 0x681   :  { %8334 = vst [vmem:[#allocation7_spill] sm:$0xff] %v7256_v27 }
 0x682   :  { %v2395_v53 = vmax.f32 %v8341_v36, %v8338_v50  ;;  %v2404_v7 = vmax.f32 %v2149_v9, %v6970_v45  ;;  %v8345_v45 = vld [vmem:[#allocation17_spill] sm:$0xff] }
 0x683   :  { %5187 = vmatmul.msk.f32.gmra.mxu3 %vm324_vm5, %v6694_v20  ;;  %v8347_v36 = vld [vmem:[#allocation13_spill] sm:$0xff] }
 0x684   :  { %v7272_v57 = vpop.f32.mrf.mxu0  ;;  %5215 = vmatmul.msk.f32.gmra.mxu0 %vm324_vm5, %v6737_v28  ;;  %v2649_v20 = vmax.f32 %v2395_v53, %v7132_v13  ;;  %v8346_v53 = vld [vmem:[#allocation19_spill] sm:$0xff] }
 0x685   :  { %8337 = vst [vmem:[#allocation10_spill] sm:$0xff] %v7272_v57  ;;  %v8348_v17 = vmax.f32 %v8346_v53, %v8347_v36  ;;  %v8351_v36 = vld [vmem:[#allocation24_spill] sm:$0xff] }
 0x686   :  { %v7269_v43 = vpop.f32.mrf.mxu3 }
 0x687   :  { %v2397_v50 = vmax.f32 %v8348_v17, %v8345_v45  ;;  %v8352_v17 = vld [vmem:[#allocation20_spill] sm:$0xff] }
 0x688   :  { %v2587_v3 = vpop.f32.mrf.mxu1 }
 0x68b   :  { %5188 = vmatmul.msk.f32.gmra.mxu3 %vm324_vm5, %v6709_v15 }
 0x68c   :  { %5216 = vmatmul.msk.f32.gmra.mxu0 %vm324_vm5, %v6750_v41 }
 0x68d   :  { %v7287_v47 = vpop.f32.mrf.mxu0 }
 0x68e   :  { %v2821_v12 = vpop.f32.mrf.mxu3 }
 0x68f   :  { %v7285_v11 = vmax.f32 %v2649_v20, %v2821_v12 }
 0x690   :  { %v2589_v55 = vpop.f32.mrf.mxu1 }
 0x691   :  { %v2658_v27 = vmax.f32 %v2404_v7, %v2589_v55  ;;  %v2651_v55 = vmax.f32 %v2397_v50, %v7169_v31  ;;  %v8353_v50 = vmax.f32 %v8351_v36, %v8352_v17 }
 0x693   :  { %5189 = vmatmul.msk.f32.gmra.mxu3 %vm324_vm5, %v6722_v51 }
 0x695   :  { %v7297_v22 = vpop.f32.mrf.mxu0 }
 0x696   :  { %v7295_v15 = vpop.f32.mrf.mxu3  ;;  %8344 = vst [vmem:[#allocation28_spill] sm:$0xff] %v7297_v22 }
 0x697   :  { %8343 = vst [vmem:[#allocation6_spill] sm:$0xff] %v7295_v15 }
 0x698   :  { %v2592_v13 = vpop.f32.mrf.mxu1 }
 0x69b   :  { %5190 = vmatmul.msk.f32.gmra.mxu3 %vm324_vm5, %v6737_v28  ;;  %v3259_v28 = vmax.f32 %v7043_v32, 0.0 }
 0x69d   :  { %v7310_v51 = vpop.f32.mrf.mxu0 }
 0x69e   :  { %v2826_v30 = vpop.f32.mrf.mxu3 }
 0x69f   :  { %v7306_v9 = vmax.f32 %v2651_v55, %v2826_v30  ;;  %v2399_v55 = vmax.f32 %v8353_v50, %v6895_v61 }
 0x6a0   :  { %v7308_v20 = vpop.f32.mrf.mxu1 }
 0x6a1   :  { %v2653_v29 = vmax.f32 %v2399_v55, %v7200_v6  ;;  %v8355_v6 = vld [vmem:[#allocation27_spill] sm:$0xff] }
 0x6a3   :  { %5191 = vmatmul.msk.f32.gmra.mxu3 %vm324_vm5, %v6750_v41 }
 0x6a5   :  { %v7318_v53 = vpop.f32.mrf.mxu0 }
 0x6a6   :  { %v7316_v7 = vpop.f32.mrf.mxu3  ;;  %8350 = vst [vmem:[#allocation32_spill] sm:$0xff] %v7318_v53 }
 0x6a7   :  { %8349 = vst [vmem:[#allocation33_spill] sm:$0xff] %v7316_v7 }
 0x6a8   :  { %v3234_v45 = vpop.f32.mrf.mxu1 }
 0x6a9   :  { %v3258_v31 = vmax.f32 %v3234_v45, 0.0 }
 0x6ab   :  { %v3266_v30 = vpack.c.bf16 %v3259_v28, %v3258_v31  ;;  %v8356_v31 = vld [vmem:[#allocation25_spill] sm:$0xff] }
 0x6ad   :  { %3277 = vmatpush.bf16.msrb.mxu2 %v3266_v30  ;;  %v7332_v53 = vpop.f32.mrf.mxu0 }
 0x6ae   :  { %v2831_v12 = vpop.f32.mrf.mxu3 }
 0x6af   :  { %v7326_v0 = vmax.f32 %v2653_v29, %v2831_v12  ;;  %v8357_v29 = vmax.f32 %v8355_v6, %v8356_v31  ;;  %v8360_v6 = vld [vmem:[#allocation30_spill] sm:$0xff] }
 0x6b0   :  { %5142 = vmatmul.msk.bf16.vlgmr.msrb.gmra.mxu2 %vm486_vm6, %v6792_v19  ;;  %v7330_v41 = vpop.f32.mrf.mxu1 }
 0x6b1   :  { %v2401_v12 = vmax.f32 %v8357_v29, %v6922_v26  ;;  %v8361_v26 = vmax.f32 %v8359_v35, %v8360_v6 }
 0x6b3   :  { %v2655_v36 = vmax.f32 %v2401_v12, %v7237_v52  ;;  %v2403_v31 = vmax.f32 %v8361_v26, %v6956_v25  ;;  %v8363_v26 = vld [vmem:[#allocation36_spill] sm:$0xff] }
 0x6b5   :  { %v3097_v28 = vpop.f32.mrf.mxu0  ;;  %v2657_v52 = vmax.f32 %v2403_v31, %v2587_v3  ;;  %v8364_v31 = vld [vmem:[#allocation35_spill] sm:$0xff] }
 0x6b6   :  { %v7336_v45 = vpop.f32.mrf.mxu3 }
 0x6b7   :  { %8354 = vst [vmem:[#allocation11_spill] sm:$0xff] %v7336_v45  ;;  %v1609_v45 = vld [vmem:[#allocation2 + $0xf8] sm:$0xff] }
 0x6b8   :  { %v7338_v61 = vpop.f32.mrf.mxu1  ;;  %v1641_v49 = vmax.f32 %v1609_v45, %v8362_v10 }
 0x6ba   :  { %v1897_v6 = vmax.f32 %v1641_v49, %v6851_v37 }
 0x6bc   :  { %v2151_v15 = vmax.f32 %v1897_v6, %v8366_v8 }
 0x6bd   :  { %v3100_v32 = vpop.f32.mrf.mxu0 }
 0x6be   :  { %v2836_v17 = vpop.f32.mrf.mxu3 }
 0x6bf   :  { %v7345_v50 = vmax.f32 %v2655_v36, %v2836_v17 }
 0x6c0   :  { %5143 = vmatmul.msk.bf16.gmra.mxu2 %vm486_vm6, %v6806_v54  ;;  %v3496_v55 = vpop.f32.mrf.mxu1 }
 0x6c5   :  { %v3102_v12 = vpop.f32.mrf.mxu0 }
 0x6c6   :  { %v7351_v22 = vpop.f32.mrf.mxu3 }
 0x6c7   :  { %8358 = vst [vmem:[#allocation15_spill] sm:$0xff] %v7351_v22 }
 0x6c8   :  { %v3499_v40 = vpop.f32.mrf.mxu1 }
 0x6c9   :  { %v3517_v6 = vmax.f32 %v3499_v40, 0.0 }
 0x6ce   :  { %v2841_v29 = vpop.f32.mrf.mxu3 }
 0x6cf   :  { %v7357_v36 = vmax.f32 %v2657_v52, %v2841_v29  ;;  %v8365_v52 = vmax.f32 %v8363_v26, %v8364_v31 }
 0x6d0   :  { %5144 = vmatmul.msk.bf16.gmra.mxu2 %vm486_vm6, %v6785_v5  ;;  %v3502_v17 = vpop.f32.mrf.mxu1 }
 0x6d1   :  { %v7363_v57 = vpop.f32.mrf.mxu0  ;;  %v2405_v29 = vmax.f32 %v8365_v52, %v6995_v48  ;;  %v7385_v52 = vld [vmem:[%s8139_s2 + $0x28] sm:$0xff] }
 0x6d3   :  { %v2659_v7 = vmax.f32 %v2405_v29, %v2592_v13 }
 0x6d6   :  { %v2843_v22 = vpop.f32.mrf.mxu3 }
 0x6d7   :  { %v2912_v35 = vmax.f32 %v2658_v27, %v2843_v22  ;;  %v2406_v22 = vmax.f32 %v2151_v15, %v7028_v39  ;;  %v3514_v15 = vmax.f32 %v7330_v41, 0.0 }
 0x6d8   :  { %v3505_v25 = vpop.f32.mrf.mxu1 }
 0x6d9   :  { %v3166_v3 = vmax.f32 %v2912_v35, %v3097_v28  ;;  %v4003_v30 = vpop.f32.mrf.mxu0  ;;  %v2660_v49 = vmax.f32 %v2406_v22, %v7308_v20  ;;  %v3518_v35 = vmax.f32 %v3502_v17, 0.0  ;;  %v3515_v20 = vmax.f32 %v7338_v61, 0.0 }
 0x6db   :  { %3198 = vst [vmem:[#allocation2 + $0xe8] sm:$0xff] %v3166_v3  ;;  %v3519_v3 = vmax.f32 %v3505_v25, 0.0  ;;  %v3522_v17 = vpack.c.bf16 %v3515_v20, %v3514_v15 }
 0x6dd   :  { %v3524_v31 = vpack.c.bf16 %v3519_v3, %v3518_v35 }
 0x6de   :  { %v2846_v4 = vpop.f32.mrf.mxu3 }
 0x6df   :  { %v2913_v24 = vmax.f32 %v2659_v7, %v2846_v4  ;;  %v3516_v7 = vmax.f32 %v3496_v55, 0.0 }
 0x6e0   :  { %5145 = vmatmul.msk.bf16.gmra.mxu2 %vm486_vm6, %v6799_v16  ;;  %v3508_v10 = vpop.f32.mrf.mxu1 }
 0x6e1   :  { %v3167_v27 = vmax.f32 %v2913_v24, %v3100_v32  ;;  %v4006_v45 = vpop.f32.mrf.mxu0  ;;  %v3520_v48 = vmax.f32 %v3508_v10, 0.0  ;;  %v3523_v32 = vpack.c.bf16 %v3517_v6, %v3516_v7 }
 0x6e3   :  { %3199 = vst [vmem:[#allocation2 + $0xf0] sm:$0xff] %v3167_v27 }
 0x6e6   :  { %v2848_v37 = vpop.f32.mrf.mxu3 }
 0x6e7   :  { %v2914_v28 = vmax.f32 %v2660_v49, %v2848_v37 }
 0x6e8   :  { %v3511_v13 = vpop.f32.mrf.mxu1 }
 0x6e9   :  { %v3521_v26 = vmax.f32 %v3511_v13, 0.0  ;;  %v3168_v8 = vmax.f32 %v2914_v28, %v3102_v12  ;;  %v4009_v39 = vpop.f32.mrf.mxu0  ;;  %v4026_v28 = vmax.f32 %v4006_v45, 0.0 }
 0x6ea   :  { %v4027_v13 = vmax.f32 %v4009_v39, 0.0 }
 0x6eb   :  { %v3525_v4 = vpack.c.bf16 %v3521_v26, %v3520_v48  ;;  %3200 = vst [vmem:[#allocation2 + $0xf8] sm:$0xff] %v3168_v8  ;;  %v4024_v26 = vmax.f32 %v7363_v57, 0.0  ;;  %v4025_v8 = vmax.f32 %v4003_v30, 0.0 }
 0x6ed   :  { %3530 = vmatpush.bf16.msrb.mxu1 %v3525_v4  ;;  %v4033_v4 = vpack.c.bf16 %v4027_v13, %v4026_v28  ;;  %v4032_v7 = vpack.c.bf16 %v4025_v8, %v4024_v26 }
 0x6ee   :  { %v3746_v24 = vpop.f32.mrf.mxu3 }
 0x6f0   :  { %5146 = vmatmul.msk.bf16.gmra.mxu2 %vm486_vm6, %v6813_v63 }
 0x6f1   :  { %3531 = vmatpush.bf16.msrb.mxu1 %v3524_v31  ;;  %v4012_v25 = vpop.f32.mrf.mxu0  ;;  %v8367_v31 = vld [vmem:[#allocation21_spill] sm:$0xff] }
 0x6f2   :  { %v4028_v22 = vmax.f32 %v4012_v25, 0.0 }
 0x6f5   :  { %3532 = vmatpush.bf16.msrb.mxu1 %v3523_v32 }
 0x6f6   :  { %v3749_v12 = vpop.f32.mrf.mxu3 }
 0x6f9   :  { %3533 = vmatpush.bf16.msrb.mxu1 %v3522_v17  ;;  %v4015_v55 = vpop.f32.mrf.mxu0 }
 0x6fa   :  { %v4029_v49 = vmax.f32 %v4015_v55, 0.0  ;;  %v3770_v55 = vmax.f32 %v3746_v24, 0.0 }
 0x6fc   :  { %5167 = vmatmul.msk.bf16.vlgmr.msrb.gmra.mxu1 %vm486_vm6, %v6792_v19  ;;  %v4034_v35 = vpack.c.bf16 %v4029_v49, %v4028_v22 }
 0x6fe   :  { %v3752_v40 = vpop.f32.mrf.mxu3 }
 0x6ff   :  { %v3772_v32 = vmax.f32 %v3752_v40, 0.0  ;;  %v8369_v40 = vld [vmem:[#allocation46_spill] sm:$0xff] }
 0x700   :  { %5147 = vmatmul.msk.bf16.gmra.mxu2 %vm486_vm6, %v7385_v52 }
 0x701   :  { %v4018_v61 = vpop.f32.mrf.mxu0 }
 0x702   :  { %v4030_v29 = vmax.f32 %v4018_v61, 0.0  ;;  %v3771_v61 = vmax.f32 %v3749_v12, 0.0  ;;  %v8372_v12 = vld [vmem:[#allocation49_spill] sm:$0xff] }
 0x706   :  { %v3755_v41 = vpop.f32.mrf.mxu3 }
 0x707   :  { %v3773_v17 = vmax.f32 %v3755_v41, 0.0  ;;  %v8370_v41 = vld [vmem:[#allocation39_spill] sm:$0xff] }
 0x708   :  { %v8371_v49 = vmax.f32 %v8369_v40, %v8370_v41  ;;  %v8383_v41 = vmax.f32 %v7009_v59, %v6945_v56 }
 0x709   :  { %v4021_v27 = vpop.f32.mrf.mxu0 }
 0x70a   :  { %v4031_v37 = vmax.f32 %v4021_v27, 0.0  ;;  %v8368_v27 = vld [vmem:[#allocation40_spill] sm:$0xff] }
 0x70c   :  { %5168 = vmatmul.msk.bf16.gmra.mxu1 %vm486_vm6, %v6806_v54  ;;  %v4035_v48 = vpack.c.bf16 %v4031_v37, %v4030_v29  ;;  %v3779_v29 = vpack.c.bf16 %v3773_v17, %v3772_v32 }
 0x70e   :  { %v3758_v10 = vpop.f32.mrf.mxu3  ;;  %4040 = vmatpush.bf16.msrb.mxu0 %v4035_v48  ;;  %v8373_v48 = vld [vmem:[#allocation41_spill] sm:$0xff] }
 0x70f   :  { %v3774_v15 = vmax.f32 %v3758_v10, 0.0  ;;  %v3778_v10 = vpack.c.bf16 %v3771_v61, %v3770_v55  ;;  %v8374_v28 = vmax.f32 %v8372_v12, %v8373_v48 }
 0x710   :  { %5148 = vmatmul.msk.bf16.gmra.mxu2 %vm486_vm6, %v6868_v23 }
 0x712   :  { %4041 = vmatpush.bf16.msrb.mxu0 %v4034_v35  ;;  %v8375_v35 = vld [vmem:[#allocation43_spill] sm:$0xff] }
 0x716   :  { %v3761_v3 = vpop.f32.mrf.mxu3  ;;  %4042 = vmatpush.bf16.msrb.mxu0 %v4033_v4  ;;  %v8376_v4 = vld [vmem:[#allocation52_spill] sm:$0xff] }
 0x717   :  { %v3775_v57 = vmax.f32 %v3761_v3, 0.0  ;;  %v7425_v3 = vld [vmem:[%s8137_s0 + $0x10] sm:$0x1] }
 0x719   :  { %v3780_v25 = vpack.c.bf16 %v3775_v57, %v3774_v15  ;;  %v8379_v57 = vld [vmem:[#allocation56_spill] sm:$0xff] }
 0x71a   :  { %4043 = vmatpush.bf16.msrb.mxu0 %v4032_v7  ;;  %v8377_v7 = vld [vmem:[#allocation42_spill] sm:$0xff] }
 0x71c   :  { %5169 = vmatmul.msk.bf16.gmra.mxu1 %vm486_vm6, %v6785_v5 }
 0x71d   :  { %5217 = vmatmul.msk.bf16.vlgmr.msrb.gmra.mxu0 %vm486_vm6, %v6792_v19 }
 0x71e   :  { %v3764_v6 = vpop.f32.mrf.mxu3 }
 0x71f   :  { %v3776_v45 = vmax.f32 %v3764_v6, 0.0  ;;  %v8378_v6 = vmax.f32 %v8376_v4, %v8377_v7  ;;  %v8386_v4 = vld [vmem:[#allocation51_spill] sm:$0xff] }
 0x720   :  { %5149 = vmatmul.msk.bf16.gmra.mxu2 %vm486_vm6, %v8367_v31 }
 0x726   :  { %v3767_v39 = vpop.f32.mrf.mxu3 }
 0x727   :  { %v3777_v30 = vmax.f32 %v3767_v39, 0.0 }
 0x729   :  { %v3781_v20 = vpack.c.bf16 %v3777_v30, %v3776_v45 }
 0x72b   :  { %3786 = vmatpush.bf16.msrb.mxu3 %v3781_v20 }
 0x72c   :  { %5170 = vmatmul.msk.bf16.gmra.mxu1 %vm486_vm6, %v6799_v16 }
 0x72d   :  { %5218 = vmatmul.msk.bf16.gmra.mxu0 %vm486_vm6, %v6806_v54 }
 0x72f   :  { %3787 = vmatpush.bf16.msrb.mxu3 %v3780_v25  ;;  %v8382_v25 = vld [vmem:[#allocation48_spill] sm:$0xff] }
 0x730   :  { %5150 = vmatmul.msk.bf16.gmra.mxu2 %vm486_vm6, %v8368_v27 }
 0x733   :  { %v3279_v22 = vpop.f32.mrf.mxu2  ;;  %3788 = vmatpush.bf16.msrb.mxu3 %v3779_v29 }
 0x734   :  { %v7409_v37 = vmax.f32 %v8371_v49, %v3279_v22  ;;  %v7455_v22 = vld [vmem:[%s8137_s0 + $0x21] sm:$0x1]  ;;  %s4773_s0 = sshll.u32 %s8141_s4, 4  ;;  %s4774_s0 = int_to_ptr.hbm [resolvable:$true] %s4773_s0 }
 0x737   :  { %3789 = vmatpush.bf16.msrb.mxu3 %v3778_v10 }
 0x73a   :  { %5192 = vmatmul.msk.bf16.vlgmr.msrb.gmra.mxu3 %vm486_vm6, %v6792_v19  ;;  %v7429_v19 = vsub.f32 %v7425_v3, %v8317_v60  ;;  %v8380_v60 = vld [vmem:[#allocation45_spill] sm:$0xff] }
 0x73b   :  { %v3281_v24 = vpop.f32.mrf.mxu2  ;;  %v8381_v30 = vmax.f32 %v8379_v57, %v8380_v60 }
 0x73c   :  { %v7416_v13 = vmax.f32 %v8374_v28, %v3281_v24  ;;  %5171 = vmatmul.msk.bf16.gmra.mxu1 %vm486_vm6, %v6813_v63  ;;  %v56_v8 = vmax.f32 %v7429_v19, 1e-06  ;;  %v8384_v24 = vld [vmem:[#allocation18_spill] sm:$0xff] }
 0x73d   :  { %5219 = vmatmul.msk.bf16.gmra.mxu0 %vm486_vm6, %v6785_v5 }
 0x73e   :  { %5300 = vrcp.f32 %v56_v8  ;;  %v98_v61 = vand.u32 2147483648, %v56_v8  ;;  %vm92_vm14 = vweird.f32 %v56_v8  ;;  %v96_v29 = vand.u32 2147483647, %v56_v8 }
 0x740   :  { %5151 = vmatmul.msk.bf16.gmra.mxu2 %vm486_vm6, %v8375_v35  ;;  %v99_v40 = vor.u32 1.1754944e-38, %v98_v61  ;;  %vm97_vm9 = vcmp.eq.f32.partialorder %v96_v29, 8.507059e+37 }
 0x743   :  { %v3284_v26 = vpop.f32.mrf.mxu2 }
 0x744   :  { %v7437_v45 = vmax.f32 %v8378_v6, %v3284_v26  ;;  %v5301_v39 = vpop.eup %5300 }
 0x745   :  { %v88_v32 = vmul.f32 %v5301_v39, %v56_v8  ;;  %vm93_vm7 = vweird.f32 %v5301_v39  ;;  %v8385_v8 = vld [vmem:[#allocation62_spill] sm:$0xff] }
 0x746   :  { %vm94_vm8 = vmor %vm92_vm14, %vm93_vm7  ;;  %v8387_v7 = vmax.f32 %v8385_v8, %v8386_v4  ;;  %v8401_v4 = vld [vmem:[#allocation47_spill] sm:$0xff] }
 0x747   :  { %v89_v17 = vsub.f32 1.0, %v88_v32  ;;  %v8390_v32 = vld [vmem:[#allocation54_spill] sm:$0xff] }
 0x749   :  { %v90_v55 = vmul.f32 %v5301_v39, %v89_v17 }
 0x74a   :  { %5193 = vmatmul.msk.bf16.gmra.mxu3 %vm486_vm6, %v6806_v54 }
 0x74b   :  { %v3286_v15 = vpop.f32.mrf.mxu2  ;;  %v91_v54 = vadd.f32 %v5301_v39, %v90_v55 }
 0x74c   :  { %v7444_v20 = vmax.f32 %v8381_v30, %v3286_v15  ;;  %5172 = vmatmul.msk.bf16.gmra.mxu1 %vm486_vm6, %v7385_v52  ;;  %v8389_v30 = vld [vmem:[#allocation64_spill] sm:$0xff] }
 0x74d   :  { %5220 = vmatmul.msk.bf16.gmra.mxu0 %vm486_vm6, %v6799_v16  ;;  %v7464_v16 = vsub.f32 %v7455_v22, %v8384_v24  ;;  %v95_v12 = vsel %vm94_vm8, %v5301_v39, %v91_v54  ;;  %v8388_v39 = vld [vmem:[#allocation55_spill] sm:$0xff]  ;;  %v8391_v17 = vmax.f32 %v8389_v30, %v8390_v32  ;;  %v2605_v54 = vld [vmem:[#allocation2 + $0x40] sm:$0xff] }
 0x74e   :  { %v100_v48 = vsel %vm97_vm9, %v99_v40, %v95_v12  ;;  %v8395_v32 = vld [vmem:[#allocation67_spill] sm:$0xff] }
 0x74f   :  { %v7467_v28 = vmul.f32 %v100_v48, %v7464_v16 }
 0x750   :  { %5152 = vmatmul.msk.bf16.gmra.mxu2 %vm486_vm6, %v8382_v25 }
 0x751   :  { %v7470_v35 = vand.u32 2147483647, %v7467_v28 }
 0x753   :  { %v3289_v10 = vpop.f32.mrf.mxu2  ;;  %v170_v59 = vadd.f32 1.0, %v7470_v35  ;;  %v119_v26 = vmax.f32 %v7470_v35, 1e-30 }
 0x754   :  { %v7460_v49 = vmax.f32 %v8383_v41, %v3289_v10  ;;  %v8392_v10 = vld [vmem:[#allocation44_spill] sm:$0xff] }
 0x755   :  { %5302 = vrcp.f32 %v170_v59  ;;  %v2637_v40 = vmax.f32 %v2605_v54, %v8392_v10  ;;  %v212_v24 = vand.u32 2147483648, %v170_v59  ;;  %v161_v12 = vand.u32 2147483648, %v119_v26 }
 0x756   :  { %5304 = vrcp.f32 %v119_v26  ;;  %vm206_vm10 = vweird.f32 %v170_v59  ;;  %vm155_vm12 = vweird.f32 %v119_v26  ;;  %v159_v8 = vand.u32 2147483647, %v119_v26 }
 0x757   :  { %v210_v30 = vand.u32 2147483647, %v170_v59 }
 0x758   :  { %vm160_vm8 = vcmp.eq.f32.partialorder %v159_v8, 8.507059e+37 }
 0x759   :  { %vm211_vm9 = vcmp.eq.f32.partialorder %v210_v30, 8.507059e+37 }
 0x75a   :  { %5194 = vmatmul.msk.bf16.gmra.mxu3 %vm486_vm6, %v6785_v5 }
 0x75b   :  { %v3291_v56 = vpop.f32.mrf.mxu2  ;;  %v5303_v15 = vpop.eup %5302 }
 0x75c   :  { %v7479_v6 = vmax.f32 %v8387_v7, %v3291_v56  ;;  %5173 = vmatmul.msk.bf16.gmra.mxu1 %vm486_vm6, %v6868_v23  ;;  %v5305_v5 = vpop.eup %5304  ;;  %v202_v60 = vmul.f32 %v5303_v15, %v170_v59  ;;  %vm207_vm11 = vweird.f32 %v5303_v15 }
 0x75d   :  { %5221 = vmatmul.msk.bf16.gmra.mxu0 %vm486_vm6, %v6813_v63  ;;  %v151_v55 = vmul.f32 %v5305_v5, %v119_v26  ;;  %v7496_v63 = vld [vmem:[%s8139_s2 + $0x18] sm:$0xff]  ;;  %vm156_vm13 = vweird.f32 %v5305_v5  ;;  %vm7500_vm14 = vmor %vm206_vm10, %vm207_vm11  ;;  %vm116_vm10 = vcmp.gt.f32.partialorder %v7470_v35, 0.41421357  ;;  %vm113_vm11 = vcmp.gt.f32.partialorder %v7470_v35, 2.4142137 }
 0x75e   :  { %v203_v61 = vsub.f32 1.0, %v202_v60  ;;  %vm157_vm7 = vmor %vm155_vm12, %vm156_vm13  ;;  %vm104_vm12 = vcmp.ge.f32.partialorder %v7467_v28, 0.0  ;;  %v4222_v28 = vrot.slane %v7455_v22, 7 }
 0x75f   :  { %v152_v23 = vsub.f32 1.0, %v151_v55 }
 0x760   :  { %5153 = vmatmul.msk.bf16.gmra.mxu2 %vm486_vm6, %v8388_v39  ;;  %v204_v29 = vmul.f32 %v5303_v15, %v203_v61  ;;  %v162_v39 = vor.u32 1.1754944e-38, %v161_v12  ;;  %v8399_v12 = vld [vmem:[#allocation61_spill] sm:$0xff] }
 0x761   :  { %v153_v41 = vmul.f32 %v5305_v5, %v152_v23  ;;  %v213_v23 = vor.u32 1.1754944e-38, %v212_v24 }
 0x762   :  { %v205_v48 = vadd.f32 %v5303_v15, %v204_v29  ;;  %v8398_v29 = vld [vmem:[#allocation69_spill] sm:$0xff] }
 0x763   :  { %v3294_v57 = vpop.f32.mrf.mxu2  ;;  %v154_v56 = vadd.f32 %v5305_v5, %v153_v41  ;;  %v2891_v10 = vmax.f32 %v2637_v40, %v8398_v29  ;;  %v7539_v29 = vld [vmem:[%s8139_s2 + $0x20] sm:$0xff] }
 0x764   :  { %v7490_v25 = vmax.f32 %v8391_v17, %v3294_v57  ;;  %v4787_v57 = vadd.f32 -1.0, %v7470_v35  ;;  %v209_v60 = vsel %vm7500_vm14, %v5303_v15, %v205_v48  ;;  %v8396_v17 = vld [vmem:[#allocation58_spill] sm:$0xff] }
 0x765   :  { %v8397_v55 = vmax.f32 %v8395_v32, %v8396_v17  ;;  %v158_v26 = vsel %vm157_vm7, %v5305_v5, %v154_v56  ;;  %v214_v15 = vsel %vm211_vm9, %v213_v23, %v209_v60  ;;  %v8400_v5 = vld [vmem:[#allocation60_spill] sm:$0xff]  ;;  %v2606_v48 = vld [vmem:[#allocation2 + $0x48] sm:$0xff]  ;;  %v8402_v60 = vld [vmem:[#allocation73_spill] sm:$0xff] }
 0x766   :  { %v163_v54 = vsel %vm160_vm8, %v162_v39, %v158_v26  ;;  %v215_v59 = vmul.f32 %v4787_v57, %v214_v15  ;;  %v3145_v24 = vmax.f32 %v2891_v10, %v8400_v5  ;;  %v8403_v26 = vld [vmem:[#allocation63_spill] sm:$0xff] }
 0x767   :  { %v164_v41 = vmul.f32 -1.0, %v163_v54  ;;  %v2607_v10 = vld [vmem:[#allocation2 + $0x50] sm:$0xff] }
 0x76a   :  { %5195 = vmatmul.msk.bf16.gmra.mxu3 %vm486_vm6, %v7496_v63 }
 0x76b   :  { %v3296_v7 = vpop.f32.mrf.mxu2 }
 0x76c   :  { %v7510_v61 = vmax.f32 %v8397_v55, %v3296_v7  ;;  %5174 = vmatmul.msk.bf16.gmra.mxu1 %vm486_vm6, %v8367_v31  ;;  %v218_v31 = vsel %vm116_vm10, %v215_v59, %v7470_v35  ;;  %v2638_v7 = vmax.f32 %v2606_v48, %v8401_v4  ;;  %v8404_v59 = vld [vmem:[#allocation50_spill] sm:$0xff] }
 0x76d   :  { %5222 = vmatmul.msk.bf16.gmra.mxu0 %vm486_vm6, %v7385_v52  ;;  %v221_v40 = vsel %vm113_vm11, %v164_v41, %v218_v31  ;;  %v8406_v4 = vld [vmem:[#allocation66_spill] sm:$0xff] }
 0x76e   :  { %v230_v8 = vmul.f32 %v221_v40, %v221_v40  ;;  %v2892_v30 = vmax.f32 %v2638_v7, %v8402_v60  ;;  %v8407_v60 = vld [vmem:[#allocation65_spill] sm:$0xff] }
 0x770   :  { %5154 = vmatmul.msk.bf16.gmra.mxu2 %vm486_vm6, %v8399_v12  ;;  %v233_v57 = vmul.f32 0.080537446, %v230_v8  ;;  %v3146_v23 = vmax.f32 %v2892_v30, %v8403_v26  ;;  %v2639_v12 = vmax.f32 %v2607_v10, %v8404_v59 }
 0x772   :  { %v4790_v32 = vadd.f32 -0.13877685, %v233_v57 }
 0x773   :  { %v3299_v56 = vpop.f32.mrf.mxu2 }
 0x774   :  { %v7528_v39 = vmax.f32 %v3145_v24, %v3299_v56  ;;  %v239_v55 = vmul.f32 %v4790_v32, %v230_v8  ;;  %v8405_v24 = vld [vmem:[#allocation75_spill] sm:$0xff] }
 0x775   :  { %v2893_v48 = vmax.f32 %v2639_v12, %v8405_v24 }
 0x776   :  { %v242_v15 = vadd.f32 0.19977711, %v239_v55  ;;  %v7559_v55 = vld [vmem:[%s8139_s2 + $0x30] sm:$0xff] }
 0x777   :  { %v3147_v30 = vmax.f32 %v2893_v48, %v8407_v60  ;;  %v50_v48 = vmul.f32 10.0, %v7429_v19  ;;  %v53_v60 = vmul.f32 10.0, %v7464_v16  ;;  %v4233_v19 = vsel %vm27_vm15, %v7425_v3, %v4222_v28 }
 0x778   :  { %v245_v5 = vmul.f32 %v242_v15, %v230_v8 }
 0x779   :  { %v7531_v17 = vpop.f32.mrf.mxu1  ;;  %v4231_v16 = vrot.slane %v53_v60, 4 }
 0x77a   :  { %v3647_v54 = vmax.f32 %v7409_v37, %v7531_v17  ;;  %5196 = vmatmul.msk.bf16.gmra.mxu3 %vm486_vm6, %v7539_v29  ;;  %v4793_v56 = vadd.f32 -0.3333295, %v245_v5  ;;  %v8421_v37 = vmax.f32 %v7254_v42, %v7186_v1  ;;  %v7742_v42 = vld [vmem:[%s8139_s2 + $0x68] sm:$0xff] }
 0x77b   :  { %v3301_v41 = vpop.f32.mrf.mxu2 }
 0x77c   :  { %v7544_v31 = vmax.f32 %v3146_v23, %v3301_v41  ;;  %5175 = vmatmul.msk.bf16.gmra.mxu1 %vm486_vm6, %v8368_v27  ;;  %v251_v57 = vmul.f32 %v4793_v56, %v230_v8  ;;  %v2608_v27 = vld [vmem:[#allocation2 + $0x58] sm:$0xff]  ;;  %v8408_v23 = vmov 0.0   ;;  %v8409_v41 = vld [vmem:[#allocation53_spill] sm:$0xff]  ;;  %v8410_v56 = vmov -1.0  }
 0x77d   :  { %5223 = vmatmul.msk.bf16.gmra.mxu0 %vm486_vm6, %v7559_v55  ;;  %v224_v8 = vsel %vm116_vm10, 0.7853982, %v8408_v23  ;;  %v2640_v15 = vmax.f32 %v2608_v27, %v8409_v41 }
 0x77e   :  { %v254_v10 = vmul.f32 %v251_v57, %v221_v40  ;;  %v227_v12 = vsel %vm113_vm11, 1.5707964, %v224_v8 }
 0x77f   :  { %v2894_v24 = vmax.f32 %v2640_v15, %v7127_v38  ;;  %v4228_v38 = vrot.slane %v50_v48, 5 }
 0x780   :  { %5155 = vmatmul.msk.bf16.gmra.mxu2 %vm486_vm6, %v8406_v4  ;;  %v257_v5 = vadd.f32 %v254_v10, %v221_v40  ;;  %v107_v4 = vsel %vm104_vm12, 1.0, %v8410_v56  ;;  %v2609_v40 = vld [vmem:[#allocation2 + $0x60] sm:$0xff] }
 0x781   :  { %v7551_v7 = vpop.f32.mrf.mxu1  ;;  %v8412_v10 = vld [vmem:[#allocation57_spill] sm:$0xff] }
 0x782   :  { %v3648_v32 = vmax.f32 %v7416_v13, %v7551_v7  ;;  %v260_v23 = vadd.f32 %v257_v5, %v227_v12  ;;  %v2641_v41 = vmax.f32 %v2609_v40, %v8412_v10  ;;  %v7592_v12 = vld [vmem:[%s8139_s2 + $0x48] sm:$0xff]  ;;  %v8416_v40 = vld [vmem:[#allocation59_spill] sm:$0xff] }
 0x783   :  { %v3304_v26 = vpop.f32.mrf.mxu2 }
 0x784   :  { %v7568_v59 = vmax.f32 %v3147_v30, %v3304_v26  ;;  %v263_v27 = vmul.f32 %v260_v23, %v107_v4  ;;  %v8411_v30 = vld [vmem:[#allocation68_spill] sm:$0xff]  ;;  %v8415_v23 = vld [vmem:[#allocation71_spill] sm:$0xff] }
 0x785   :  { %v3148_v26 = vmax.f32 %v2894_v24, %v8411_v30  ;;  %v8413_v24 = vld [vmem:[#allocation79_spill] sm:$0xff]  ;;  %v8414_v4 = vld [vmem:[#allocation72_spill] sm:$0xff] }
 0x786   :  { %v4225_v8 = vrot.slane %v263_v27, 6  ;;  %v2895_v3 = vmax.f32 %v2641_v41, %v8413_v24  ;;  %v8417_v41 = vld [vmem:[#allocation74_spill] sm:$0xff] }
 0x788   :  { %v4234_v5 = vsel %vm316_vm0, %v4233_v19, %v4225_v8  ;;  %v3149_v27 = vmax.f32 %v2895_v3, %v8415_v23 }
 0x789   :  { %v7577_v57 = vpop.f32.mrf.mxu1  ;;  %v4235_v48 = vsel %vm318_vm1, %v4234_v5, %v4228_v38  ;;  %v2610_v38 = vld [vmem:[#allocation2 + $0x68] sm:$0xff] }
 0x78a   :  { %v3649_v35 = vmax.f32 %v7437_v45, %v7577_v57  ;;  %5197 = vmatmul.msk.bf16.gmra.mxu3 %vm486_vm6, %v7385_v52  ;;  %v4236_v56 = vsel %vm320_vm2, %v4235_v48, %v4231_v16 }
 0x78b   :  { %v3306_v22 = vpop.f32.mrf.mxu2  ;;  %v4237_v28 = vsel %vm322_vm3, %v4236_v56, 1.0  ;;  %v7632_v56 = vld [vmem:[%s8139_s2 + $0x50] sm:$0xff] }
 0x78c   :  { %v7587_v15 = vmax.f32 %v3148_v26, %v3306_v22  ;;  %5176 = vmatmul.msk.bf16.gmra.mxu1 %vm486_vm6, %v7592_v12  ;;  %5233 = vmatpush.msk.msra.mxu2 %vm349_vm4, %v4237_v28  ;;  %v7612_v26 = vld [vmem:[%s8139_s2 + $0x38] sm:$0xff]  ;;  %v2642_v22 = vmax.f32 %v2610_v38, %v8416_v40  ;;  %v8419_v40 = vld [vmem:[#allocation78_spill] sm:$0xff] }
 0x78d   :  { %5224 = vmatmul.msk.bf16.gmra.mxu0 %vm486_vm6, %v7612_v26 }
 0x78e   :  { %v2896_v16 = vmax.f32 %v2642_v22, %v7163_v62  ;;  %v3152_v22 = vmax.f32 %v7198_v34, %v8419_v40  ;;  %v5366_v34 = vld [vmem:[%s8138_s1] sm:$0xff]  ;;  %v8420_v40 = vmax.f32 %v7219_v33, %v7147_v58 }
 0x790   :  { %5156 = vmatmul.msk.bf16.gmra.mxu2 %vm486_vm6, %v8414_v4  ;;  %v3150_v5 = vmax.f32 %v2896_v16, %v8417_v41  ;;  %v8418_v4 = vld [vmem:[#allocation77_spill] sm:$0xff] }
 0x791   :  { %v7603_v60 = vpop.f32.mrf.mxu1  ;;  %v3151_v28 = vmax.f32 %v7182_v44, %v8418_v4  ;;  %v7700_v44 = vld [vmem:[%s8139_s2 + $0x60] sm:$0xff] }
 0x792   :  { %v3650_v30 = vmax.f32 %v7444_v20, %v7603_v60 }
 0x793   :  { %v3309_v19 = vpop.f32.mrf.mxu2 }
 0x794   :  { %v7617_v8 = vmax.f32 %v3149_v27, %v3309_v19  ;;  %v7647_v27 = vld [vmem:[%s8139_s2 + $0x40] sm:$0xff] }
 0x799   :  { %v7620_v10 = vpop.f32.mrf.mxu1 }
 0x79a   :  { %v3651_v24 = vmax.f32 %v7460_v49, %v7620_v10  ;;  %5198 = vmatmul.msk.bf16.gmra.mxu3 %vm486_vm6, %v7559_v55  ;;  %v8424_v49 = vmax.f32 %v7306_v9, %v7258_v21 }
 0x79b   :  { %v3311_v3 = vpop.f32.mrf.mxu2 }
 0x79c   :  { %v7627_v48 = vmax.f32 %v3150_v5, %v3311_v3  ;;  %5177 = vmatmul.msk.bf16.gmra.mxu1 %vm486_vm6, %v7632_v56  ;;  %v7666_v5 = vld [vmem:[%s8139_s2 + $0x58] sm:$0xff]  ;;  %v7670_v3 = vpop.f32.mrf.mxu0 }
 0x79d   :  { %5225 = vmatmul.msk.bf16.gmra.mxu0 %vm486_vm6, %v7647_v27 }
 0x7a0   :  { %5157 = vmatmul.msk.bf16.gmra.mxu2 %vm486_vm6, %v7120_v14 }
 0x7a1   :  { %v7638_v62 = vpop.f32.mrf.mxu1 }
 0x7a3   :  { %v3314_v38 = vpop.f32.mrf.mxu2 }
 0x7a4   :  { %v7651_v19 = vmax.f32 %v3151_v28, %v3314_v38 }
 0x7a9   :  { %v7653_v14 = vpop.f32.mrf.mxu1 }
 0x7aa   :  { %5199 = vmatmul.msk.bf16.gmra.mxu3 %vm486_vm6, %v7612_v26 }
 0x7ab   :  { %v3316_v16 = vpop.f32.mrf.mxu2 }
 0x7ac   :  { %v7661_v41 = vmax.f32 %v3152_v22, %v3316_v16  ;;  %5178 = vmatmul.msk.bf16.gmra.mxu1 %vm486_vm6, %v7666_v5  ;;  %v5367_v16 = vld [vmem:[%s8138_s1 + $0x8] sm:$0xff] }
 0x7ad   :  { %5226 = vmatmul.msk.bf16.gmra.mxu0 %vm486_vm6, %v7592_v12 }
 0x7b0   :  { %5234 = vmatmul.msk.f32.vlgmr.msra.gmra.mxu2 %vm324_vm5, %v5366_v34  ;;  %v7691_v34 = vpop.f32.mrf.mxu0 }
 0x7b1   :  { %v7676_v4 = vpop.f32.mrf.mxu1 }
 0x7b3   :  { %v3319_v38 = vpop.f32.mrf.mxu2 }
 0x7b4   :  { %v7685_v22 = vmax.f32 %v8420_v40, %v3319_v38  ;;  %v5369_v38 = vld [vmem:[%s8138_s1 + $0x10] sm:$0xff] }
 0x7b8   :  { %5235 = vmatmul.msk.f32.gmra.mxu2 %vm324_vm5, %v5367_v16  ;;  %v7717_v23 = vpop.f32.mrf.mxu0 }
 0x7ba   :  { %5200 = vmatmul.msk.bf16.gmra.mxu3 %vm486_vm6, %v7647_v27 }
 0x7bb   :  { %v7695_v28 = vpop.f32.mrf.mxu2 }
 0x7bc   :  { %5179 = vmatmul.msk.bf16.gmra.mxu1 %vm486_vm6, %v7700_v44 }
 0x7bd   :  { %v3791_v58 = vpop.f32.mrf.mxu3  ;;  %5227 = vmatmul.msk.bf16.gmra.mxu0 %vm486_vm6, %v7632_v56 }
 0x7be   :  { %v7707_v33 = vmax.f32 %v3647_v54, %v3791_v58 }
 0x7c0   :  { %5236 = vmatmul.msk.f32.gmra.mxu2 %vm324_vm5, %v5369_v38  ;;  %v5370_v38 = vld [vmem:[%s8138_s1 + $0x18] sm:$0xff]  ;;  %v7746_v7 = vpop.f32.mrf.mxu0 }
 0x7c3   :  { %v3324_v16 = vpop.f32.mrf.mxu2 }
 0x7c4   :  { %v7722_v17 = vmax.f32 %v8421_v37, %v3324_v16  ;;  %v5372_v16 = vld [vmem:[%s8138_s1 + $0x20] sm:$0xff] }
 0x7c5   :  { %v3793_v54 = vpop.f32.mrf.mxu3 }
 0x7c6   :  { %v7727_v58 = vmax.f32 %v3648_v32, %v3793_v54 }
 0x7c8   :  { %5237 = vmatmul.msk.f32.gmra.mxu2 %vm324_vm5, %v5370_v38  ;;  %v8422_v38 = vmax.f32 %v7285_v11, %v7223_v46  ;;  %v7786_v11 = vld [vmem:[%s8139_s2 + $0x70] sm:$0xff] }
 0x7ca   :  { %5201 = vmatmul.msk.bf16.gmra.mxu3 %vm486_vm6, %v7592_v12 }
 0x7cb   :  { %v7737_v1 = vpop.f32.mrf.mxu2 }
 0x7cc   :  { %5180 = vmatmul.msk.bf16.gmra.mxu1 %vm486_vm6, %v7742_v42 }
 0x7cd   :  { %v3796_v13 = vpop.f32.mrf.mxu3  ;;  %5228 = vmatmul.msk.bf16.gmra.mxu0 %vm486_vm6, %v7666_v5 }
 0x7ce   :  { %v7751_v32 = vmax.f32 %v3649_v35, %v3796_v13  ;;  %v7771_v35 = vpop.f32.mrf.mxu0  ;;  %v5373_v13 = vld [vmem:[%s8138_s1 + $0x28] sm:$0xff] }
 0x7d0   :  { %5238 = vmatmul.msk.f32.gmra.mxu2 %vm324_vm5, %v5372_v16 }
 0x7d3   :  { %v3329_v54 = vpop.f32.mrf.mxu2 }
 0x7d4   :  { %v7764_v40 = vmax.f32 %v8422_v38, %v3329_v54 }
 0x7d5   :  { %v3798_v45 = vpop.f32.mrf.mxu3 }
 0x7d6   :  { %v7769_v57 = vmax.f32 %v3650_v30, %v3798_v45  ;;  %v5375_v30 = vld [vmem:[%s8138_s1 + $0x30] sm:$0xff]  ;;  %v7801_v38 = vpop.f32.mrf.mxu0 }
 0x7d8   :  { %5239 = vmatmul.msk.f32.gmra.mxu2 %vm324_vm5, %v5373_v13  ;;  %v8426_v13 = vmax.f32 %v7479_v6, %v7638_v62  ;;  %v7830_v6 = vld [vmem:[%s8139_s2 + $0x78] sm:$0xff] }
 0x7da   :  { %5202 = vmatmul.msk.bf16.gmra.mxu3 %vm486_vm6, %v7632_v56 }
 0x7db   :  { %v7781_v46 = vpop.f32.mrf.mxu2 }
 0x7dc   :  { %8423 = vst [vmem:[#allocation8_spill] sm:$0xff] %v7781_v46  ;;  %5181 = vmatmul.msk.bf16.gmra.mxu1 %vm486_vm6, %v7786_v11 }
 0x7dd   :  { %v3801_v20 = vpop.f32.mrf.mxu3  ;;  %5229 = vmatmul.msk.bf16.gmra.mxu0 %vm486_vm6, %v7700_v44 }
 0x7de   :  { %v7793_v60 = vmax.f32 %v3651_v24, %v3801_v20  ;;  %v7825_v9 = vpop.f32.mrf.mxu0 }
 0x7e0   :  { %5240 = vmatmul.msk.f32.gmra.mxu2 %vm324_vm5, %v5375_v30  ;;  %v5376_v30 = vld [vmem:[%s8138_s1 + $0x38] sm:$0xff] }
 0x7e3   :  { %v3334_v45 = vpop.f32.mrf.mxu2 }
 0x7e4   :  { %v7808_v10 = vmax.f32 %v8424_v49, %v3334_v45  ;;  %v8428_v45 = vmax.f32 %v7490_v25, %v7653_v14  ;;  %v8431_v25 = vmax.f32 %v7510_v61, %v7676_v4 }
 0x7e5   :  { %v3803_v24 = vpop.f32.mrf.mxu3 }
 0x7e6   :  { %8425 = vst [vmem:[#allocation34_spill] sm:$0xff] %v7808_v10  ;;  %v7813_v20 = vmax.f32 %v8426_v13, %v3803_v24  ;;  %v7848_v37 = vpop.f32.mrf.mxu0 }
 0x7e8   :  { %5241 = vmatmul.msk.f32.gmra.mxu2 %vm324_vm5, %v5376_v30  ;;  %v8429_v30 = vmax.f32 %v7326_v0, %v7287_v47  ;;  %v8433_v0 = vmax.f32 %v7345_v50, %v7310_v51 }
 0x7ea   :  { %5203 = vmatmul.msk.bf16.gmra.mxu3 %vm486_vm6, %v7666_v5 }
 0x7eb   :  { %v7823_v21 = vpop.f32.mrf.mxu2 }
 0x7ec   :  { %8427 = vst [vmem:[#allocation17_spill] sm:$0xff] %v7823_v21  ;;  %5182 = vmatmul.msk.bf16.gmra.mxu1 %vm486_vm6, %v7830_v6 }
 0x7ed   :  { %v3806_v62 = vpop.f32.mrf.mxu3  ;;  %5230 = vmatmul.msk.bf16.gmra.mxu0 %vm486_vm6, %v7742_v42 }
 0x7ee   :  { %v7837_v49 = vmax.f32 %v8428_v45, %v3806_v62 }
 0x7f3   :  { %v3339_v13 = vpop.f32.mrf.mxu2 }
 0x7f4   :  { %v7846_v54 = vmax.f32 %v8429_v30, %v3339_v13 }
 0x7f5   :  { %v3808_v16 = vpop.f32.mrf.mxu3 }
 0x7f6   :  { %8430 = vst [vmem:[#allocation19_spill] sm:$0xff] %v7846_v54  ;;  %v7853_v14 = vmax.f32 %v8431_v25, %v3808_v16  ;;  %v8436_v16 = vmax.f32 %v7357_v36, %v7332_v53 }
 0x7fa   :  { %5204 = vmatmul.msk.bf16.gmra.mxu3 %vm486_vm6, %v7700_v44 }
 0x7fb   :  { %v7859_v45 = vpop.f32.mrf.mxu2 }
 0x7fc   :  { %8432 = vst [vmem:[#allocation13_spill] sm:$0xff] %v7859_v45 }
 0x7fd   :  { %5231 = vmatmul.msk.bf16.gmra.mxu0 %vm486_vm6, %v7786_v11 }
 0x803   :  { %v3344_v47 = vpop.f32.mrf.mxu2 }
 0x804   :  { %v7866_v13 = vmax.f32 %v8433_v0, %v3344_v47 }
 0x806   :  { %8434 = vst [vmem:[#allocation24_spill] sm:$0xff] %v7866_v13 }
 0x80a   :  { %5205 = vmatmul.msk.bf16.gmra.mxu3 %vm486_vm6, %v7742_v42 }
 0x80b   :  { %v7870_v61 = vpop.f32.mrf.mxu2 }
 0x80c   :  { %8435 = vst [vmem:[#allocation20_spill] sm:$0xff] %v7870_v61 }
 0x80d   :  { %5232 = vmatmul.msk.bf16.gmra.mxu0 %vm486_vm6, %v7830_v6 }
 0x813   :  { %v3349_v4 = vpop.f32.mrf.mxu2 }
 0x814   :  { %v7877_v30 = vmax.f32 %v8436_v16, %v3349_v4 }
 0x816   :  { %8437 = vst [vmem:[#allocation27_spill] sm:$0xff] %v7877_v30 }
 0x81a   :  { %5206 = vmatmul.msk.bf16.gmra.mxu3 %vm486_vm6, %v7786_v11 }
 0x81b   :  { %v7881_v51 = vpop.f32.mrf.mxu2 }
 0x81c   :  { %8438 = vst [vmem:[#allocation25_spill] sm:$0xff] %v7881_v51 }
 0x823   :  { %v7883_v50 = vpop.f32.mrf.mxu2 }
 0x824   :  { %8439 = vst [vmem:[#allocation31_spill] sm:$0xff] %v7883_v50  ;;  %v5409_v50 = vmov 0  }
 0x825   :  { %5285 = vset.pattern.permute.xlu0 %v5409_v50  ;;  %5286 = vset.pattern.permute.xlu1 %v5409_v50 }
 0x826   :  { %5287 = vset.pattern.permute.xlu2 %v5409_v50  ;;  %v4520_v50 = vld [vmem:[%s8140_s3 + $0x48] sm:$0xff] }
 0x82a   :  { %5207 = vmatmul.msk.bf16.gmra.mxu3 %vm486_vm6, %v7830_v6 }
 0x82b   :  { %v7887_v25 = vpop.f32.mrf.mxu2 }
 0x82c   :  { %8440 = vst [vmem:[#allocation30_spill] sm:$0xff] %v7887_v25  ;;  %v4511_v25 = vld [vmem:[%s8140_s3] sm:$0xff] }
 0x82d   :  { %4545 = vperm.xlu0 %5285, %v4511_v25   ;;  %v4521_v25 = vld [vmem:[%s8140_s3 + $0x50] sm:$0xff] }
 0x833   :  { %v4258_v47 = vpop.f32.mrf.mxu2 }
 0x83b   :  { %v4261_v0 = vpop.f32.mrf.mxu2 }
 0x83c   :  { %v4283_v46 = vmax.f32 %v4261_v0, 0.0  ;;  %v4522_v0 = vld [vmem:[%s8140_s3 + $0x58] sm:$0xff] }
 0x843   :  { %v4264_v62 = vpop.f32.mrf.mxu2 }
 0x844   :  { %v4284_v10 = vmax.f32 %v4264_v62, 0.0  ;;  %v4517_v62 = vld [vmem:[%s8140_s3 + $0x30] sm:$0xff] }
 0x84b   :  { %v4267_v24 = vpop.f32.mrf.mxu2 }
 0x84c   :  { %v4285_v54 = vmax.f32 %v4267_v24, 0.0  ;;  %v5378_v24 = vld [vmem:[%s8139_s2] sm:$0xff] }
 0x853   :  { %v4270_v61 = vpop.f32.mrf.mxu2 }
 0x854   :  { %v4286_v51 = vmax.f32 %v4270_v61, 0.0 }
 0x85b   :  { %v4273_v53 = vpop.f32.mrf.mxu2 }
 0x85c   :  { %v4287_v13 = vmax.f32 %v4273_v53, 0.0  ;;  %v4527_v53 = vld [vmem:[%s8140_s3 + $0x80] sm:$0xff] }
 0x85e   :  { %v4292_v21 = vpack.c.bf16 %v4287_v13, %v4286_v51  ;;  %v4515_v13 = vld [vmem:[%s8140_s3 + $0x20] sm:$0xff]  ;;  %v4516_v51 = vld [vmem:[%s8140_s3 + $0x28] sm:$0xff] }
 0x85f   :  { %4565 = vperm.xlu2 %5287, %v4515_v13  }
 0x863   :  { %v4276_v36 = vpop.f32.mrf.mxu2 }
 0x864   :  { %v4288_v16 = vmax.f32 %v4276_v36, 0.0  ;;  %v4291_v36 = vpack.c.bf16 %v4285_v54, %v4284_v10  ;;  %v4514_v54 = vld [vmem:[%s8140_s3 + $0x18] sm:$0xff]  ;;  %v5380_v10 = vld [vmem:[%s8139_s2 + $0x10] sm:$0xff] }
 0x867   :  { %4570 = vperm.xlu2 %5287, %v4516_v51  }
 0x86b   :  { %v4279_v4 = vpop.f32.mrf.mxu2 }
 0x86c   :  { %v4289_v30 = vmax.f32 %v4279_v4, 0.0  ;;  %v4282_v4 = vmax.f32 %v4258_v47, 0.0  ;;  %v4523_v47 = vld [vmem:[%s8140_s3 + $0x60] sm:$0xff] }
 0x86e   :  { %v4293_v45 = vpack.c.bf16 %v4289_v30, %v4288_v16  ;;  %v4290_v61 = vpack.c.bf16 %v4283_v46, %v4282_v4  ;;  %v5379_v46 = vld [vmem:[%s8139_s2 + $0x8] sm:$0xff]  ;;  %v4518_v30 = vld [vmem:[%s8140_s3 + $0x38] sm:$0xff]  ;;  %v4529_v16 = vld [vmem:[%s8140_s3 + $0x90] sm:$0xff] }
 0x86f   :  { %v4532_v4 = vld [vmem:[%s8140_s3 + $0xa8] sm:$0xff] }
 0x870   :  { %4298 = vmatpush.bf16.msrb.mxu2 %v4293_v45  ;;  %v4512_v45 = vld [vmem:[%s8140_s3 + $0x8] sm:$0xff] }
 0x871   :  { %4550 = vperm.xlu0 %5285, %v4512_v45   ;;  %v4533_v45 = vld [vmem:[%s8140_s3 + $0xb0] sm:$0xff] }
 0x874   :  { %4299 = vmatpush.bf16.msrb.mxu2 %v4292_v21  ;;  %v4513_v21 = vld [vmem:[%s8140_s3 + $0x10] sm:$0xff] }
 0x875   :  { %4555 = vperm.xlu1 %5286, %v4513_v21  }
 0x878   :  { %4300 = vmatpush.bf16.msrb.mxu2 %v4291_v36  ;;  %v4530_v36 = vld [vmem:[%s8140_s3 + $0x98] sm:$0xff] }
 0x879   :  { %4575 = vperm.xlu0 %5285, %v4517_v62  }
 0x87c   :  { %4301 = vmatpush.bf16.msrb.mxu2 %v4290_v61 }
 0x87d   :  { %4560 = vperm.xlu1 %5286, %v4514_v54  }
 0x87f   :  { %5242 = vmatmul.msk.bf16.vlgmr.msrb.gmra.mxu2 %vm486_vm6, %v5378_v24  ;;  %v8441_v24 = vmax.f32 %v7707_v33, %v7670_v3  ;;  %v8442_v3 = vmax.f32 %v7727_v58, %v7691_v34  ;;  %v4539_v34 = vld [vmem:[%s8140_s3 + $0xe0] sm:$0xff] }
 0x881   :  { %4590 = vperm.xlu0 %5285, %v4520_v50   ;;  %v7992_v50 = vpop.f32.mrf.mxu0 }
 0x885   :  { %4580 = vperm.xlu1 %5286, %v4518_v30   ;;  %v7987_v30 = vpop.f32.mrf.mxu3 }
 0x889   :  { %4605 = vperm.xlu0 %5285, %v4523_v47   ;;  %v4538_v47 = vld [vmem:[%s8140_s3 + $0xd8] sm:$0xff] }
 0x88d   :  { %4595 = vperm.xlu1 %5286, %v4521_v25  }
 0x88f   :  { %5243 = vmatmul.msk.bf16.gmra.mxu2 %vm486_vm6, %v5379_v46  ;;  %v7979_v46 = vpop.f32.mrf.mxu1 }
 0x89f   :  { %5244 = vmatmul.msk.bf16.gmra.mxu2 %vm486_vm6, %v5380_v10  ;;  %v4536_v10 = vld [vmem:[%s8140_s3 + $0xc8] sm:$0xff] }
 0x8af   :  { %5245 = vmatmul.msk.bf16.gmra.mxu2 %vm486_vm6, %v7496_v63  ;;  %v4519_v63 = vld [vmem:[%s8140_s3 + $0x40] sm:$0xff] }
 0x8b0   :  { %4585 = vperm.xlu2 %5287, %v4519_v63   ;;  %v4528_v63 = vld [vmem:[%s8140_s3 + $0x88] sm:$0xff] }
 0x8b8   :  { %4600 = vperm.xlu2 %5287, %v4522_v0  }
 0x8bf   :  { %5246 = vmatmul.msk.bf16.gmra.mxu2 %vm486_vm6, %v7539_v29  ;;  %v4524_v29 = vld [vmem:[%s8140_s3 + $0x68] sm:$0xff] }
 0x8c0   :  { %4610 = vperm.xlu1 %5286, %v4524_v29   ;;  %v8005_v29 = vpop.f32.mrf.mxu1 }
 0x8c8   :  { %4625 = vperm.xlu1 %5286, %v4527_v53  }
 0x8cf   :  { %5247 = vmatmul.msk.bf16.gmra.mxu2 %vm486_vm6, %v7385_v52  ;;  %v4526_v52 = vld [vmem:[%s8140_s3 + $0x78] sm:$0xff] }
 0x8d0   :  { %4620 = vperm.xlu0 %5285, %v4526_v52   ;;  %4640 = vperm.xlu1 %5286, %v4530_v36   ;;  %v8010_v52 = vpop.f32.mrf.mxu3  ;;  %v4542_v36 = vld [vmem:[%s8140_s3 + $0xf8] sm:$0xff] }
 0x8d8   :  { %4635 = vperm.xlu0 %5285, %v4529_v16   ;;  %4655 = vperm.xlu1 %5286, %v4533_v45   ;;  %v4541_v16 = vld [vmem:[%s8140_s3 + $0xf0] sm:$0xff]  ;;  %v8023_v45 = vpop.f32.mrf.mxu1 }
 0x8df   :  { %5248 = vmatmul.msk.bf16.gmra.mxu2 %vm486_vm6, %v7559_v55  ;;  %v4525_v55 = vld [vmem:[%s8140_s3 + $0x70] sm:$0xff] }
 0x8e0   :  { %4615 = vperm.xlu2 %5287, %v4525_v55   ;;  %4650 = vperm.xlu0 %5285, %v4532_v4   ;;  %v8012_v55 = vpop.f32.mrf.mxu0 }
 0x8e1   :  { %4670 = vperm.xlu1 %5286, %v4536_v10  }
 0x8e7   :  { %v4556_v25 = vpop.permute.xlu1 %4555 }
 0x8e8   :  { %4630 = vperm.xlu2 %5287, %v4528_v63   ;;  %v8030_v10 = vpop.f32.mrf.mxu0 }
 0x8e9   :  { %4685 = vperm.xlu1 %5286, %v4539_v34   ;;  %v4537_v34 = vld [vmem:[%s8140_s3 + $0xd0] sm:$0xff] }
 0x8ef   :  { %5249 = vmatmul.msk.bf16.gmra.mxu2 %vm486_vm6, %v7612_v26  ;;  %v4546_v26 = vpop.permute.xlu0 %4545  ;;  %v4561_v4 = vpop.permute.xlu1 %4560 }
 0x8f1   :  { %4700 = vperm.xlu1 %5286, %v4542_v36  }
 0x8f7   :  { %v4551_v13 = vpop.permute.xlu0 %4550 }
 0x8ff   :  { %5250 = vmatmul.msk.bf16.gmra.mxu2 %vm486_vm6, %v7647_v27  ;;  %v4535_v27 = vld [vmem:[%s8140_s3 + $0xc0] sm:$0xff] }
 0x900   :  { %4665 = vperm.xlu0 %5285, %v4535_v27  }
 0x902   :  { %v4303_v61 = vpop.f32.mrf.mxu2 }
 0x903   :  { %v4415_v21 = vmax.f32 %v8441_v24, %v4303_v61  ;;  %v3816_v24 = vpop.f32.mrf.mxu3 }
 0x905   :  { %v4703_v54 = vadd.f32 %v4546_v26, %v4415_v21  ;;  %v4566_v21 = vpop.permute.xlu2 %4565 }
 0x907   :  { %4735 = vst [vmem:[#allocation2] sm:$0xff] %v4703_v54  ;;  %v4531_v54 = vld [vmem:[%s8140_s3 + $0xa0] sm:$0xff] }
 0x908   :  { %4680 = vperm.xlu0 %5285, %v4538_v47   ;;  %4645 = vperm.xlu2 %5287, %v4531_v54   ;;  %v8043_v47 = vpop.f32.mrf.mxu0 }
 0x90a   :  { %v4305_v62 = vpop.f32.mrf.mxu2 }
 0x90b   :  { %v4416_v33 = vmax.f32 %v8442_v3, %v4305_v62  ;;  %v3818_v3 = vpop.f32.mrf.mxu3 }
 0x90d   :  { %v4704_v51 = vadd.f32 %v4551_v13, %v4416_v33  ;;  %v8035_v13 = vpop.f32.mrf.mxu1 }
 0x90f   :  { %5251 = vmatmul.msk.bf16.gmra.mxu2 %vm486_vm6, %v7592_v12  ;;  %4736 = vst [vmem:[#allocation2 + $0x8] sm:$0xff] %v4704_v51  ;;  %v8443_v12 = vmax.f32 %v7751_v32, %v7717_v23  ;;  %v8444_v23 = vmax.f32 %v7769_v57, %v7746_v7  ;;  %v8445_v7 = vmax.f32 %v7793_v60, %v7771_v35  ;;  %v4571_v51 = vpop.permute.xlu2 %4570 }
 0x910   :  { %4695 = vperm.xlu0 %5285, %v4541_v16   ;;  %v8053_v16 = vpop.f32.mrf.mxu0 }
 0x912   :  { %v4308_v58 = vpop.f32.mrf.mxu2 }
 0x913   :  { %v4417_v0 = vmax.f32 %v8443_v12, %v4308_v58  ;;  %v4576_v12 = vpop.permute.xlu0 %4575 }
 0x915   :  { %v4705_v53 = vadd.f32 %v4556_v25, %v4417_v0  ;;  %v8446_v25 = vmax.f32 %v7813_v20, %v7801_v38  ;;  %v3565_v60 = vpop.f32.mrf.mxu1  ;;  %v3821_v0 = vpop.f32.mrf.mxu3  ;;  %v8447_v38 = vmax.f32 %v7837_v49, %v7825_v9 }
 0x917   :  { %4737 = vst [vmem:[#allocation2 + $0x10] sm:$0xff] %v4705_v53 }
 0x91a   :  { %v4310_v26 = vpop.f32.mrf.mxu2 }
 0x91b   :  { %v4418_v32 = vmax.f32 %v8444_v23, %v4310_v26  ;;  %v4581_v26 = vpop.permute.xlu1 %4580 }
 0x91d   :  { %v4706_v61 = vadd.f32 %v4561_v4, %v4418_v32  ;;  %v3655_v4 = vmax.f32 %v7528_v39, %v7979_v46  ;;  %v3567_v23 = vpop.f32.mrf.mxu1  ;;  %v8448_v32 = vmax.f32 %v7853_v14, %v7848_v37  ;;  %v3656_v39 = vmax.f32 %v7544_v31, %v8005_v29 }
 0x91f   :  { %5252 = vmatmul.msk.bf16.gmra.mxu2 %vm486_vm6, %v7632_v56  ;;  %4738 = vst [vmem:[#allocation2 + $0x18] sm:$0xff] %v4706_v61  ;;  %v4534_v56 = vld [vmem:[%s8140_s3 + $0xb8] sm:$0xff]  ;;  %v3911_v49 = vmax.f32 %v3655_v4, %v7987_v30  ;;  %v3823_v61 = vpop.f32.mrf.mxu3  ;;  %v3912_v37 = vmax.f32 %v3656_v39, %v8010_v52 }
 0x920   :  { %4660 = vperm.xlu2 %5287, %v4534_v56  }
 0x921   :  { %v4165_v54 = vmax.f32 %v3911_v49, %v7992_v50  ;;  %v4166_v56 = vmax.f32 %v3912_v37, %v8012_v55  ;;  %v3657_v50 = vmax.f32 %v7568_v59, %v8023_v45  ;;  %v3658_v55 = vmax.f32 %v7587_v15, %v8035_v13 }
 0x922   :  { %v4313_v27 = vpop.f32.mrf.mxu2 }
 0x923   :  { %v4419_v57 = vmax.f32 %v8445_v7, %v4313_v27  ;;  %v4077_v27 = vpop.f32.mrf.mxu0 }
 0x925   :  { %v4707_v62 = vadd.f32 %v4566_v21, %v4419_v57  ;;  %v4586_v57 = vpop.permute.xlu2 %4585 }
 0x927   :  { %4739 = vst [vmem:[#allocation2 + $0x20] sm:$0xff] %v4707_v62  ;;  %v3570_v62 = vpop.f32.mrf.mxu1  ;;  %v3826_v30 = vpop.f32.mrf.mxu3 }
 0x928   :  { %4675 = vperm.xlu2 %5287, %v4537_v34   ;;  %v3661_v39 = vmax.f32 %v7651_v19, %v3570_v62 }
 0x92a   :  { %v4315_v33 = vpop.f32.mrf.mxu2  ;;  %v3917_v37 = vmax.f32 %v3661_v39, %v3826_v30 }
 0x92b   :  { %v4420_v63 = vmax.f32 %v8446_v25, %v4315_v33 }
 0x92d   :  { %v4708_v35 = vadd.f32 %v4571_v51, %v4420_v63  ;;  %v4080_v51 = vpop.f32.mrf.mxu0  ;;  %v3913_v63 = vmax.f32 %v3657_v50, %v3816_v24 }
 0x92f   :  { %5253 = vmatmul.msk.bf16.gmra.mxu2 %vm486_vm6, %v7666_v5  ;;  %4740 = vst [vmem:[#allocation2 + $0x28] sm:$0xff] %v4708_v35  ;;  %v4540_v5 = vld [vmem:[%s8140_s3 + $0xe8] sm:$0xff]  ;;  %v3572_v34 = vpop.f32.mrf.mxu1  ;;  %v4167_v31 = vmax.f32 %v3913_v63, %v8030_v10  ;;  %v3828_v29 = vpop.f32.mrf.mxu3  ;;  %s5410_s3 = smov [#allocation2]  }
 0x930   :  { %4690 = vperm.xlu2 %5287, %v4540_v5   ;;  %v4601_v5 = vpop.permute.xlu2 %4600  ;;  %s4771_s20 = sshll.u32 %s5410_s3, 4  ;;  %s4772_s20 = int_to_ptr.vmem [resolvable:$true] %s4771_s20 }
 0x932   :  { %v4318_v58 = vpop.f32.mrf.mxu2 }
 0x933   :  { %v4421_v20 = vmax.f32 %v8447_v38, %v4318_v58  ;;  %v4596_v58 = vpop.permute.xlu1 %4595  ;;  %v3914_v38 = vmax.f32 %v3658_v55, %v3818_v3 }
 0x935   :  { %v4709_v53 = vadd.f32 %v4576_v12, %v4421_v20  ;;  %v4082_v59 = vpop.f32.mrf.mxu0  ;;  %v4168_v20 = vmax.f32 %v3914_v38, %v8043_v47 }
 0x937   :  { %4741 = vst [vmem:[#allocation2 + $0x30] sm:$0xff] %v4709_v53  ;;  %v3575_v24 = vpop.f32.mrf.mxu1 }
 0x93a   :  { %v4320_v36 = vpop.f32.mrf.mxu2 }
 0x93b   :  { %v4422_v9 = vmax.f32 %v8448_v32, %v4320_v36  ;;  %v3831_v36 = vpop.f32.mrf.mxu3 }
 0x93d   :  { %v4710_v21 = vadd.f32 %v4581_v26, %v4422_v9  ;;  %v4085_v32 = vpop.f32.mrf.mxu0  ;;  %v3660_v9 = vmax.f32 %v7627_v48, %v3567_v23  ;;  %v4171_v48 = vmax.f32 %v3917_v37, %v4080_v51  ;;  %v3663_v51 = vmax.f32 %v7685_v22, %v3575_v24 }
 0x93f   :  { %5254 = vmatmul.msk.bf16.gmra.mxu2 %vm486_vm6, %v7700_v44  ;;  %4742 = vst [vmem:[#allocation2 + $0x38] sm:$0xff] %v4710_v21  ;;  %v4591_v44 = vpop.permute.xlu0 %4590  ;;  %v3577_v47 = vpop.f32.mrf.mxu1  ;;  %v3916_v21 = vmax.f32 %v3660_v9, %v3823_v61  ;;  %v3919_v55 = vmax.f32 %v3663_v51, %v3831_v36 }
 0x940   :  { %v4616_v61 = vpop.permute.xlu2 %4615 }
 0x942   :  { %v4323_v7 = vpop.f32.mrf.mxu2 }
 0x943   :  { %v4423_v46 = vmax.f32 %v4165_v54, %v4323_v7  ;;  %v3833_v54 = vpop.f32.mrf.mxu3 }
 0x945   :  { %v4711_v14 = vadd.f32 %v4586_v57, %v4423_v46  ;;  %v4611_v57 = vpop.permute.xlu1 %4610 }
 0x947   :  { %4743 = vst [vmem:[#allocation2 + $0x40] sm:$0xff] %v4711_v14  ;;  %v4606_v3 = vpop.permute.xlu0 %4605  ;;  %v3580_v46 = vpop.f32.mrf.mxu1 }
 0x94a   :  { %v4325_v33 = vpop.f32.mrf.mxu2 }
 0x94b   :  { %v4424_v25 = vmax.f32 %v4166_v56, %v4325_v33  ;;  %v3836_v14 = vpop.f32.mrf.mxu3  ;;  %v3662_v56 = vmax.f32 %v7661_v41, %v3572_v34 }
 0x94d   :  { %v4712_v35 = vadd.f32 %v4591_v44, %v4424_v25  ;;  %v3918_v44 = vmax.f32 %v3662_v56, %v3828_v29 }
 0x94f   :  { %5255 = vmatmul.msk.bf16.gmra.mxu2 %vm486_vm6, %v7742_v42  ;;  %4744 = vst [vmem:[#allocation2 + $0x48] sm:$0xff] %v4712_v35  ;;  %v3659_v42 = vmax.f32 %v7617_v8, %v3565_v60  ;;  %v4170_v60 = vmax.f32 %v3916_v21, %v4077_v27  ;;  %v3582_v25 = vpop.f32.mrf.mxu1  ;;  %v4172_v19 = vmax.f32 %v3918_v44, %v4082_v59  ;;  %v4621_v63 = vpop.permute.xlu0 %4620  ;;  %v8449_v35 = vld [vmem:[#allocation9_spill] sm:$0xff] }
 0x950   :  { %v4173_v59 = vmax.f32 %v3919_v55, %v4085_v32  ;;  %v8455_v21 = vld [vmem:[#allocation81_spill] sm:$0xff] }
 0x951   :  { %v3915_v26 = vmax.f32 %v3659_v42, %v3821_v0  ;;  %v4087_v0 = vpop.f32.mrf.mxu0 }
 0x952   :  { %v4328_v52 = vpop.f32.mrf.mxu2 }
 0x953   :  { %v4425_v12 = vmax.f32 %v4167_v31, %v4328_v52  ;;  %v4169_v15 = vmax.f32 %v3915_v26, %v8053_v16  ;;  %v3838_v62 = vpop.f32.mrf.mxu3  ;;  %v8450_v31 = vld [vmem:[#allocation70_spill] sm:$0xff]  ;;  %v4631_v26 = vpop.permute.xlu2 %4630 }
 0x955   :  { %v4713_v45 = vadd.f32 %v4596_v58, %v4425_v12 }
 0x957   :  { %4745 = vst [vmem:[#allocation2 + $0x50] sm:$0xff] %v4713_v45  ;;  %v3585_v38 = vpop.f32.mrf.mxu1 }
 0x959   :  { %v4090_v33 = vpop.f32.mrf.mxu0 }
 0x95a   :  { %v4330_v53 = vpop.f32.mrf.mxu2 }
 0x95b   :  { %v4426_v10 = vmax.f32 %v4168_v20, %v4330_v53  ;;  %v4626_v20 = vpop.permute.xlu1 %4625  ;;  %v3841_v42 = vpop.f32.mrf.mxu3 }
 0x95d   :  { %v4714_v4 = vadd.f32 %v4601_v5, %v4426_v10 }
 0x95f   :  { %5256 = vmatmul.msk.bf16.gmra.mxu2 %vm486_vm6, %v7786_v11  ;;  %4746 = vst [vmem:[#allocation2 + $0x58] sm:$0xff] %v4714_v4  ;;  %v8452_v4 = vld [vmem:[#allocation12_spill] sm:$0xff] }
 0x961   :  { %v4092_v34 = vpop.f32.mrf.mxu0 }
 0x962   :  { %v4333_v13 = vpop.f32.mrf.mxu2 }
 0x963   :  { %v4427_v49 = vmax.f32 %v4169_v15, %v4333_v13 }
 0x965   :  { %v4715_v8 = vadd.f32 %v4606_v3, %v4427_v49  ;;  %v3587_v3 = vpop.f32.mrf.mxu1  ;;  %v3843_v49 = vpop.f32.mrf.mxu3 }
 0x967   :  { %4747 = vst [vmem:[#allocation2 + $0x60] sm:$0xff] %v4715_v8 }
 0x969   :  { %v4095_v22 = vpop.f32.mrf.mxu0 }
 0x96a   :  { %v4335_v7 = vpop.f32.mrf.mxu2 }
 0x96b   :  { %v4428_v11 = vmax.f32 %v4170_v60, %v4335_v7 }
 0x96d   :  { %v4716_v16 = vadd.f32 %v4611_v57, %v4428_v11  ;;  %v4636_v11 = vpop.permute.xlu0 %4635 }
 0x96f   :  { %5257 = vmatmul.msk.bf16.gmra.mxu2 %vm486_vm6, %v7830_v6  ;;  %4748 = vst [vmem:[#allocation2 + $0x68] sm:$0xff] %v4716_v16  ;;  %v8451_v6 = vmax.f32 %v8449_v35, %v8450_v31  ;;  %v3590_v16 = vpop.f32.mrf.mxu1  ;;  %v8461_v35 = vld [vmem:[#allocation8_spill] sm:$0xff] }
 0x971   :  { %v2900_v52 = vmax.f32 %v8451_v6, %v7234_v2 }
 0x972   :  { %v4338_v23 = vpop.f32.mrf.mxu2 }
 0x973   :  { %v4429_v27 = vmax.f32 %v4171_v48, %v4338_v23  ;;  %v3154_v29 = vmax.f32 %v2900_v52, %v7171_v18  ;;  %v8453_v18 = vld [vmem:[#allocation76_spill] sm:$0xff]  ;;  %v8456_v48 = vld [vmem:[#allocation6_spill] sm:$0xff] }
 0x974   :  { %v8454_v15 = vmax.f32 %v8452_v4, %v8453_v18  ;;  %v8457_v23 = vld [vmem:[#allocation16_spill] sm:$0xff]  ;;  %v8467_v18 = vld [vmem:[#allocation10_spill] sm:$0xff] }
 0x975   :  { %v4717_v50 = vadd.f32 %v4616_v61, %v4429_v27  ;;  %v3408_v12 = vmax.f32 %v3154_v29, %v7695_v28  ;;  %v3665_v28 = vmax.f32 %v7722_v17, %v3580_v46  ;;  %v3846_v17 = vpop.f32.mrf.mxu3  ;;  %v8458_v61 = vld [vmem:[#allocation80_spill] sm:$0xff] }
 0x976   :  { %v2902_v13 = vmax.f32 %v8454_v15, %v7269_v43  ;;  %v8459_v56 = vmax.f32 %v8457_v23, %v8458_v61 }
 0x977   :  { %4749 = vst [vmem:[#allocation2 + $0x70] sm:$0xff] %v4717_v50  ;;  %v3664_v53 = vmax.f32 %v3408_v12, %v3577_v47  ;;  %v3921_v9 = vmax.f32 %v3665_v28, %v3836_v14  ;;  %v4641_v50 = vpop.permute.xlu1 %4640  ;;  %v8468_v28 = vld [vmem:[#allocation17_spill] sm:$0xff] }
 0x978   :  { %v2904_v27 = vmax.f32 %v8459_v56, %v8456_v48 }
 0x979   :  { %v3920_v10 = vmax.f32 %v3664_v53, %v3833_v54  ;;  %v3156_v54 = vmax.f32 %v2902_v13, %v8455_v21  ;;  %v4175_v60 = vmax.f32 %v3921_v9, %v4090_v33  ;;  %v8464_v53 = vld [vmem:[#allocation14_spill] sm:$0xff] }
 0x97a   :  { %v4340_v30 = vpop.f32.mrf.mxu2 }
 0x97b   :  { %v4430_v58 = vmax.f32 %v4172_v19, %v4340_v30  ;;  %v4174_v24 = vmax.f32 %v3920_v10, %v4087_v0  ;;  %v3410_v8 = vmax.f32 %v3156_v54, %v7737_v1  ;;  %v4097_v0 = vpop.f32.mrf.mxu0  ;;  %v3667_v1 = vmax.f32 %v7764_v40, %v3585_v38  ;;  %v8460_v30 = vld [vmem:[#allocation29_spill] sm:$0xff]  ;;  %v8466_v10 = vld [vmem:[#allocation34_spill] sm:$0xff] }
 0x97d   :  { %v4718_v41 = vadd.f32 %v4621_v63, %v4430_v58  ;;  %v3666_v57 = vmax.f32 %v3410_v8, %v3582_v25  ;;  %v3923_v25 = vmax.f32 %v3667_v1, %v3841_v42  ;;  %v3592_v63 = vpop.f32.mrf.mxu1  ;;  %v3848_v52 = vpop.f32.mrf.mxu3  ;;  %v8474_v1 = vld [vmem:[#allocation28_spill] sm:$0xff] }
 0x97f   :  { %4750 = vst [vmem:[#allocation2 + $0x78] sm:$0xff] %v4718_v41  ;;  %v3922_v37 = vmax.f32 %v3666_v57, %v3838_v62  ;;  %v3158_v62 = vmax.f32 %v2904_v27, %v8460_v30  ;;  %v4177_v6 = vmax.f32 %v3923_v25, %v4095_v22  ;;  %v4646_v41 = vpop.permute.xlu2 %4645  ;;  %v4656_v54 = vpop.permute.xlu1 %4655 }
 0x981   :  { %v4176_v46 = vmax.f32 %v3922_v37, %v4092_v34  ;;  %v3412_v31 = vmax.f32 %v3158_v62, %v8461_v35  ;;  %v8470_v37 = vld [vmem:[#allocation5_spill] sm:$0xff] }
 0x982   :  { %v4343_v45 = vpop.f32.mrf.mxu2 }
 0x983   :  { %v4431_v5 = vmax.f32 %v4173_v59, %v4343_v45  ;;  %v4100_v44 = vpop.f32.mrf.mxu0  ;;  %v3668_v58 = vmax.f32 %v3412_v31, %v3587_v3  ;;  %v8462_v45 = vld [vmem:[#allocation33_spill] sm:$0xff] }
 0x985   :  { %v4719_v2 = vadd.f32 %v4626_v20, %v4431_v5  ;;  %v3924_v34 = vmax.f32 %v3668_v58, %v3843_v49  ;;  %v3595_v38 = vpop.f32.mrf.mxu1  ;;  %v8463_v20 = vld [vmem:[#allocation22_spill] sm:$0xff] }
 0x986   :  { %v8465_v5 = vmax.f32 %v8463_v20, %v8464_v53 }
 0x987   :  { %4751 = vst [vmem:[#allocation2 + $0x80] sm:$0xff] %v4719_v2  ;;  %v4178_v12 = vmax.f32 %v3924_v34, %v4097_v0  ;;  %v3669_v2 = vmax.f32 %v8466_v10, %v3590_v16  ;;  %v4661_v23 = vpop.permute.xlu2 %4660  ;;  %v8476_v34 = vld [vmem:[#allocation15_spill] sm:$0xff]  ;;  %v4671_v53 = vpop.permute.xlu1 %4670 }
 0x988   :  { %v2906_v42 = vmax.f32 %v8465_v5, %v8462_v45 }
 0x98a   :  { %v4345_v36 = vpop.f32.mrf.mxu2  ;;  %v3160_v15 = vmax.f32 %v2906_v42, %v8467_v18 }
 0x98b   :  { %v4432_v32 = vmax.f32 %v4174_v24, %v4345_v36  ;;  %v4102_v40 = vpop.f32.mrf.mxu0  ;;  %v3851_v24 = vpop.f32.mrf.mxu3 }
 0x98c   :  { %v4651_v36 = vpop.permute.xlu0 %4650 }
 0x98d   :  { %v4720_v47 = vadd.f32 %v4631_v26, %v4432_v32  ;;  %v3925_v26 = vmax.f32 %v3669_v2, %v3846_v17  ;;  %v3414_v32 = vmax.f32 %v3160_v15, %v8468_v28  ;;  %v3597_v21 = vpop.f32.mrf.mxu1  ;;  %v8481_v2 = vld [vmem:[#allocation32_spill] sm:$0xff] }
 0x98f   :  { %4752 = vst [vmem:[#allocation2 + $0x88] sm:$0xff] %v4720_v47  ;;  %v4179_v3 = vmax.f32 %v3925_v26, %v4100_v44  ;;  %v3670_v47 = vmax.f32 %v3414_v32, %v3592_v63  ;;  %v4676_v32 = vpop.permute.xlu2 %4675 }
 0x991   :  { %v3926_v8 = vmax.f32 %v3670_v47, %v3848_v52 }
 0x992   :  { %v4348_v7 = vpop.f32.mrf.mxu2 }
 0x993   :  { %v4433_v39 = vmax.f32 %v4175_v60, %v4348_v7  ;;  %v4105_v13 = vpop.f32.mrf.mxu0  ;;  %v3853_v0 = vpop.f32.mrf.mxu3  ;;  %v4180_v7 = vmax.f32 %v3926_v8, %v4102_v40  ;;  %v8478_v40 = vld [vmem:[#allocation7_spill] sm:$0xff] }
 0x994   :  { %v4666_v31 = vpop.permute.xlu0 %4665 }
 0x995   :  { %v4721_v43 = vadd.f32 %v4636_v11, %v4433_v39  ;;  %v8469_v11 = vld [vmem:[#allocation11_spill] sm:$0xff]  ;;  %v3600_v27 = vpop.f32.mrf.mxu1 }
 0x997   :  { %4753 = vst [vmem:[#allocation2 + $0x90] sm:$0xff] %v4721_v43  ;;  %v8471_v43 = vld [vmem:[#allocation23_spill] sm:$0xff] }
 0x998   :  { %v8472_v16 = vmax.f32 %v8470_v37, %v8471_v43  ;;  %v3388_v37 = vld [vmem:[#allocation2 + $0xe8] sm:$0xff]  ;;  %v8484_v43 = vld [vmem:[#allocation25_spill] sm:$0xff] }
 0x99a   :  { %v4350_v14 = vpop.f32.mrf.mxu2  ;;  %v2908_v17 = vmax.f32 %v8472_v16, %v8469_v11  ;;  %v3420_v16 = vmax.f32 %v3388_v37, %v8484_v43 }
 0x99b   :  { %v4434_v33 = vmax.f32 %v4176_v46, %v4350_v14  ;;  %v4107_v57 = vpop.f32.mrf.mxu0  ;;  %v8473_v46 = vld [vmem:[#allocation19_spill] sm:$0xff]  ;;  %v3856_v44 = vpop.f32.mrf.mxu3 }
 0x99c   :  { %v3671_v14 = vmax.f32 %v8473_v46, %v3595_v38 }
 0x99d   :  { %v4722_v19 = vadd.f32 %v4641_v50, %v4434_v33  ;;  %v3162_v33 = vmax.f32 %v2908_v17, %v8474_v1  ;;  %v8475_v50 = vld [vmem:[#allocation13_spill] sm:$0xff] }
 0x99e   :  { %v3927_v61 = vmax.f32 %v3671_v14, %v3851_v24  ;;  %v8482_v24 = vld [vmem:[#allocation20_spill] sm:$0xff] }
 0x99f   :  { %4754 = vst [vmem:[#allocation2 + $0x98] sm:$0xff] %v4722_v19  ;;  %v3416_v25 = vmax.f32 %v3162_v33, %v8475_v50  ;;  %v3389_v33 = vld [vmem:[#allocation2 + $0xf0] sm:$0xff] }
 0x9a0   :  { %v4181_v19 = vmax.f32 %v3927_v61, %v4105_v13  ;;  %v4686_v61 = vpop.permute.xlu1 %4685  ;;  %v8485_v50 = vld [vmem:[#allocation31_spill] sm:$0xff] }
 0x9a1   :  { %v3672_v62 = vmax.f32 %v3416_v25, %v3597_v21  ;;  %v3421_v25 = vmax.f32 %v3389_v33, %v8485_v50 }
 0x9a2   :  { %v4353_v51 = vpop.f32.mrf.mxu2 }
 0x9a3   :  { %v4435_v55 = vmax.f32 %v4177_v6, %v4353_v51  ;;  %v4110_v35 = vpop.f32.mrf.mxu0  ;;  %v3928_v6 = vmax.f32 %v3672_v62, %v3853_v0  ;;  %v3602_v51 = vpop.f32.mrf.mxu1 }
 0x9a5   :  { %v4723_v29 = vadd.f32 %v4646_v41, %v4435_v55  ;;  %v4182_v58 = vmax.f32 %v3928_v6, %v4107_v57  ;;  %v3858_v55 = vpop.f32.mrf.mxu3 }
 0x9a7   :  { %4755 = vst [vmem:[#allocation2 + $0xa0] sm:$0xff] %v4723_v29  ;;  %v8477_v29 = vld [vmem:[#allocation26_spill] sm:$0xff] }
 0x9aa   :  { %v4355_v59 = vpop.f32.mrf.mxu2 }
 0x9ab   :  { %v4436_v22 = vmax.f32 %v4178_v12, %v4355_v59  ;;  %v8479_v12 = vmax.f32 %v8477_v29, %v8478_v40  ;;  %v8480_v59 = vld [vmem:[#allocation24_spill] sm:$0xff]  ;;  %v4112_v10 = vpop.f32.mrf.mxu0 }
 0x9ac   :  { %v3673_v45 = vmax.f32 %v8480_v59, %v3600_v27 }
 0x9ad   :  { %v4724_v4 = vadd.f32 %v4651_v36, %v4436_v22  ;;  %v2910_v38 = vmax.f32 %v8479_v12, %v8476_v34  ;;  %v3861_v28 = vpop.f32.mrf.mxu3 }
 0x9ae   :  { %v3929_v5 = vmax.f32 %v3673_v45, %v3856_v44 }
 0x9af   :  { %4756 = vst [vmem:[#allocation2 + $0xa8] sm:$0xff] %v4724_v4  ;;  %v3164_v22 = vmax.f32 %v2910_v38, %v8481_v2  ;;  %v3605_v4 = vpop.f32.mrf.mxu1  ;;  %v4701_v2 = vpop.permute.xlu1 %4700 }
 0x9b0   :  { %v4183_v26 = vmax.f32 %v3929_v5, %v4110_v35 }
 0x9b1   :  { %v3418_v36 = vmax.f32 %v3164_v22, %v8482_v24 }
 0x9b2   :  { %v4358_v9 = vpop.f32.mrf.mxu2 }
 0x9b3   :  { %v4437_v49 = vmax.f32 %v4179_v3, %v4358_v9  ;;  %v3674_v15 = vmax.f32 %v3418_v36, %v3602_v51  ;;  %v4115_v47 = vpop.f32.mrf.mxu0  ;;  %v3390_v51 = vld [vmem:[#allocation2 + $0xf8] sm:$0xff] }
 0x9b5   :  { %v4725_v60 = vadd.f32 %v4656_v54, %v4437_v49  ;;  %v3930_v3 = vmax.f32 %v3674_v15, %v3858_v55  ;;  %v8483_v54 = vld [vmem:[#allocation27_spill] sm:$0xff]  ;;  %v3863_v11 = vpop.f32.mrf.mxu3  ;;  %v8486_v55 = vld [vmem:[#allocation30_spill] sm:$0xff] }
 0x9b6   :  { %v3675_v8 = vmax.f32 %v8483_v54, %v3605_v4 }
 0x9b7   :  { %4757 = vst [vmem:[#allocation2 + $0xb0] sm:$0xff] %v4725_v60  ;;  %v4184_v49 = vmax.f32 %v3930_v3, %v4112_v10  ;;  %v3607_v0 = vpop.f32.mrf.mxu1 }
 0x9b8   :  { %v3931_v57 = vmax.f32 %v3675_v8, %v3861_v28 }
 0x9ba   :  { %v4360_v39 = vpop.f32.mrf.mxu2  ;;  %v4185_v17 = vmax.f32 %v3931_v57, %v4115_v47 }
 0x9bb   :  { %v4438_v48 = vmax.f32 %v4180_v7, %v4360_v39  ;;  %v4681_v7 = vpop.permute.xlu0 %4680  ;;  %v4117_v46 = vpop.f32.mrf.mxu0 }
 0x9bd   :  { %v4726_v56 = vadd.f32 %v4661_v23, %v4438_v48  ;;  %v3676_v48 = vmax.f32 %v3420_v16, %v3607_v0  ;;  %v3866_v44 = vpop.f32.mrf.mxu3 }
 0x9bf   :  { %4758 = vst [vmem:[#allocation2 + $0xb8] sm:$0xff] %v4726_v56  ;;  %v3932_v56 = vmax.f32 %v3676_v48, %v3863_v11  ;;  %v3610_v1 = vpop.f32.mrf.mxu1 }
 0x9c0   :  { %v3677_v62 = vmax.f32 %v3421_v25, %v3610_v1 }
 0x9c2   :  { %v4363_v30 = vpop.f32.mrf.mxu2  ;;  %v3933_v6 = vmax.f32 %v3677_v62, %v3866_v44 }
 0x9c3   :  { %v4439_v63 = vmax.f32 %v4181_v19, %v4363_v30  ;;  %v4186_v19 = vmax.f32 %v3932_v56, %v4117_v46  ;;  %v4120_v35 = vpop.f32.mrf.mxu0  ;;  %v4696_v59 = vpop.permute.xlu0 %4695 }
 0x9c4   :  { %v4187_v34 = vmax.f32 %v3933_v6, %v4120_v35 }
 0x9c5   :  { %v4727_v52 = vadd.f32 %v4666_v31, %v4439_v63  ;;  %v4691_v31 = vpop.permute.xlu2 %4690  ;;  %v3868_v29 = vpop.f32.mrf.mxu3 }
 0x9c7   :  { %4759 = vst [vmem:[#allocation2 + $0xc0] sm:$0xff] %v4727_v52 }
 0x9ca   :  { %v4365_v41 = vpop.f32.mrf.mxu2 }
 0x9cb   :  { %v4440_v20 = vmax.f32 %v4182_v58, %v4365_v41  ;;  %v3612_v58 = vpop.f32.mrf.mxu1  ;;  %v3422_v41 = vmax.f32 %v3390_v51, %v8486_v55 }
 0x9cd   :  { %v4728_v42 = vadd.f32 %v4671_v53, %v4440_v20  ;;  %v3678_v12 = vmax.f32 %v3422_v41, %v3612_v58  ;;  %v4122_v53 = vpop.f32.mrf.mxu0 }
 0x9cf   :  { %4760 = vst [vmem:[#allocation2 + $0xc8] sm:$0xff] %v4728_v42  ;;  %v3934_v45 = vmax.f32 %v3678_v12, %v3868_v29 }
 0x9d1   :  { %v4188_v5 = vmax.f32 %v3934_v45, %v4122_v53 }
 0x9d2   :  { %v4368_v18 = vpop.f32.mrf.mxu2 }
 0x9d3   :  { %v4441_v13 = vmax.f32 %v4183_v26, %v4368_v18 }
 0x9d5   :  { %v4729_v9 = vadd.f32 %v4676_v32, %v4441_v13 }
 0x9d7   :  { %4761 = vst [vmem:[#allocation2 + $0xd0] sm:$0xff] %v4729_v9 }
 0x9da   :  { %v4370_v21 = vpop.f32.mrf.mxu2 }
 0x9db   :  { %v4442_v60 = vmax.f32 %v4184_v49, %v4370_v21 }
 0x9dd   :  { %v4730_v39 = vadd.f32 %v4681_v7, %v4442_v60 }
 0x9df   :  { %4762 = vst [vmem:[#allocation2 + $0xd8] sm:$0xff] %v4730_v39 }
 0x9e2   :  { %v4373_v14 = vpop.f32.mrf.mxu2 }
 0x9e3   :  { %v4443_v23 = vmax.f32 %v4185_v17, %v4373_v14 }
 0x9e5   :  { %v4731_v27 = vadd.f32 %v4686_v61, %v4443_v23 }
 0x9e7   :  { %4763 = vst [vmem:[#allocation2 + $0xe0] sm:$0xff] %v4731_v27 }
 0x9ea   :  { %v4375_v30 = vpop.f32.mrf.mxu2 }
 0x9eb   :  { %v4444_v63 = vmax.f32 %v4186_v19, %v4375_v30 }
 0x9ed   :  { %v4732_v52 = vadd.f32 %v4691_v31, %v4444_v63 }
 0x9ef   :  { %4764 = vst [vmem:[#allocation2 + $0xe8] sm:$0xff] %v4732_v52 }
 0x9f2   :  { %v4378_v40 = vpop.f32.mrf.mxu2 }
 0x9f3   :  { %v4445_v38 = vmax.f32 %v4187_v34, %v4378_v40 }
 0x9f5   :  { %v4733_v20 = vadd.f32 %v4696_v59, %v4445_v38 }
 0x9f7   :  { %4765 = vst [vmem:[#allocation2 + $0xf0] sm:$0xff] %v4733_v20 }
 0x9fa   :  { %v4380_v42 = vpop.f32.mrf.mxu2 }
 0x9fb   :  { %v4446_v10 = vmax.f32 %v4188_v5, %v4380_v42 }
 0x9fd   :  { %v4734_v22 = vadd.f32 %v4701_v2, %v4446_v10 }
 0x9ff   :  { %4766 = vst [vmem:[#allocation2 + $0xf8] sm:$0xff] %v4734_v22 }
 0xa00   :  { %4779 = dma.vmem_to_hbm [thread:$0]  %s4772_s20, 4096, %s4774_s0, [#allocation3], %s5411_s23, %s5411_s23, %s5412_s24  }
 0xa01   :  { %5405 = dma.done.wait [#allocation3], 4096  }
 0xa02   :  { %5406 = vsyncadd [#allocation3], 4294963200 }
 0xa03   :  { %4784 = vsyncpa [#allocation3], 1 }

</bundles_post_ra>
